<compile_context>
chip_gen: v5e
topology: v5e:2x2
jax: 0.10.0
libtpu: 0.0.40
codegen_flags: <defaults>
</compile_context>

<pallas_src>
import functools

import jax
import jax.numpy as jnp
from jax import lax
from jax.experimental import pallas as pl
from jax.experimental.pallas import tpu as pltpu

LN_EPS = 1e-5          # PyTorch nn.LayerNorm default
MASK_VALUE = -1e30     # additive causal mask; exp() underflows to exactly 0


# --------------------------------------------------------------------------- #
# In-kernel helpers
# --------------------------------------------------------------------------- #

def _layernorm(x, gamma, beta):
    """LayerNorm over the last axis in f32; affine params are (1, C)."""
    mu = jnp.mean(x, axis=-1, keepdims=True)
    xc = x - mu
    var = jnp.mean(xc * xc, axis=-1, keepdims=True)
    return xc * lax.rsqrt(var + LN_EPS) * gamma + beta


def _mha(xq, xkv, wq, wk, wv, wp, bp, *, num_heads, bias):
    """All-heads attention + output projection for one batch element.

    xq / xkv are (T, C) bf16; wq has the softmax scale (C**-0.5) pre-folded.
    Returns the (Tq, C) f32 projected attention output (pre-residual).
    """
    # Full-width projections, bf16 in / f32 accumulate (pre-transposed weights).
    q = jnp.dot(xq, wq, preferred_element_type=jnp.float32)      # (Tq, C)
    k = jnp.dot(xkv, wk, preferred_element_type=jnp.float32)     # (Tk, C)
    v = jnp.dot(xkv, wv, preferred_element_type=jnp.float32)     # (Tk, C)
    tq, c = q.shape
    tk = k.shape[0]
    hs = c // num_heads

    # One relayout per tensor to a head-batched (H, T, hs) view; the per-head
    # matmuls then run as single batched dots (MXU pushes stream back-to-back,
    # no per-head lane slices, no lane concat).
    qh = pltpu.einshape("qhd->hqd", q.astype(jnp.bfloat16).reshape(tq, num_heads, hs))
    kh = pltpu.einshape("khd->hkd", k.astype(jnp.bfloat16).reshape(tk, num_heads, hs))
    vh = pltpu.einshape("khd->hkd", v.astype(jnp.bfloat16).reshape(tk, num_heads, hs))

    s = jnp.einsum("hqd,hkd->hqk", qh, kh,
                   preferred_element_type=jnp.float32)           # (H, Tq, Tk) f32
    if bias is not None:
        s = s + bias[None, :, :]                                 # causal additive mask
    m = jnp.max(s, axis=-1, keepdims=True)                       # f32 softmax
    e = jnp.exp(s - m)
    p = e * pl.reciprocal(jnp.sum(e, axis=-1, keepdims=True), approx=True)
    ctx = jnp.einsum("hqk,hkd->hqd", p.astype(jnp.bfloat16), vh,
                     preferred_element_type=jnp.float32)         # (H, Tq, hs)
    # Back to a lane-dense (Tq, C) slab for the output projection.
    ctx = pltpu.einshape("hqd->qhd", ctx.astype(jnp.bfloat16)).reshape(tq, c)

    return jnp.dot(ctx, wp, preferred_element_type=jnp.float32) + bp
    # TODO(synk): attention-weight / projection dropout are identity (eval mode).


# --------------------------------------------------------------------------- #
# Fused decoder-stack kernel: all layers, all sub-blocks, per batch element
# --------------------------------------------------------------------------- #

def _decoder_stack_kernel(x_ref, enc_ref,
                          ln1g_ref, ln1b_ref, wq1_ref, wk1_ref, wv1_ref, wp1_ref,
                          bp1_ref,
                          ln2g_ref, ln2b_ref, wq2_ref, wk2_ref, wv2_ref, wp2_ref,
                          bp2_ref,
                          ln3g_ref, ln3b_ref, wf1_ref, bf1_ref, wf2_ref, bf2_ref,
                          o_ref, *, num_heads):
    # Layer 0: initialize the residual stream from the embedding output.  The output
    # block's index_map depends only on b, so it stays VMEM-resident across the layer
    # axis and carries the residual stream between layers with no HBM round trips.
    @pl.when(pl.program_id(1) == 0)
    def _():
        o_ref[...] = x_ref[...]

    x = o_ref[0]                                       # (T, C) f32 residual stream
    enc = enc_ref[0].astype(jnp.bfloat16)              # (T_enc, C)
    t_q = x.shape[0]

    # Causal additive mask, built once per step and broadcast over all heads.
    row = lax.broadcasted_iota(jnp.int32, (t_q, t_q), 0)
    col = lax.broadcasted_iota(jnp.int32, (t_q, t_q), 1)
    causal_bias = jnp.where(col <= row, 0.0, MASK_VALUE).astype(jnp.float32)

    # --- x = x + MaskedMultiHeadAttention(LN1(x))  [causal self-attention] ---
    xn = _layernorm(x, ln1g_ref[0], ln1b_ref[0]).astype(jnp.bfloat16)
    x = x + _mha(xn, xn, wq1_ref[0], wk1_ref[0], wv1_ref[0], wp1_ref[0],
                 bp1_ref[0], num_heads=num_heads, bias=causal_bias)

    # --- x = x + CrossMultiHeadAttention(LN2(x), encoder_output) ---
    xn = _layernorm(x, ln2g_ref[0], ln2b_ref[0]).astype(jnp.bfloat16)
    x = x + _mha(xn, enc, wq2_ref[0], wk2_ref[0], wv2_ref[0], wp2_ref[0],
                 bp2_ref[0], num_heads=num_heads, bias=None)

    # --- x = x + FFN(LN3(x)) ---
    xn = _layernorm(x, ln3g_ref[0], ln3b_ref[0]).astype(jnp.bfloat16)
    h = jnp.dot(xn, wf1_ref[0], preferred_element_type=jnp.float32) + bf1_ref[0]
    h = jnp.maximum(h, 0.0).astype(jnp.bfloat16)       # ReLU
    y = jnp.dot(h, wf2_ref[0], preferred_element_type=jnp.float32) + bf2_ref[0]
    # TODO(synk): FFN dropout is identity (eval mode).

    o_ref[0] = x + y


def _decoder_stack(x_emb, encoder_output, w, *, num_heads):
    B, T, C = x_emb.shape
    T_enc = encoder_output.shape[1]
    L = w["wq1"].shape[0]
    Ch = w["w_ff1"].shape[-1]

    def xmap(b, l):        # activation blocks: depend on batch only (resident over l)
        return (b, 0, 0)

    def wmap(b, l):        # stacked per-layer weights: depend on layer only
        return (l, 0, 0)

    act = lambda t: pl.BlockSpec((1, t, C), xmap)
    wsp = lambda s: pl.BlockSpec((1,) + s, wmap)

    in_specs = [
        act(T),                                              # embedding output
        act(T_enc),                                          # encoder output
        wsp((1, C)), wsp((1, C)),                            # ln1 gamma/beta
        wsp((C, C)), wsp((C, C)), wsp((C, C)), wsp((C, C)), wsp((1, C)),   # self-attn
        wsp((1, C)), wsp((1, C)),                            # ln2 gamma/beta
        wsp((C, C)), wsp((C, C)), wsp((C, C)), wsp((C, C)), wsp((1, C)),   # cross-attn
        wsp((1, C)), wsp((1, C)),                            # ln3 gamma/beta
        wsp((C, Ch)), wsp((1, Ch)), wsp((Ch, C)), wsp((1, C)),             # FFN
    ]
    inputs = [
        x_emb, encoder_output,
        w["ln1_g"], w["ln1_b"], w["wq1"], w["wk1"], w["wv1"], w["wp1"], w["bp1"],
        w["ln2_g"], w["ln2_b"], w["wq2"], w["wk2"], w["wv2"], w["wp2"], w["bp2"],
        w["ln3_g"], w["ln3_b"], w["w_ff1"], w["b_ff1"], w["w_ff2"], w["b_ff2"],
    ]

    # Explicit VMEM budget: double-buffered stacked layer weights + activation blocks
    # + attention temporaries, with headroom (review: don't hard-code 32 MiB).
    weight_bytes = 2 * (8 * C * C + 2 * C * Ch)              # bf16 weights / layer
    param_bytes = 4 * (9 * C + Ch)                           # f32 LN/bias params
    act_bytes = 4 * (2 * T * C + T_enc * C)                  # in/out/enc blocks
    tmp_bytes = 4 * (num_heads * T * max(T, T_enc) + 6 * T * C + T * Ch)
    vmem_limit = int(min(max(2 * (weight_bytes + param_bytes + act_bytes)
                             + 2 * tmp_bytes + (8 << 20), 32 << 20), 96 << 20))

    flops = B * L * (8 * T * C * C + 4 * T * T * C
                     + 4 * T * C * C + 4 * T_enc * C * C + 4 * T * T_enc * C
                     + 4 * T * C * Ch)
    transcendentals = B * L * num_heads * (T * T + T * T_enc)
    bytes_accessed = (4 * B * (2 * T * C + T_enc * C)
                      + B * L * (weight_bytes + param_bytes))

    kernel = functools.partial(_decoder_stack_kernel, num_heads=num_heads)
    return pl.pallas_call(
        kernel,
        out_shape=jax.ShapeDtypeStruct((B, T, C), jnp.float32),
        grid_spec=pltpu.PrefetchScalarGridSpec(
            num_scalar_prefetch=0,
            grid=(B, L),                       # batch parallel; layers sequential
            in_specs=in_specs,
            out_specs=pl.BlockSpec((1, T, C), xmap),
        ),
        compiler_params=pltpu.CompilerParams(
            dimension_semantics=("parallel", "arbitrary"),
            vmem_limit_bytes=vmem_limit),
        cost_estimate=pl.CostEstimate(flops=flops,
                                      transcendentals=transcendentals,
                                      bytes_accessed=bytes_accessed),
    )(*inputs)


# --------------------------------------------------------------------------- #
# Parameter preparation (one-time) + full forward wrapper
# --------------------------------------------------------------------------- #

def prepare_decoder_params(params):
    """Stack per-layer weights to (L, ...), fold softmax scale into wq (in f32),
    and cast matmul weights to bf16 ONCE (no per-forward casts / weight re-reads)."""
    C = params["tok_emb"].shape[1]
    scale = float(C) ** -0.5      # PyTorch Head scales by n_embd (C), not head_size
    layers = params["layers"]

    def stack(key, *, bf16=False, scaled=False):
        arr = jnp.stack([lp[key] for lp in layers])
        if scaled:
            arr = arr * scale
        return arr.astype(jnp.bfloat16) if bf16 else arr

    return {
        "tok_emb": params["tok_emb"],
        "pos_emb": params["pos_emb"],
        "ln1_g": stack("ln1_g"), "ln1_b": stack("ln1_b"),
        "wq1": stack("wq1", bf16=True, scaled=True),
        "wk1": stack("wk1", bf16=True), "wv1": stack("wv1", bf16=True),
        "wp1": stack("wp1", bf16=True), "bp1": stack("bp1"),
        "ln2_g": stack("ln2_g"), "ln2_b": stack("ln2_b"),
        "wq2": stack("wq2", bf16=True, scaled=True),
        "wk2": stack("wk2", bf16=True), "wv2": stack("wv2", bf16=True),
        "wp2": stack("wp2", bf16=True), "bp2": stack("bp2"),
        "ln3_g": stack("ln3_g"), "ln3_b": stack("ln3_b"),
        "w_ff1": stack("w_ff1", bf16=True), "b_ff1": stack("b_ff1"),
        "w_ff2": stack("w_ff2", bf16=True), "b_ff2": stack("b_ff2"),
    }


def decoder_forward(encoder_output, decoder_input, prepared, *, n_head):
    """Forward pass of the PyTorch `Decoder` module (eval mode).

    encoder_output: (B, T_enc, C) f32; decoder_input: (B, T) int token ids.
    """
    T = decoder_input.shape[1]
    # Embedding gather + positional add outside Pallas (a pure DMA gather beats an
    # in-kernel one-hot matmul and keeps the (V, C) table out of VMEM).
    x = jnp.take(prepared["tok_emb"], decoder_input.astype(jnp.int32), axis=0)
    x = x + prepared["pos_emb"][:T]
    return _decoder_stack(x, encoder_output, prepared, num_heads=n_head)


# --------------------------------------------------------------------------- #
# Pure-JAX reference (mirrors the PyTorch math in f32)
# --------------------------------------------------------------------------- #

def _layernorm_ref(x, g, b):
    mu = x.mean(axis=-1, keepdims=True)
    var = ((x - mu) ** 2).mean(axis=-1, keepdims=True)
    return (x - mu) / jnp.sqrt(var + LN_EPS) * g + b


def _mha_ref(xq, xkv, wq, wk, wv, wp, bp, n_head, causal):
    B, T, C = xq.shape
    t_kv = xkv.shape[1]
    hs = C // n_head
    scale = float(C) ** -0.5
    outs = []
    for h in range(n_head):
        sl = slice(h * hs, (h + 1) * hs)
        q = xq @ wq[:, sl]
        k = xkv @ wk[:, sl]
        v = xkv @ wv[:, sl]
        wei = (q @ jnp.swapaxes(k, -1, -2)) * scale
        if causal:
            mask = jnp.tril(jnp.ones((T, t_kv)))
            wei = jnp.where(mask == 0, -jnp.inf, wei)
        wei = jax.nn.softmax(wei, axis=-1)
        outs.append(wei @ v)
    return jnp.concatenate(outs, axis=-1) @ wp + bp


def decoder_ref(encoder_output, decoder_input, params, n_head):
    x = params["tok_emb"][decoder_input] + params["pos_emb"][:decoder_input.shape[1]]
    for lp in params["layers"]:
        xn = _layernorm_ref(x, lp["ln1_g"], lp["ln1_b"])
        x = x + _mha_ref(xn, xn, lp["wq1"], lp["wk1"], lp["wv1"],
                         lp["wp1"], lp["bp1"], n_head, True)
        xn = _layernorm_ref(x, lp["ln2_g"], lp["ln2_b"])
        x = x + _mha_ref(xn, encoder_output, lp["wq2"], lp["wk2"], lp["wv2"],
                         lp["wp2"], lp["bp2"], n_head, False)
        xn = _layernorm_ref(x, lp["ln3_g"], lp["ln3_b"])
        h = jnp.maximum(xn @ lp["w_ff1"] + lp["b_ff1"], 0.0)
        x = x + h @ lp["w_ff2"] + lp["b_ff2"]
    return x


# --------------------------------------------------------------------------- #
# Main
# --------------------------------------------------------------------------- #

if __name__ == "__main__":
    # Small config consistent with the module (real: n_embd=384, n_head=6,
    # block_size=256, n_layer=6), scaled down but kept TPU-lane-friendly.
    B, T, T_ENC = 2, 8, 8
    N_EMBD, N_HEAD, N_LAYER = 128, 4, 2
    VOCAB, BLOCK_SIZE = 64, 16

    key = jax.random.PRNGKey(0)
    k_tok, k_pos, k_enc, k_ids, k_layers = jax.random.split(key, 5)

    def u(k, shape, bnd):
        return jax.random.uniform(k, shape, minval=-bnd, maxval=bnd,
                                  dtype=jnp.float32)

    bound = 1.0 / (N_EMBD ** 0.5)
    bound_ff = 1.0 / ((4 * N_EMBD) ** 0.5)

    layers = []
    for lk_root in jax.random.split(k_layers, N_LAYER):
        lk = jax.random.split(lk_root, 20)
        layers.append({
            "ln1_g": 1.0 + u(lk[0], (1, N_EMBD), 0.1),
            "ln1_b": u(lk[1], (1, N_EMBD), 0.1),
            "wq1": u(lk[2], (N_EMBD, N_EMBD), bound),
            "wk1": u(lk[3], (N_EMBD, N_EMBD), bound),
            "wv1": u(lk[4], (N_EMBD, N_EMBD), bound),
            "wp1": u(lk[5], (N_EMBD, N_EMBD), bound),
            "bp1": u(lk[6], (1, N_EMBD), bound),
            "ln2_g": 1.0 + u(lk[7], (1, N_EMBD), 0.1),
            "ln2_b": u(lk[8], (1, N_EMBD), 0.1),
            "wq2": u(lk[9], (N_EMBD, N_EMBD), bound),
            "wk2": u(lk[10], (N_EMBD, N_EMBD), bound),
            "wv2": u(lk[11], (N_EMBD, N_EMBD), bound),
            "wp2": u(lk[12], (N_EMBD, N_EMBD), bound),
            "bp2": u(lk[13], (1, N_EMBD), bound),
            "ln3_g": 1.0 + u(lk[14], (1, N_EMBD), 0.1),
            "ln3_b": u(lk[15], (1, N_EMBD), 0.1),
            "w_ff1": u(lk[16], (N_EMBD, 4 * N_EMBD), bound),
            "b_ff1": u(lk[17], (1, 4 * N_EMBD), bound),
            "w_ff2": u(lk[18], (4 * N_EMBD, N_EMBD), bound_ff),
            "b_ff2": u(lk[19], (1, N_EMBD), bound_ff),
        })

    params = {
        "tok_emb": jax.random.normal(k_tok, (VOCAB, N_EMBD), dtype=jnp.float32),
        "pos_emb": jax.random.normal(k_pos, (BLOCK_SIZE, N_EMBD), dtype=jnp.float32),
        "layers": layers,
    }

    encoder_output = jax.random.normal(k_enc, (B, T_ENC, N_EMBD), dtype=jnp.float32)
    decoder_input = jax.random.randint(k_ids, (B, T), 0, VOCAB, dtype=jnp.int32)

    # One-time weight preparation (stacking + scale folding + bf16 cast).
    prepared = prepare_decoder_params(params)

    fwd = jax.jit(functools.partial(decoder_forward, n_head=N_HEAD))
    out = jax.block_until_ready(fwd(encoder_output, decoder_input, prepared))

    ref = jax.block_until_ready(
        decoder_ref(encoder_output, decoder_input, params, N_HEAD))

    assert out.shape == (B, T, N_EMBD)
    # bf16 MXU inputs (f32 accumulate) + approx reciprocal -> loose-ish tolerance
    assert jnp.allclose(out, ref, atol=5e-2, rtol=5e-2), (
        "mismatch vs reference: max abs err "
        f"{float(jnp.max(jnp.abs(out - ref)))}")

    print("KERNEL_OK")
</pallas_src>

<mosaic_0001>
module attributes {stable_mosaic.version = 11 : i64} {
  func.func @_decoder_stack_kernel(%arg0: i32, %arg1: i32, %arg2: memref<1x8x128xf32, #tpu.memory_space<vmem>>, %arg3: memref<1x8x128xf32, #tpu.memory_space<vmem>>, %arg4: memref<1x1x128xf32, #tpu.memory_space<vmem>>, %arg5: memref<1x1x128xf32, #tpu.memory_space<vmem>>, %arg6: memref<1x128x128xbf16, #tpu.memory_space<vmem>>, %arg7: memref<1x128x128xbf16, #tpu.memory_space<vmem>>, %arg8: memref<1x128x128xbf16, #tpu.memory_space<vmem>>, %arg9: memref<1x128x128xbf16, #tpu.memory_space<vmem>>, %arg10: memref<1x1x128xf32, #tpu.memory_space<vmem>>, %arg11: memref<1x1x128xf32, #tpu.memory_space<vmem>>, %arg12: memref<1x1x128xf32, #tpu.memory_space<vmem>>, %arg13: memref<1x128x128xbf16, #tpu.memory_space<vmem>>, %arg14: memref<1x128x128xbf16, #tpu.memory_space<vmem>>, %arg15: memref<1x128x128xbf16, #tpu.memory_space<vmem>>, %arg16: memref<1x128x128xbf16, #tpu.memory_space<vmem>>, %arg17: memref<1x1x128xf32, #tpu.memory_space<vmem>>, %arg18: memref<1x1x128xf32, #tpu.memory_space<vmem>>, %arg19: memref<1x1x128xf32, #tpu.memory_space<vmem>>, %arg20: memref<1x128x512xbf16, #tpu.memory_space<vmem>>, %arg21: memref<1x1x512xf32, #tpu.memory_space<vmem>>, %arg22: memref<1x512x128xbf16, #tpu.memory_space<vmem>>, %arg23: memref<1x1x128xf32, #tpu.memory_space<vmem>>, %arg24: memref<1x8x128xf32, #tpu.memory_space<vmem>>) attributes {dimension_semantics = [#tpu.dimension_semantics<parallel>, #tpu.dimension_semantics<arbitrary>], iteration_bounds = array<i64: 2, 2>, scalar_prefetch = 0 : i64, scratch_operands = 0 : i64, tpu.core_type = #tpu.core_type<tc>, window_params = [{transform_indices = @transform_0, window_bounds = array<i64: 1, 8, 128>}, {transform_indices = @transform_1, window_bounds = array<i64: 1, 8, 128>}, {transform_indices = @transform_2, window_bounds = array<i64: 1, 1, 128>}, {transform_indices = @transform_3, window_bounds = array<i64: 1, 1, 128>}, {transform_indices = @transform_4, window_bounds = array<i64: 1, 128, 128>}, {transform_indices = @transform_5, window_bounds = array<i64: 1, 128, 128>}, {transform_indices = @transform_6, window_bounds = array<i64: 1, 128, 128>}, {transform_indices = @transform_7, window_bounds = array<i64: 1, 128, 128>}, {transform_indices = @transform_8, window_bounds = array<i64: 1, 1, 128>}, {transform_indices = @transform_9, window_bounds = array<i64: 1, 1, 128>}, {transform_indices = @transform_10, window_bounds = array<i64: 1, 1, 128>}, {transform_indices = @transform_11, window_bounds = array<i64: 1, 128, 128>}, {transform_indices = @transform_12, window_bounds = array<i64: 1, 128, 128>}, {transform_indices = @transform_13, window_bounds = array<i64: 1, 128, 128>}, {transform_indices = @transform_14, window_bounds = array<i64: 1, 128, 128>}, {transform_indices = @transform_15, window_bounds = array<i64: 1, 1, 128>}, {transform_indices = @transform_16, window_bounds = array<i64: 1, 1, 128>}, {transform_indices = @transform_17, window_bounds = array<i64: 1, 1, 128>}, {transform_indices = @transform_18, window_bounds = array<i64: 1, 128, 512>}, {transform_indices = @transform_19, window_bounds = array<i64: 1, 1, 512>}, {transform_indices = @transform_20, window_bounds = array<i64: 1, 512, 128>}, {transform_indices = @transform_21, window_bounds = array<i64: 1, 1, 128>}, {transform_indices = @transform_22, window_bounds = array<i64: 1, 8, 128>}]} {
    %c0_i32 = arith.constant 0 : i32
    %0 = arith.cmpi eq, %arg1, %c0_i32 : i32
    %1 = arith.extui %0 : i1 to i32
    %c0_i32_0 = arith.constant 0 : i32
    %2 = arith.cmpi ne, %1, %c0_i32_0 : i32
    scf.if %2 {
      %c0_104 = arith.constant 0 : index
      %c0_105 = arith.constant 0 : index
      %c0_106 = arith.constant 0 : index
      %197 = vector.load %arg2[%c0_104, %c0_105, %c0_106] : memref<1x8x128xf32, #tpu.memory_space<vmem>>, vector<1x8x128xf32>
      %c0_107 = arith.constant 0 : index
      %c0_108 = arith.constant 0 : index
      %c0_109 = arith.constant 0 : index
      %198 = vector.load %arg24[%c0_107, %c0_108, %c0_109] : memref<1x8x128xf32, #tpu.memory_space<vmem>>, vector<1x8x128xf32>
      tpu.vector_store %arg24[%c0_107, %c0_108, %c0_109], %197 {strides = array<i32>} : memref<1x8x128xf32, #tpu.memory_space<vmem>>, vector<1x8x128xf32>,
    } else {
    }
    %c0 = arith.constant 0 : index
    %c0_1 = arith.constant 0 : index
    %c0_2 = arith.constant 0 : index
    %3 = vector.load %arg24[%c0, %c0_1, %c0_2] : memref<1x8x128xf32, #tpu.memory_space<vmem>>, vector<1x8x128xf32>
    %4 = vector.shape_cast %3 : vector<1x8x128xf32> to vector<8x128xf32>
    %c0_3 = arith.constant 0 : index
    %c0_4 = arith.constant 0 : index
    %c0_5 = arith.constant 0 : index
    %5 = vector.load %arg3[%c0_3, %c0_4, %c0_5] : memref<1x8x128xf32, #tpu.memory_space<vmem>>, vector<1x8x128xf32>
    %6 = vector.shape_cast %5 : vector<1x8x128xf32> to vector<8x128xf32>
    %7 = arith.truncf %6 : vector<8x128xf32> to vector<8x128xbf16>
    %8 = tpu.iota {dimensions = array<i32: 0>} : vector<8x8xi32>
    %9 = tpu.iota {dimensions = array<i32: 1>} : vector<8x8xi32>
    %10 = arith.cmpi sle, %9, %8 : vector<8x8xi32>
    %cst = arith.constant 0.000000e+00 : f32
    %cst_6 = arith.constant -1.000000e+30 : f32
    %11 = vector.broadcast %cst : f32 to vector<8x8xf32>
    %12 = vector.broadcast %cst_6 : f32 to vector<8x8xf32>
    %13 = arith.select %10, %11, %12 : vector<8x8xi1>, vector<8x8xf32>
    %c0_7 = arith.constant 0 : index
    %c0_8 = arith.constant 0 : index
    %c0_9 = arith.constant 0 : index
    %14 = vector.load %arg4[%c0_7, %c0_8, %c0_9] : memref<1x1x128xf32, #tpu.memory_space<vmem>>, vector<1x1x128xf32>
    %15 = vector.shape_cast %14 : vector<1x1x128xf32> to vector<1x128xf32>
    %c0_10 = arith.constant 0 : index
    %c0_11 = arith.constant 0 : index
    %c0_12 = arith.constant 0 : index
    %16 = vector.load %arg5[%c0_10, %c0_11, %c0_12] : memref<1x1x128xf32, #tpu.memory_space<vmem>>, vector<1x1x128xf32>
    %17 = vector.shape_cast %16 : vector<1x1x128xf32> to vector<1x128xf32>
    %cst_13 = arith.constant dense<0.000000e+00> : vector<8xf32>
    %18 = vector.multi_reduction <add>, %4, %cst_13 [1] : vector<8x128xf32> to vector<8xf32>
    %19 = vector.shape_cast %18 : vector<8xf32> to vector<8x1xf32>
    %cst_14 = arith.constant 1.280000e+02 : f32
    %20 = vector.broadcast %cst_14 : f32 to vector<8x1xf32>
    %21 = arith.divf %19, %20 : vector<8x1xf32>
    %22 = vector.broadcast %21 : vector<8x1xf32> to vector<8x128xf32>
    %23 = arith.subf %4, %22 : vector<8x128xf32>
    %24 = arith.mulf %23, %23 : vector<8x128xf32>
    %cst_15 = arith.constant dense<0.000000e+00> : vector<8xf32>
    %25 = vector.multi_reduction <add>, %24, %cst_15 [1] : vector<8x128xf32> to vector<8xf32>
    %26 = vector.shape_cast %25 : vector<8xf32> to vector<8x1xf32>
    %cst_16 = arith.constant 1.280000e+02 : f32
    %27 = vector.broadcast %cst_16 : f32 to vector<8x1xf32>
    %28 = arith.divf %26, %27 : vector<8x1xf32>
    %cst_17 = arith.constant 9.99999974E-6 : f32
    %29 = vector.broadcast %cst_17 : f32 to vector<8x1xf32>
    %30 = arith.addf %28, %29 : vector<8x1xf32>
    %31 = math.rsqrt %30 : vector<8x1xf32>
    %32 = vector.broadcast %31 : vector<8x1xf32> to vector<8x128xf32>
    %33 = arith.mulf %23, %32 : vector<8x128xf32>
    %34 = vector.broadcast %15 : vector<1x128xf32> to vector<8x128xf32>
    %35 = arith.mulf %33, %34 : vector<8x128xf32>
    %36 = vector.broadcast %17 : vector<1x128xf32> to vector<8x128xf32>
    %37 = arith.addf %35, %36 : vector<8x128xf32>
    %38 = arith.truncf %37 : vector<8x128xf32> to vector<8x128xbf16>
    %c0_18 = arith.constant 0 : index
    %c0_19 = arith.constant 0 : index
    %c0_20 = arith.constant 0 : index
    %39 = vector.load %arg6[%c0_18, %c0_19, %c0_20] : memref<1x128x128xbf16, #tpu.memory_space<vmem>>, vector<1x128x128xbf16>
    %40 = vector.shape_cast %39 : vector<1x128x128xbf16> to vector<128x128xbf16>
    %c0_21 = arith.constant 0 : index
    %c0_22 = arith.constant 0 : index
    %c0_23 = arith.constant 0 : index
    %41 = vector.load %arg7[%c0_21, %c0_22, %c0_23] : memref<1x128x128xbf16, #tpu.memory_space<vmem>>, vector<1x128x128xbf16>
    %42 = vector.shape_cast %41 : vector<1x128x128xbf16> to vector<128x128xbf16>
    %c0_24 = arith.constant 0 : index
    %c0_25 = arith.constant 0 : index
    %c0_26 = arith.constant 0 : index
    %43 = vector.load %arg8[%c0_24, %c0_25, %c0_26] : memref<1x128x128xbf16, #tpu.memory_space<vmem>>, vector<1x128x128xbf16>
    %44 = vector.shape_cast %43 : vector<1x128x128xbf16> to vector<128x128xbf16>
    %c0_27 = arith.constant 0 : index
    %c0_28 = arith.constant 0 : index
    %c0_29 = arith.constant 0 : index
    %45 = vector.load %arg9[%c0_27, %c0_28, %c0_29] : memref<1x128x128xbf16, #tpu.memory_space<vmem>>, vector<1x128x128xbf16>
    %46 = vector.shape_cast %45 : vector<1x128x128xbf16> to vector<128x128xbf16>
    %c0_30 = arith.constant 0 : index
    %c0_31 = arith.constant 0 : index
    %c0_32 = arith.constant 0 : index
    %47 = vector.load %arg10[%c0_30, %c0_31, %c0_32] : memref<1x1x128xf32, #tpu.memory_space<vmem>>, vector<1x1x128xf32>
    %48 = vector.shape_cast %47 : vector<1x1x128xf32> to vector<1x128xf32>
    %cst_33 = arith.constant dense<0.000000e+00> : vector<8x128xf32>
    %49 = tpu.matmul %38, %40, %cst_33 {dimension_numbers = #tpu.dot_dimension_numbers<[1], [0], [0], [1], [0, 0, 1, 1], [], []>} : vector<8x128xbf16>, vector<128x128xbf16>, vector<8x128xf32> -> vector<8x128xf32>
    %cst_34 = arith.constant dense<0.000000e+00> : vector<8x128xf32>
    %50 = tpu.matmul %38, %42, %cst_34 {dimension_numbers = #tpu.dot_dimension_numbers<[1], [0], [0], [1], [0, 0, 1, 1], [], []>} : vector<8x128xbf16>, vector<128x128xbf16>, vector<8x128xf32> -> vector<8x128xf32>
    %cst_35 = arith.constant dense<0.000000e+00> : vector<8x128xf32>
    %51 = tpu.matmul %38, %44, %cst_35 {dimension_numbers = #tpu.dot_dimension_numbers<[1], [0], [0], [1], [0, 0, 1, 1], [], []>} : vector<8x128xbf16>, vector<128x128xbf16>, vector<8x128xf32> -> vector<8x128xf32>
    %52 = arith.truncf %49 : vector<8x128xf32> to vector<8x128xbf16>
    %53 = vector.shape_cast %52 : vector<8x128xbf16> to vector<8x4x32xbf16>
    %54 = tpu.transpose %53, [1, 0, 2] : vector<8x4x32xbf16> -> vector<4x8x32xbf16>
    %55 = arith.truncf %50 : vector<8x128xf32> to vector<8x128xbf16>
    %56 = vector.shape_cast %55 : vector<8x128xbf16> to vector<8x4x32xbf16>
    %57 = tpu.transpose %56, [1, 0, 2] : vector<8x4x32xbf16> -> vector<4x8x32xbf16>
    %58 = arith.truncf %51 : vector<8x128xf32> to vector<8x128xbf16>
    %59 = vector.shape_cast %58 : vector<8x128xbf16> to vector<8x4x32xbf16>
    %60 = tpu.transpose %59, [1, 0, 2] : vector<8x4x32xbf16> -> vector<4x8x32xbf16>
    "tpu.trace_start"() <{level = 10 : i32, message = "hqd,hkd->hqk"}> : () -> ()
    %cst_36 = arith.constant dense<0.000000e+00> : vector<4x8x8xf32>
    %61 = tpu.matmul %54, %57, %cst_36 {dimension_numbers = #tpu.dot_dimension_numbers<[2], [2], [1], [1], [0, 0, 0, 1, 1, 1], [0], [0]>} : vector<4x8x32xbf16>, vector<4x8x32xbf16>, vector<4x8x8xf32> -> vector<4x8x8xf32>
    "tpu.trace_stop"() : () -> ()
    %62 = vector.shape_cast %13 : vector<8x8xf32> to vector<1x8x8xf32>
    %63 = vector.broadcast %62 : vector<1x8x8xf32> to vector<4x8x8xf32>
    %64 = arith.addf %61, %63 : vector<4x8x8xf32>
    %cst_37 = arith.constant dense<0xFF800000> : vector<4x8xf32>
    %65 = vector.multi_reduction <maximumf>, %64, %cst_37 [2] : vector<4x8x8xf32> to vector<4x8xf32>
    %66 = vector.shape_cast %65 : vector<4x8xf32> to vector<4x8x1xf32>
    %67 = vector.broadcast %66 : vector<4x8x1xf32> to vector<4x8x8xf32>
    %68 = arith.subf %64, %67 : vector<4x8x8xf32>
    %69 = math.exp %68 : vector<4x8x8xf32>
    %cst_38 = arith.constant dense<0.000000e+00> : vector<4x8xf32>
    %70 = vector.multi_reduction <add>, %69, %cst_38 [2] : vector<4x8x8xf32> to vector<4x8xf32>
    %71 = vector.shape_cast %70 : vector<4x8xf32> to vector<4x8x1xf32>
    %72 = tpu.reciprocal %71 {approx = true} : vector<4x8x1xf32> -> vector<4x8x1xf32>
    %73 = vector.broadcast %72 : vector<4x8x1xf32> to vector<4x8x8xf32>
    %74 = arith.mulf %69, %73 : vector<4x8x8xf32>
    %75 = arith.truncf %74 : vector<4x8x8xf32> to vector<4x8x8xbf16>
    "tpu.trace_start"() <{level = 10 : i32, message = "hqk,hkd->hqd"}> : () -> ()
    %cst_39 = arith.constant dense<0.000000e+00> : vector<4x8x32xf32>
    %76 = tpu.matmul %75, %60, %cst_39 {dimension_numbers = #tpu.dot_dimension_numbers<[2], [1], [1], [2], [0, 0, 0, 1, 1, 2], [0], [0]>} : vector<4x8x8xbf16>, vector<4x8x32xbf16>, vector<4x8x32xf32> -> vector<4x8x32xf32>
    "tpu.trace_stop"() : () -> ()
    %77 = arith.truncf %76 : vector<4x8x32xf32> to vector<4x8x32xbf16>
    %78 = tpu.transpose %77, [1, 0, 2] : vector<4x8x32xbf16> -> vector<8x4x32xbf16>
    %79 = vector.shape_cast %78 : vector<8x4x32xbf16> to vector<8x128xbf16>
    %cst_40 = arith.constant dense<0.000000e+00> : vector<8x128xf32>
    %80 = tpu.matmul %79, %46, %cst_40 {dimension_numbers = #tpu.dot_dimension_numbers<[1], [0], [0], [1], [0, 0, 1, 1], [], []>} : vector<8x128xbf16>, vector<128x128xbf16>, vector<8x128xf32> -> vector<8x128xf32>
    %81 = vector.broadcast %48 : vector<1x128xf32> to vector<8x128xf32>
    %82 = arith.addf %80, %81 : vector<8x128xf32>
    %83 = arith.addf %4, %82 : vector<8x128xf32>
    %c0_41 = arith.constant 0 : index
    %c0_42 = arith.constant 0 : index
    %c0_43 = arith.constant 0 : index
    %84 = vector.load %arg11[%c0_41, %c0_42, %c0_43] : memref<1x1x128xf32, #tpu.memory_space<vmem>>, vector<1x1x128xf32>
    %85 = vector.shape_cast %84 : vector<1x1x128xf32> to vector<1x128xf32>
    %c0_44 = arith.constant 0 : index
    %c0_45 = arith.constant 0 : index
    %c0_46 = arith.constant 0 : index
    %86 = vector.load %arg12[%c0_44, %c0_45, %c0_46] : memref<1x1x128xf32, #tpu.memory_space<vmem>>, vector<1x1x128xf32>
    %87 = vector.shape_cast %86 : vector<1x1x128xf32> to vector<1x128xf32>
    %cst_47 = arith.constant dense<0.000000e+00> : vector<8xf32>
    %88 = vector.multi_reduction <add>, %83, %cst_47 [1] : vector<8x128xf32> to vector<8xf32>
    %89 = vector.shape_cast %88 : vector<8xf32> to vector<8x1xf32>
    %cst_48 = arith.constant 1.280000e+02 : f32
    %90 = vector.broadcast %cst_48 : f32 to vector<8x1xf32>
    %91 = arith.divf %89, %90 : vector<8x1xf32>
    %92 = vector.broadcast %91 : vector<8x1xf32> to vector<8x128xf32>
    %93 = arith.subf %83, %92 : vector<8x128xf32>
    %94 = arith.mulf %93, %93 : vector<8x128xf32>
    %cst_49 = arith.constant dense<0.000000e+00> : vector<8xf32>
    %95 = vector.multi_reduction <add>, %94, %cst_49 [1] : vector<8x128xf32> to vector<8xf32>
    %96 = vector.shape_cast %95 : vector<8xf32> to vector<8x1xf32>
    %cst_50 = arith.constant 1.280000e+02 : f32
    %97 = vector.broadcast %cst_50 : f32 to vector<8x1xf32>
    %98 = arith.divf %96, %97 : vector<8x1xf32>
    %cst_51 = arith.constant 9.99999974E-6 : f32
    %99 = vector.broadcast %cst_51 : f32 to vector<8x1xf32>
    %100 = arith.addf %98, %99 : vector<8x1xf32>
    %101 = math.rsqrt %100 : vector<8x1xf32>
    %102 = vector.broadcast %101 : vector<8x1xf32> to vector<8x128xf32>
    %103 = arith.mulf %93, %102 : vector<8x128xf32>
    %104 = vector.broadcast %85 : vector<1x128xf32> to vector<8x128xf32>
    %105 = arith.mulf %103, %104 : vector<8x128xf32>
    %106 = vector.broadcast %87 : vector<1x128xf32> to vector<8x128xf32>
    %107 = arith.addf %105, %106 : vector<8x128xf32>
    %108 = arith.truncf %107 : vector<8x128xf32> to vector<8x128xbf16>
    %c0_52 = arith.constant 0 : index
    %c0_53 = arith.constant 0 : index
    %c0_54 = arith.constant 0 : index
    %109 = vector.load %arg13[%c0_52, %c0_53, %c0_54] : memref<1x128x128xbf16, #tpu.memory_space<vmem>>, vector<1x128x128xbf16>
    %110 = vector.shape_cast %109 : vector<1x128x128xbf16> to vector<128x128xbf16>
    %c0_55 = arith.constant 0 : index
    %c0_56 = arith.constant 0 : index
    %c0_57 = arith.constant 0 : index
    %111 = vector.load %arg14[%c0_55, %c0_56, %c0_57] : memref<1x128x128xbf16, #tpu.memory_space<vmem>>, vector<1x128x128xbf16>
    %112 = vector.shape_cast %111 : vector<1x128x128xbf16> to vector<128x128xbf16>
    %c0_58 = arith.constant 0 : index
    %c0_59 = arith.constant 0 : index
    %c0_60 = arith.constant 0 : index
    %113 = vector.load %arg15[%c0_58, %c0_59, %c0_60] : memref<1x128x128xbf16, #tpu.memory_space<vmem>>, vector<1x128x128xbf16>
    %114 = vector.shape_cast %113 : vector<1x128x128xbf16> to vector<128x128xbf16>
    %c0_61 = arith.constant 0 : index
    %c0_62 = arith.constant 0 : index
    %c0_63 = arith.constant 0 : index
    %115 = vector.load %arg16[%c0_61, %c0_62, %c0_63] : memref<1x128x128xbf16, #tpu.memory_space<vmem>>, vector<1x128x128xbf16>
    %116 = vector.shape_cast %115 : vector<1x128x128xbf16> to vector<128x128xbf16>
    %c0_64 = arith.constant 0 : index
    %c0_65 = arith.constant 0 : index
    %c0_66 = arith.constant 0 : index
    %117 = vector.load %arg17[%c0_64, %c0_65, %c0_66] : memref<1x1x128xf32, #tpu.memory_space<vmem>>, vector<1x1x128xf32>
    %118 = vector.shape_cast %117 : vector<1x1x128xf32> to vector<1x128xf32>
    %cst_67 = arith.constant dense<0.000000e+00> : vector<8x128xf32>
    %119 = tpu.matmul %108, %110, %cst_67 {dimension_numbers = #tpu.dot_dimension_numbers<[1], [0], [0], [1], [0, 0, 1, 1], [], []>} : vector<8x128xbf16>, vector<128x128xbf16>, vector<8x128xf32> -> vector<8x128xf32>
    %cst_68 = arith.constant dense<0.000000e+00> : vector<8x128xf32>
    %120 = tpu.matmul %7, %112, %cst_68 {dimension_numbers = #tpu.dot_dimension_numbers<[1], [0], [0], [1], [0, 0, 1, 1], [], []>} : vector<8x128xbf16>, vector<128x128xbf16>, vector<8x128xf32> -> vector<8x128xf32>
    %cst_69 = arith.constant dense<0.000000e+00> : vector<8x128xf32>
    %121 = tpu.matmul %7, %114, %cst_69 {dimension_numbers = #tpu.dot_dimension_numbers<[1], [0], [0], [1], [0, 0, 1, 1], [], []>} : vector<8x128xbf16>, vector<128x128xbf16>, vector<8x128xf32> -> vector<8x128xf32>
    %122 = arith.truncf %119 : vector<8x128xf32> to vector<8x128xbf16>
    %123 = vector.shape_cast %122 : vector<8x128xbf16> to vector<8x4x32xbf16>
    %124 = tpu.transpose %123, [1, 0, 2] : vector<8x4x32xbf16> -> vector<4x8x32xbf16>
    %125 = arith.truncf %120 : vector<8x128xf32> to vector<8x128xbf16>
    %126 = vector.shape_cast %125 : vector<8x128xbf16> to vector<8x4x32xbf16>
    %127 = tpu.transpose %126, [1, 0, 2] : vector<8x4x32xbf16> -> vector<4x8x32xbf16>
    %128 = arith.truncf %121 : vector<8x128xf32> to vector<8x128xbf16>
    %129 = vector.shape_cast %128 : vector<8x128xbf16> to vector<8x4x32xbf16>
    %130 = tpu.transpose %129, [1, 0, 2] : vector<8x4x32xbf16> -> vector<4x8x32xbf16>
    "tpu.trace_start"() <{level = 10 : i32, message = "hqd,hkd->hqk"}> : () -> ()
    %cst_70 = arith.constant dense<0.000000e+00> : vector<4x8x8xf32>
    %131 = tpu.matmul %124, %127, %cst_70 {dimension_numbers = #tpu.dot_dimension_numbers<[2], [2], [1], [1], [0, 0, 0, 1, 1, 1], [0], [0]>} : vector<4x8x32xbf16>, vector<4x8x32xbf16>, vector<4x8x8xf32> -> vector<4x8x8xf32>
    "tpu.trace_stop"() : () -> ()
    %cst_71 = arith.constant dense<0xFF800000> : vector<4x8xf32>
    %132 = vector.multi_reduction <maximumf>, %131, %cst_71 [2] : vector<4x8x8xf32> to vector<4x8xf32>
    %133 = vector.shape_cast %132 : vector<4x8xf32> to vector<4x8x1xf32>
    %134 = vector.broadcast %133 : vector<4x8x1xf32> to vector<4x8x8xf32>
    %135 = arith.subf %131, %134 : vector<4x8x8xf32>
    %136 = math.exp %135 : vector<4x8x8xf32>
    %cst_72 = arith.constant dense<0.000000e+00> : vector<4x8xf32>
    %137 = vector.multi_reduction <add>, %136, %cst_72 [2] : vector<4x8x8xf32> to vector<4x8xf32>
    %138 = vector.shape_cast %137 : vector<4x8xf32> to vector<4x8x1xf32>
    %139 = tpu.reciprocal %138 {approx = true} : vector<4x8x1xf32> -> vector<4x8x1xf32>
    %140 = vector.broadcast %139 : vector<4x8x1xf32> to vector<4x8x8xf32>
    %141 = arith.mulf %136, %140 : vector<4x8x8xf32>
    %142 = arith.truncf %141 : vector<4x8x8xf32> to vector<4x8x8xbf16>
    "tpu.trace_start"() <{level = 10 : i32, message = "hqk,hkd->hqd"}> : () -> ()
    %cst_73 = arith.constant dense<0.000000e+00> : vector<4x8x32xf32>
    %143 = tpu.matmul %142, %130, %cst_73 {dimension_numbers = #tpu.dot_dimension_numbers<[2], [1], [1], [2], [0, 0, 0, 1, 1, 2], [0], [0]>} : vector<4x8x8xbf16>, vector<4x8x32xbf16>, vector<4x8x32xf32> -> vector<4x8x32xf32>
    "tpu.trace_stop"() : () -> ()
    %144 = arith.truncf %143 : vector<4x8x32xf32> to vector<4x8x32xbf16>
    %145 = tpu.transpose %144, [1, 0, 2] : vector<4x8x32xbf16> -> vector<8x4x32xbf16>
    %146 = vector.shape_cast %145 : vector<8x4x32xbf16> to vector<8x128xbf16>
    %cst_74 = arith.constant dense<0.000000e+00> : vector<8x128xf32>
    %147 = tpu.matmul %146, %116, %cst_74 {dimension_numbers = #tpu.dot_dimension_numbers<[1], [0], [0], [1], [0, 0, 1, 1], [], []>} : vector<8x128xbf16>, vector<128x128xbf16>, vector<8x128xf32> -> vector<8x128xf32>
    %148 = vector.broadcast %118 : vector<1x128xf32> to vector<8x128xf32>
    %149 = arith.addf %147, %148 : vector<8x128xf32>
    %150 = arith.addf %83, %149 : vector<8x128xf32>
    %c0_75 = arith.constant 0 : index
    %c0_76 = arith.constant 0 : index
    %c0_77 = arith.constant 0 : index
    %151 = vector.load %arg18[%c0_75, %c0_76, %c0_77] : memref<1x1x128xf32, #tpu.memory_space<vmem>>, vector<1x1x128xf32>
    %152 = vector.shape_cast %151 : vector<1x1x128xf32> to vector<1x128xf32>
    %c0_78 = arith.constant 0 : index
    %c0_79 = arith.constant 0 : index
    %c0_80 = arith.constant 0 : index
    %153 = vector.load %arg19[%c0_78, %c0_79, %c0_80] : memref<1x1x128xf32, #tpu.memory_space<vmem>>, vector<1x1x128xf32>
    %154 = vector.shape_cast %153 : vector<1x1x128xf32> to vector<1x128xf32>
    %cst_81 = arith.constant dense<0.000000e+00> : vector<8xf32>
    %155 = vector.multi_reduction <add>, %150, %cst_81 [1] : vector<8x128xf32> to vector<8xf32>
    %156 = vector.shape_cast %155 : vector<8xf32> to vector<8x1xf32>
    %cst_82 = arith.constant 1.280000e+02 : f32
    %157 = vector.broadcast %cst_82 : f32 to vector<8x1xf32>
    %158 = arith.divf %156, %157 : vector<8x1xf32>
    %159 = vector.broadcast %158 : vector<8x1xf32> to vector<8x128xf32>
    %160 = arith.subf %150, %159 : vector<8x128xf32>
    %161 = arith.mulf %160, %160 : vector<8x128xf32>
    %cst_83 = arith.constant dense<0.000000e+00> : vector<8xf32>
    %162 = vector.multi_reduction <add>, %161, %cst_83 [1] : vector<8x128xf32> to vector<8xf32>
    %163 = vector.shape_cast %162 : vector<8xf32> to vector<8x1xf32>
    %cst_84 = arith.constant 1.280000e+02 : f32
    %164 = vector.broadcast %cst_84 : f32 to vector<8x1xf32>
    %165 = arith.divf %163, %164 : vector<8x1xf32>
    %cst_85 = arith.constant 9.99999974E-6 : f32
    %166 = vector.broadcast %cst_85 : f32 to vector<8x1xf32>
    %167 = arith.addf %165, %166 : vector<8x1xf32>
    %168 = math.rsqrt %167 : vector<8x1xf32>
    %169 = vector.broadcast %168 : vector<8x1xf32> to vector<8x128xf32>
    %170 = arith.mulf %160, %169 : vector<8x128xf32>
    %171 = vector.broadcast %152 : vector<1x128xf32> to vector<8x128xf32>
    %172 = arith.mulf %170, %171 : vector<8x128xf32>
    %173 = vector.broadcast %154 : vector<1x128xf32> to vector<8x128xf32>
    %174 = arith.addf %172, %173 : vector<8x128xf32>
    %175 = arith.truncf %174 : vector<8x128xf32> to vector<8x128xbf16>
    %c0_86 = arith.constant 0 : index
    %c0_87 = arith.constant 0 : index
    %c0_88 = arith.constant 0 : index
    %176 = vector.load %arg20[%c0_86, %c0_87, %c0_88] : memref<1x128x512xbf16, #tpu.memory_space<vmem>>, vector<1x128x512xbf16>
    %177 = vector.shape_cast %176 : vector<1x128x512xbf16> to vector<128x512xbf16>
    %cst_89 = arith.constant dense<0.000000e+00> : vector<8x512xf32>
    %178 = tpu.matmul %175, %177, %cst_89 {dimension_numbers = #tpu.dot_dimension_numbers<[1], [0], [0], [1], [0, 0, 1, 1], [], []>} : vector<8x128xbf16>, vector<128x512xbf16>, vector<8x512xf32> -> vector<8x512xf32>
    %c0_90 = arith.constant 0 : index
    %c0_91 = arith.constant 0 : index
    %c0_92 = arith.constant 0 : index
    %179 = vector.load %arg21[%c0_90, %c0_91, %c0_92] : memref<1x1x512xf32, #tpu.memory_space<vmem>>, vector<1x1x512xf32>
    %180 = vector.shape_cast %179 : vector<1x1x512xf32> to vector<1x512xf32>
    %181 = vector.broadcast %180 : vector<1x512xf32> to vector<8x512xf32>
    %182 = arith.addf %178, %181 : vector<8x512xf32>
    %cst_93 = arith.constant 0.000000e+00 : f32
    %183 = vector.broadcast %cst_93 : f32 to vector<8x512xf32>
    %184 = arith.maximumf %182, %183 : vector<8x512xf32>
    %185 = arith.truncf %184 : vector<8x512xf32> to vector<8x512xbf16>
    %c0_94 = arith.constant 0 : index
    %c0_95 = arith.constant 0 : index
    %c0_96 = arith.constant 0 : index
    %186 = vector.load %arg22[%c0_94, %c0_95, %c0_96] : memref<1x512x128xbf16, #tpu.memory_space<vmem>>, vector<1x512x128xbf16>
    %187 = vector.shape_cast %186 : vector<1x512x128xbf16> to vector<512x128xbf16>
    %cst_97 = arith.constant dense<0.000000e+00> : vector<8x128xf32>
    %188 = tpu.matmul %185, %187, %cst_97 {dimension_numbers = #tpu.dot_dimension_numbers<[1], [0], [0], [1], [0, 0, 1, 1], [], []>} : vector<8x512xbf16>, vector<512x128xbf16>, vector<8x128xf32> -> vector<8x128xf32>
    %c0_98 = arith.constant 0 : index
    %c0_99 = arith.constant 0 : index
    %c0_100 = arith.constant 0 : index
    %189 = vector.load %arg23[%c0_98, %c0_99, %c0_100] : memref<1x1x128xf32, #tpu.memory_space<vmem>>, vector<1x1x128xf32>
    %190 = vector.shape_cast %189 : vector<1x1x128xf32> to vector<1x128xf32>
    %191 = vector.broadcast %190 : vector<1x128xf32> to vector<8x128xf32>
    %192 = arith.addf %188, %191 : vector<8x128xf32>
    %193 = arith.addf %150, %192 : vector<8x128xf32>
    %c0_101 = arith.constant 0 : index
    %c0_102 = arith.constant 0 : index
    %c0_103 = arith.constant 0 : index
    %194 = vector.load %arg24[%c0_101, %c0_102, %c0_103] : memref<1x8x128xf32, #tpu.memory_space<vmem>>, vector<1x8x128xf32>
    %195 = vector.shape_cast %194 : vector<1x8x128xf32> to vector<8x128xf32>
    %196 = vector.shape_cast %193 : vector<8x128xf32> to vector<1x8x128xf32>
    tpu.vector_store %arg24[%c0_101, %c0_102, %c0_103], %196 {strides = array<i32>} : memref<1x8x128xf32, #tpu.memory_space<vmem>>, vector<1x8x128xf32>,
    return
  }
  func.func @transform_0(%arg0: i32, %arg1: i32) -> (i32, i32, i32) {
    %c0_i32 = arith.constant 0 : i32
    %c0_i32_0 = arith.constant 0 : i32
    %c0_i32_1 = arith.constant 0 : i32
    return %arg0, %c0_i32, %c0_i32_0 : i32, i32, i32
  }
  func.func @transform_1(%arg0: i32, %arg1: i32) -> (i32, i32, i32) {
    %c0_i32 = arith.constant 0 : i32
    %c0_i32_0 = arith.constant 0 : i32
    %c0_i32_1 = arith.constant 0 : i32
    return %arg0, %c0_i32, %c0_i32_0 : i32, i32, i32
  }
  func.func @transform_2(%arg0: i32, %arg1: i32) -> (i32, i32, i32) {
    %c0_i32 = arith.constant 0 : i32
    %c0_i32_0 = arith.constant 0 : i32
    %c0_i32_1 = arith.constant 0 : i32
    return %arg1, %c0_i32, %c0_i32_0 : i32, i32, i32
  }
  func.func @transform_3(%arg0: i32, %arg1: i32) -> (i32, i32, i32) {
    %c0_i32 = arith.constant 0 : i32
    %c0_i32_0 = arith.constant 0 : i32
    %c0_i32_1 = arith.constant 0 : i32
    return %arg1, %c0_i32, %c0_i32_0 : i32, i32, i32
  }
  func.func @transform_4(%arg0: i32, %arg1: i32) -> (i32, i32, i32) {
    %c0_i32 = arith.constant 0 : i32
    %c0_i32_0 = arith.constant 0 : i32
    %c0_i32_1 = arith.constant 0 : i32
    return %arg1, %c0_i32, %c0_i32_0 : i32, i32, i32
  }
  func.func @transform_5(%arg0: i32, %arg1: i32) -> (i32, i32, i32) {
    %c0_i32 = arith.constant 0 : i32
    %c0_i32_0 = arith.constant 0 : i32
    %c0_i32_1 = arith.constant 0 : i32
    return %arg1, %c0_i32, %c0_i32_0 : i32, i32, i32
  }
  func.func @transform_6(%arg0: i32, %arg1: i32) -> (i32, i32, i32) {
    %c0_i32 = arith.constant 0 : i32
    %c0_i32_0 = arith.constant 0 : i32
    %c0_i32_1 = arith.constant 0 : i32
    return %arg1, %c0_i32, %c0_i32_0 : i32, i32, i32
  }
  func.func @transform_7(%arg0: i32, %arg1: i32) -> (i32, i32, i32) {
    %c0_i32 = arith.constant 0 : i32
    %c0_i32_0 = arith.constant 0 : i32
    %c0_i32_1 = arith.constant 0 : i32
    return %arg1, %c0_i32, %c0_i32_0 : i32, i32, i32
  }
  func.func @transform_8(%arg0: i32, %arg1: i32) -> (i32, i32, i32) {
    %c0_i32 = arith.constant 0 : i32
    %c0_i32_0 = arith.constant 0 : i32
    %c0_i32_1 = arith.constant 0 : i32
    return %arg1, %c0_i32, %c0_i32_0 : i32, i32, i32
  }
  func.func @transform_9(%arg0: i32, %arg1: i32) -> (i32, i32, i32) {
    %c0_i32 = arith.constant 0 : i32
    %c0_i32_0 = arith.constant 0 : i32
    %c0_i32_1 = arith.constant 0 : i32
    return %arg1, %c0_i32, %c0_i32_0 : i32, i32, i32
  }
  func.func @transform_10(%arg0: i32, %arg1: i32) -> (i32, i32, i32) {
    %c0_i32 = arith.constant 0 : i32
    %c0_i32_0 = arith.constant 0 : i32
    %c0_i32_1 = arith.constant 0 : i32
    return %arg1, %c0_i32, %c0_i32_0 : i32, i32, i32
  }
  func.func @transform_11(%arg0: i32, %arg1: i32) -> (i32, i32, i32) {
    %c0_i32 = arith.constant 0 : i32
    %c0_i32_0 = arith.constant 0 : i32
    %c0_i32_1 = arith.constant 0 : i32
    return %arg1, %c0_i32, %c0_i32_0 : i32, i32, i32
  }
  func.func @transform_12(%arg0: i32, %arg1: i32) -> (i32, i32, i32) {
    %c0_i32 = arith.constant 0 : i32
    %c0_i32_0 = arith.constant 0 : i32
    %c0_i32_1 = arith.constant 0 : i32
    return %arg1, %c0_i32, %c0_i32_0 : i32, i32, i32
  }
  func.func @transform_13(%arg0: i32, %arg1: i32) -> (i32, i32, i32) {
    %c0_i32 = arith.constant 0 : i32
    %c0_i32_0 = arith.constant 0 : i32
    %c0_i32_1 = arith.constant 0 : i32
    return %arg1, %c0_i32, %c0_i32_0 : i32, i32, i32
  }
  func.func @transform_14(%arg0: i32, %arg1: i32) -> (i32, i32, i32) {
    %c0_i32 = arith.constant 0 : i32
    %c0_i32_0 = arith.constant 0 : i32
    %c0_i32_1 = arith.constant 0 : i32
    return %arg1, %c0_i32, %c0_i32_0 : i32, i32, i32
  }
  func.func @transform_15(%arg0: i32, %arg1: i32) -> (i32, i32, i32) {
    %c0_i32 = arith.constant 0 : i32
    %c0_i32_0 = arith.constant 0 : i32
    %c0_i32_1 = arith.constant 0 : i32
    return %arg1, %c0_i32, %c0_i32_0 : i32, i32, i32
  }
  func.func @transform_16(%arg0: i32, %arg1: i32) -> (i32, i32, i32) {
    %c0_i32 = arith.constant 0 : i32
    %c0_i32_0 = arith.constant 0 : i32
    %c0_i32_1 = arith.constant 0 : i32
    return %arg1, %c0_i32, %c0_i32_0 : i32, i32, i32
  }
  func.func @transform_17(%arg0: i32, %arg1: i32) -> (i32, i32, i32) {
    %c0_i32 = arith.constant 0 : i32
    %c0_i32_0 = arith.constant 0 : i32
    %c0_i32_1 = arith.constant 0 : i32
    return %arg1, %c0_i32, %c0_i32_0 : i32, i32, i32
  }
  func.func @transform_18(%arg0: i32, %arg1: i32) -> (i32, i32, i32) {
    %c0_i32 = arith.constant 0 : i32
    %c0_i32_0 = arith.constant 0 : i32
    %c0_i32_1 = arith.constant 0 : i32
    return %arg1, %c0_i32, %c0_i32_0 : i32, i32, i32
  }
  func.func @transform_19(%arg0: i32, %arg1: i32) -> (i32, i32, i32) {
    %c0_i32 = arith.constant 0 : i32
    %c0_i32_0 = arith.constant 0 : i32
    %c0_i32_1 = arith.constant 0 : i32
    return %arg1, %c0_i32, %c0_i32_0 : i32, i32, i32
  }
  func.func @transform_20(%arg0: i32, %arg1: i32) -> (i32, i32, i32) {
    %c0_i32 = arith.constant 0 : i32
    %c0_i32_0 = arith.constant 0 : i32
    %c0_i32_1 = arith.constant 0 : i32
    return %arg1, %c0_i32, %c0_i32_0 : i32, i32, i32
  }
  func.func @transform_21(%arg0: i32, %arg1: i32) -> (i32, i32, i32) {
    %c0_i32 = arith.constant 0 : i32
    %c0_i32_0 = arith.constant 0 : i32
    %c0_i32_1 = arith.constant 0 : i32
    return %arg1, %c0_i32, %c0_i32_0 : i32, i32, i32
  }
  func.func @transform_22(%arg0: i32, %arg1: i32) -> (i32, i32, i32) {
    %c0_i32 = arith.constant 0 : i32
    %c0_i32_0 = arith.constant 0 : i32
    %c0_i32_1 = arith.constant 0 : i32
    return %arg0, %c0_i32, %c0_i32_0 : i32, i32, i32
  }
}

</mosaic_0001>

<bundles_post_ra>
// kernel: decoder_forward.1
= control target key start
LH: loop header
LB: loop body
LE: loop exit
PB: predicated region body
PF: predicated region fallthrough
CT: control target
= control target key end

     0   :  { %s6835_s0 = inlined_call_operand.vmem [shape: f32[2,8,128], index: 0, kind: input, shape index: {}]   ;;  %s6836_s1 = inlined_call_operand.vmem [shape: f32[2,8,128], index: 1, kind: input, shape index: {}]   ;;  %s6837_s2 = inlined_call_operand.vmem [shape: f32[2,1,128], index: 2, kind: input, shape index: {}]   ;;  %s6838_s3 = inlined_call_operand.vmem [shape: f32[2,1,128], index: 3, kind: input, shape index: {}]   ;;  %s6839_s4 = inlined_call_operand.vmem [shape: bf16[2,128,128], index: 4, kind: input, shape index: {}]   ;;  %s6840_s5 = inlined_call_operand.hbm [shape: bf16[2,128,128], index: 5, kind: input, shape index: {}]   ;;  %s6841_s6 = inlined_call_operand.hbm [shape: bf16[2,128,128], index: 6, kind: input, shape index: {}]   ;;  %s6842_s7 = inlined_call_operand.hbm [shape: bf16[2,128,128], index: 7, kind: input, shape index: {}]   ;;  %s6843_s8 = inlined_call_operand.vmem [shape: f32[2,1,128], index: 8, kind: input, shape index: {}]   ;;  %s6844_s9 = inlined_call_operand.vmem [shape: f32[2,1,128], index: 9, kind: input, shape index: {}]   ;;  %s6845_s10 = inlined_call_operand.vmem [shape: f32[2,1,128], index: 10, kind: input, shape index: {}]   ;;  %s6846_s11 = inlined_call_operand.hbm [shape: bf16[2,128,128], index: 11, kind: input, shape index: {}]   ;;  %s6847_s12 = inlined_call_operand.hbm [shape: bf16[2,128,128], index: 12, kind: input, shape index: {}]   ;;  %s6848_s13 = inlined_call_operand.hbm [shape: bf16[2,128,128], index: 13, kind: input, shape index: {}]   ;;  %s6849_s14 = inlined_call_operand.hbm [shape: bf16[2,128,128], index: 14, kind: input, shape index: {}]   ;;  %s6850_s15 = inlined_call_operand.vmem [shape: f32[2,1,128], index: 15, kind: input, shape index: {}]   ;;  %s6851_s16 = inlined_call_operand.vmem [shape: f32[2,1,128], index: 16, kind: input, shape index: {}]   ;;  %s6852_s17 = inlined_call_operand.vmem [shape: f32[2,1,128], index: 17, kind: input, shape index: {}]   ;;  %s6853_s18 = inlined_call_operand.hbm [shape: bf16[2,128,512], index: 18, kind: input, shape index: {}]   ;;  %s6854_s19 = inlined_call_operand.vmem [shape: f32[2,1,512], index: 19, kind: input, shape index: {}]   ;;  %s6855_s20 = inlined_call_operand.hbm [shape: bf16[2,512,128], index: 20, kind: input, shape index: {}]   ;;  %s6856_s21 = inlined_call_operand.vmem [shape: f32[2,1,128], index: 21, kind: input, shape index: {}]   ;;  %s6857_s22 = inlined_call_operand.hbm [shape: f32[2,8,128], index: 22, kind: output, shape index: {}]  }
   0x1   :  { %6889 = sst [smem:[#allocation46_spill]] %s6835_s0 }
   0x2   :  { %6890 = sst [smem:[#allocation47_spill]] %s6836_s1 }
   0x3   :  { %6891 = sst [smem:[#allocation48_spill]] %s6837_s2 }
   0x4   :  { %6892 = sst [smem:[#allocation49_spill]] %s6838_s3 }
   0x5   :  { %6893 = sst [smem:[#allocation50_spill]] %s6839_s4 }
   0x6   :  { %6894 = sst [smem:[#allocation51_spill]] %s6840_s5 }
   0x7   :  { %6895 = sst [smem:[#allocation52_spill]] %s6841_s6 }
   0x8   :  { %6896 = sst [smem:[#allocation53_spill]] %s6842_s7 }
   0x9   :  { %6897 = sst [smem:[#allocation54_spill]] %s6843_s8 }
   0xa   :  { %6898 = sst [smem:[#allocation55_spill]] %s6844_s9 }
   0xb   :  { %6899 = sst [smem:[#allocation56_spill]] %s6845_s10 }
   0xc   :  { %6900 = sst [smem:[#allocation57_spill]] %s6846_s11 }
   0xd   :  { %6901 = sst [smem:[#allocation58_spill]] %s6847_s12 }
   0xe   :  { %6902 = sst [smem:[#allocation59_spill]] %s6848_s13 }
   0xf   :  { %6903 = sst [smem:[#allocation60_spill]] %s6849_s14 }
  0x10   :  { %6904 = sst [smem:[#allocation61_spill]] %s6850_s15 }
  0x11   :  { %6905 = sst [smem:[#allocation62_spill]] %s6851_s16 }
  0x12   :  { %6906 = sst [smem:[#allocation63_spill]] %s6852_s17 }
  0x13   :  { %6907 = sst [smem:[#allocation64_spill]] %s6853_s18 }
  0x14   :  { %6908 = sst [smem:[#allocation65_spill]] %s6854_s19 }
  0x15   :  { %6909 = sst [smem:[#allocation66_spill]] %s6855_s20 }
  0x16   :  { %6910 = sst [smem:[#allocation67_spill]] %s6856_s21 }
  0x17   :  { %6911 = sst [smem:[#allocation68_spill]] %s6857_s22 }
  0x18   :  { %27 = vsyncpa [#allocation3], 0 }
  0x19   :  { %29 = vsyncpa [#allocation3 + $0x1], 0 }
  0x1a   :  { %30 = vsyncpa [#allocation6], 0 }
  0x1b   :  { %32 = vsyncpa [#allocation6 + $0x1], 0 }
  0x1c   :  { %33 = vsyncpa [#allocation9], 0 }
  0x1d   :  { %35 = vsyncpa [#allocation9 + $0x1], 0 }
  0x1e   :  { %36 = vsyncpa [#allocation12], 0 }
  0x1f   :  { %38 = vsyncpa [#allocation12 + $0x1], 0 }
  0x20   :  { %39 = vsyncpa [#allocation15], 0 }
  0x21   :  { %41 = vsyncpa [#allocation15 + $0x1], 0 }
  0x22   :  { %42 = vsyncpa [#allocation4], 0 }
  0x23   :  { %44 = vsyncpa [#allocation4 + $0x1], 0  ;;  %s5824_s3 = smov 0   ;;  %s5826_s28 = smov 0  }
  0x24   :  { %s5828_s29 = smov 0   ;;  %s5830_s30 = smov 0  }
  0x25   :  { %s5832_s4 = smov 0   ;;  %s5834_s0 = smov 0  }
  0x26   :  { %s5836_s23 = smov 0   ;;  %s5838_s1 = smov 0  }
  0x27   :  { %s5840_s5 = smov 0   ;;  %s5842_s24 = smov 0  }
  0x28   :  { %s5844_s6 = smov 0  }
  0x29 LB: > { %6912 = sst [smem:[#allocation24_spill]] %s5656_s3  ;;  %s5878_s25 = sadd.s32 4294967295, %s5696_s6   ;;  %s5696_s6 = sphi %s5844_s6, %s50_s6   ;;  %s5692_s24 = sphi %s5842_s24, %s7006_s24   ;;  %s5688_s5 = sphi %s5840_s5, %s7005_s5   ;;  %s5684_s1 = sphi %s5838_s1, %s7004_s1   ;;  %s5680_s23 = sphi %s5836_s23, %s7003_s23   ;;  %s5676_s0 = sphi %s5834_s0, %s7002_s0   ;;  %s5672_s4 = sphi %s5832_s4, %s7001_s4   ;;  %s5668_s30 = sphi %s5830_s30, %s7000_s30   ;;  %s5664_s29 = sphi %s5828_s29, %s6999_s29   ;;  %s5660_s28 = sphi %s5826_s28, %s6998_s28   ;;  %s5656_s3 = sphi %s5824_s3, %s6997_s3  }
  0x2a   : > { %6913 = sst [smem:[#allocation25_spill]] %s5660_s28  ;;  %s4368_s26 = sadd.s32 4294967294, %s5696_s6  }
  0x2b   : > { %6914 = sst [smem:[#allocation26_spill]] %s5664_s29  ;;  %s59_s2 = sadd.s32 1, %s5688_s5 }
  0x2c   : > { %6915 = sst [smem:[#allocation27_spill]] %s5672_s4  ;;  %s62_s27 = sadd.s32 1, %s5692_s24 }
  0x2d   : > { %6916 = sst [smem:[#allocation28_spill]] %s5676_s0  ;;  %p60_p0 = scmp.ge.s32.totalorder %s59_s2, 2 }
  0x2e   : > { %6917 = sst [smem:[#allocation29_spill]] %s5680_s23  ;;  %s199_s22 = sadd.s32 1, %s5676_s0 }
  0x2f   : > { %6918 = sst [smem:[#allocation30_spill]] %s5684_s1  ;;  %p206_p1 = scmp.ne.s32.totalorder %s5676_s0, %s5672_s4 }
  0x30   : > { %6919 = sst [smem:[#allocation31_spill]] %s5688_s5  ;;  %p207_p2 = scmp.eq.s32.totalorder %s5696_s6, 0 }
  0x31   : > { %6920 = sst [smem:[#allocation32_spill]] %s5692_s24  ;;  %s7008_s2 = smov (%p60_p0, %s59_s2), 0 }
  0x32   : > { %6921 = sst [smem:[#allocation33_spill]] %s5696_s6  ;;  %s7010_s27 = smov (!%p60_p0, %s62_s27), %s5692_s24 }
  0x33   : > { %6922 = sst [smem:[#allocation34_spill]] %s7008_s2  ;;  %s196_s19 = ssub.s32 %s5688_s5, %s7008_s2 }
  0x34   : > { %p5892_p3 = por %p207_p2, %p206_p1  ;;  %p64_p4 = scmp.ge.s32.totalorder %s7010_s27, 2 }
  0x35   : > { %p197_p5 = scmp.eq.s32.totalorder %s196_s19, 0  ;;  %p212_p6 = scmp.ne.s32.totalorder %s5672_s4, %s5668_s30 }
  0x36   : > { %p213_p7 = scmp.eq.s32.totalorder %s5878_s25, 0  ;;  %s7012_s27 = smov (%p64_p4, %s7010_s27), 0 }
  0x37   : > { %6924 = sst [smem:[#allocation35_spill]] %s7012_s27  ;;  %s638_s16 = ssub.s32 %s5692_s24, %s7012_s27 }
  0x38   : > { %s5901_s17 = scalar_select %p197_p5, %s5676_s0, %s199_s22  }
  0x39   : > { %p5903_p8 = por %p213_p7, %p212_p6  ;;  %p639_p9 = scmp.eq.s32.totalorder %s638_s16, 0 }
  0x3a   : > { %6925 = sst [smem:[#allocation36_spill]] %s5901_s17  ;;  %s641_s15 = sadd.s32 1, %s5664_s29 }
  0x3b   : > { %p651_p10 = scmp.ne.s32.totalorder %s5664_s29, %s5660_s28  ;;  %p652_p11 = scmp.eq.s32.totalorder %s5878_s25, 3 }
  0x3c   : > { %s5914_s19 = scalar_select %p639_p9, %s5664_s29, %s641_s15  }
  0x3d   : > { %p5916_p12 = por %p652_p11, %p651_p10  ;;  %p657_p13 = scmp.ne.s32.totalorder %s5660_s28, %s5656_s3 }
  0x3e   : > { %6927 = sst [smem:[#allocation37_spill]] %s5914_s19  ;;  %p658_p0 = scmp.eq.s32.totalorder %s4368_s26, 3 }
  0x3f   : > { %s6928_s30 = scalar_select %p5916_p12, 1, 0 }
  0x40   : > { %p5137_p1 = scmp.lt.s32.totalorder %s5696_s6, 4  ;;  %s5924_s22 = sand.u32 1, %s5676_s0  }
  0x41   : > { %6929 = sst [smem:[#allocation38_spill]] %s6928_s30  ;;  %p5926_p2 = por %p658_p0, %p657_p13 }
  0x42   : > { %s5931_s16 = sshll.u32 %s5924_s22, 6  ;;  %s5934_s15 = sshll.u32 %s5688_s5, 6 }
  0x43   : > { %s6930_s17 = scalar_select %p5926_p2, 1, 0 }
  0x44   : > { %p5938_p4 = pnand %p5137_p1, %p5892_p3  ;;  %s5943_s26 = sand.u32 1, %s5696_s6  }
  0x45   : > { %6931 = sst [smem:[#allocation39_spill]] %s6930_s17  ;;  %s738_s17 = scalar_lea.vmem [#allocation5], %s5931_s16 }
  0x46   : > { %s6933_s19 = sld [smem:[#allocation52_spill]]  ;;  %s746_s3 = sshll.u32 %s738_s17, 4  ;;  %s747_s3 = int_to_ptr.vmem [resolvable:$true] %s746_s3 }
  0x47   : > { %p4398_p3 = scmp.ge.s32.totalorder %s5696_s6, 1  ;;  %s6869_s21 = scalar_lea.sflag [#allocation6], %s5943_s26 }
  0x48   : > { %s6877_s10 = smov 64   ;;  %s6879_s9 = smov 4  }
  0x49   : > { %p957_p5 = scmp.lt.s32.totalorder %s5696_s6, 5  ;;  %s6934_s11 = sld [smem:[#allocation57_spill]] }
  0x4a   : > { %s800_s8 = scalar_lea.vmem [#allocation8], %s5931_s16  ;;  %s6936_s13 = sld [smem:[#allocation59_spill]] }
  0x4b   : > { %p5964_p6 = pnand %p4398_p3, %p957_p5  ;;  %s808_s23 = sshll.u32 %s800_s8, 4  ;;  %s809_s23 = int_to_ptr.vmem [resolvable:$true] %s808_s23 }
  0x4c   : > { %s743_s29 = scalar_lea.hbm %s6933_s19, %s5934_s15  ;;  %s6876_s8 = scalar_lea.sflag [#allocation12], %s5943_s26 }
  0x4d   : > { %s744_s30 = sshll.u32 %s743_s29, 4  ;;  %s6937_s18 = sld [smem:[#allocation64_spill]]  ;;  %s745_s30 = int_to_ptr.hbm [resolvable:$true] %s744_s30 }
  0x4e   : > { %5111 = dma.hbm_to_vmem [thread:$0]  (!%p5938_p4), %s745_s30, 1024, %s747_s3, %s6869_s21, %s6877_s10, %s6877_s10, %s6879_s9  }
  0x4f   : > { %s805_s0 = scalar_lea.hbm %s6934_s11, %s5934_s15  ;;  %s6870_s3 = scalar_lea.sflag [#allocation9], %s5943_s26 }
  0x50   : > { %s806_s19 = sshll.u32 %s805_s0, 4  ;;  %s849_s29 = scalar_lea.hbm %s6936_s13, %s5934_s15  ;;  %s807_s19 = int_to_ptr.hbm [resolvable:$true] %s806_s19 }
  0x51   : > { %5117 = dma.hbm_to_vmem [thread:$0]  (!%p5938_p4), %s807_s19, 1024, %s809_s23, %s6870_s3, %s6877_s10, %s6877_s10, %s6879_s9  }
  0x52   : > { %s850_s21 = sshll.u32 %s849_s29, 4  ;;  %s844_s11 = scalar_lea.vmem [#allocation11], %s5931_s16  ;;  %s851_s21 = int_to_ptr.hbm [resolvable:$true] %s850_s21 }
  0x53   : > { %s852_s0 = sshll.u32 %s844_s11, 4  ;;  %s4392_s23 = sshll.u32 %s5924_s22, 8  ;;  %s853_s0 = int_to_ptr.vmem [resolvable:$true] %s852_s0 }
  0x54   : > { %5123 = dma.hbm_to_vmem [thread:$0]  (!%p5938_p4), %s851_s21, 1024, %s853_s0, %s6876_s8, %s6877_s10, %s6877_s10, %s6879_s9  }
  0x55   : > { %s4954_s19 = sshll.u32 %s5688_s5, 8  ;;  %s906_s29 = scalar_lea.vmem [#allocation14], %s4392_s23 }
  0x56   : > { %s911_s17 = scalar_lea.hbm %s6937_s18, %s4954_s19  ;;  %s914_s11 = sshll.u32 %s906_s29, 4  ;;  %s915_s11 = int_to_ptr.vmem [resolvable:$true] %s914_s11 }
  0x57   : > { %s912_s13 = sshll.u32 %s911_s17, 4  ;;  %s903_s6 = scalar_lea.sflag [#allocation15], %s5943_s26  ;;  %s913_s13 = int_to_ptr.hbm [resolvable:$true] %s912_s13 }
  0x58   : > { %s5700_s1 = smov 256   ;;  %s5701_s28 = smov 16  }
  0x59   : > { %5129 = dma.hbm_to_vmem [thread:$0]  (!%p5938_p4), %s913_s13, 4096, %s915_s11, %s903_s6, %s5700_s1, %s5700_s1, %s5701_s28  }
  0x5a   : > { %s6938_s20 = sld [smem:[#allocation66_spill]]  ;;  %s935_s30 = scalar_lea.vmem [#allocation16], %s4392_s23 }
  0x5b   : > { %s943_s29 = sshll.u32 %s935_s30, 4  ;;  %s6939_s9 = sld [smem:[#allocation51_spill]]  ;;  %s6003_s29 = int_to_ptr.vmem [resolvable:$true] %s943_s29 }
  0x5c   : > { %s716_s28 = scalar_lea.vmem [#allocation2], %s5931_s16  ;;  %s713_s23 = scalar_lea.sflag [#allocation3], %s5924_s22 }
  0x5d   : > { %s724_s1 = sshll.u32 %s716_s28, 4  ;;  %s6941_s11 = smov 64   ;;  %s725_s1 = int_to_ptr.vmem [resolvable:$true] %s724_s1 }
  0x5e   : > { %s6942_s7 = sld [smem:[#allocation53_spill]]  ;;  %s6943_s22 = scalar_lea.sflag [#allocation6], %s5943_s26 }
  0x5f   : > { %s6944_s12 = sld [smem:[#allocation58_spill]]  ;;  %s6945_s21 = scalar_lea.sflag [#allocation9], %s5943_s26 }
  0x60   : > { %s940_s3 = scalar_lea.hbm %s6938_s20, %s4954_s19  ;;  %s6940_s19 = smov 4  }
  0x61   : > { %s941_s8 = sshll.u32 %s940_s3, 4  ;;  %s721_s18 = scalar_lea.hbm %s6939_s9, %s5934_s15  ;;  %s6005_s8 = int_to_ptr.hbm [resolvable:$true] %s941_s8 }
  0x62   : > { %s722_s13 = sshll.u32 %s721_s18, 4  ;;  %s760_s18 = scalar_lea.vmem [#allocation7], %s5931_s16  ;;  %s723_s13 = int_to_ptr.hbm [resolvable:$true] %s722_s13 }
  0x63   : > { %5108 = dma.hbm_to_vmem [thread:$0]  (!%p5938_p4), %s723_s13, 1024, %s725_s1, %s713_s23, %s6941_s11, %s6941_s11, %s6940_s19  }
  0x64   : > { %s765_s10 = scalar_lea.hbm %s6942_s7, %s5934_s15  ;;  %s768_s3 = sshll.u32 %s760_s18, 4  ;;  %s769_s3 = int_to_ptr.vmem [resolvable:$true] %s768_s3 }
  0x65   : > { %s766_s9 = sshll.u32 %s765_s10, 4  ;;  %s827_s13 = scalar_lea.hbm %s6944_s12, %s5934_s15  ;;  %s767_s9 = int_to_ptr.hbm [resolvable:$true] %s766_s9 }
  0x66   : > { %5114 = dma.hbm_to_vmem [thread:$0]  (!%p5938_p4), %s767_s9, 1024, %s769_s3, %s6943_s22, %s6941_s11, %s6941_s11, %s6940_s19  }
  0x67   : > { %s828_s28 = sshll.u32 %s827_s13, 4  ;;  %s822_s1 = scalar_lea.vmem [#allocation10], %s5931_s16  ;;  %s829_s28 = int_to_ptr.hbm [resolvable:$true] %s828_s28 }
  0x68   : > { %s830_s23 = sshll.u32 %s822_s1, 4  ;;  %s6946_s14 = sld [smem:[#allocation60_spill]]  ;;  %s831_s23 = int_to_ptr.vmem [resolvable:$true] %s830_s23 }
  0x69   : > { %5120 = dma.hbm_to_vmem [thread:$0]  (!%p5938_p4), %s829_s28, 1024, %s831_s23, %s6945_s21, %s6941_s11, %s6941_s11, %s6940_s19  }
  0x6a   : > { %s866_s3 = scalar_lea.vmem [#allocation13], %s5931_s16  ;;  %s6947_s30 = scalar_lea.sflag [#allocation12], %s5943_s26 }
  0x6b   : > { %s874_s22 = sshll.u32 %s866_s3, 4  ;;  %s875_s22 = int_to_ptr.vmem [resolvable:$true] %s874_s22 }
  0x6c   : > { %5132 = dma.hbm_to_vmem [thread:$0]  (!%p5938_p4), %s6005_s8, 4096, %s6003_s29, %s903_s6, %s6941_s11, %s6941_s11, %s6940_s19  }
  0x6d   : > { %961 = sbr.rel (%p5964_p6) target bundleno = 3461 (0xd85), region = 108 }
  0x6e   : > { %s871_s18 = scalar_lea.hbm %s6946_s14, %s5934_s15 }
  0x6f   : > { %s872_s9 = sshll.u32 %s871_s18, 4  ;;  %s873_s9 = int_to_ptr.hbm [resolvable:$true] %s872_s9 }
  0x70   : > { %5126 = dma.hbm_to_vmem [thread:$0]  (!%p5938_p4), %s873_s9, 1024, %s875_s22, %s6947_s30, %s6941_s11, %s6941_s11, %s6940_s19  }
  0x72   : > { %s6066_s16 = sand.u32 1, %s5672_s4  }
  0x73   : > { %s4399_s15 = sshll.u32 %s6066_s16, 6  ;;  %s964_s17 = scalar_lea.sflag [#allocation3], %s6066_s16 }
  0x74   : > { %s6070_s13 = scalar_lea.vmem [#allocation2], %s4399_s15 }
  0x75   : > { %5631 = dma.done.wait (%p5903_p8), %s964_s17, 1024  }
  0x76   : > { %5633 = vsyncadd (%p5903_p8), %s964_s17, 4294966272  ;;  %s973_s6 = sand.u32 1, %s5878_s25   ;;  %s6077_s26 = scalar_lea.vmem [#allocation5], %s4399_s15 }
  0x77   : > { %s974_s27 = scalar_lea.sflag [#allocation6], %s973_s6 }
  0x78   : > { %5635 = dma.done.wait (%p5903_p8), %s974_s27, 2048  }
  0x79   : > { %5637 = vsyncadd (%p5903_p8), %s974_s27, 4294965248  ;;  %s6083_s24 = scalar_lea.vmem [#allocation7], %s4399_s15  ;;  %s994_s8 = scalar_lea.sflag [#allocation9], %s973_s6 }
  0x7a   : > { %s6085_s29 = scalar_lea.vmem [#allocation8], %s4399_s15 }
  0x7b   : > { %6948 = sst [smem:[#allocation40_spill]] %s6085_s29 }
  0x7c   : > { %5639 = dma.done.wait (%p5903_p8), %s994_s8, 2048  }
  0x7d   : > { %5641 = vsyncadd (%p5903_p8), %s994_s8, 4294965248  ;;  %s6091_s25 = scalar_lea.vmem [#allocation10], %s4399_s15  ;;  %s1014_s19 = scalar_lea.sflag [#allocation12], %s973_s6 }
  0x7e   : > { %6949 = sst [smem:[#allocation41_spill]] %s6091_s25  ;;  %s6093_s11 = scalar_lea.vmem [#allocation11], %s4399_s15 }
  0x7f   : > { %6950 = sst [smem:[#allocation42_spill]] %s6093_s11 }
  0x80   : > { %5643 = dma.done.wait (%p5903_p8), %s1014_s19, 2048  }
  0x81   : > { %5645 = vsyncadd (%p5903_p8), %s1014_s19, 4294965248  ;;  %s4406_s28 = sshll.u32 %s6066_s16, 8  ;;  %s6100_s1 = scalar_lea.vmem [#allocation13], %s4399_s15 }
  0x82   : > { %6951 = sst [smem:[#allocation43_spill]] %s6100_s1  ;;  %s1034_s23 = scalar_lea.sflag [#allocation15], %s973_s6 }
  0x83   : > { %s6102_s21 = scalar_lea.vmem [#allocation14], %s4406_s28 }
  0x84   : > { %6952 = sst [smem:[#allocation44_spill]] %s6102_s21 }
  0x85   : > { %5647 = dma.done.wait (%p5903_p8), %s1034_s23, 8192  }
  0x86   : > { %5649 = vsyncadd (%p5903_p8), %s1034_s23, 4294959104  ;;  %s6953_s0 = sld [smem:[#allocation25_spill]]  ;;  %s6173_s12 = scalar_lea.vmem [#allocation16], %s4406_s28 }
  0x87   : > { %s6954_s10 = sld [smem:[#allocation30_spill]] }
  0x88   : > { %s6955_s18 = sld [smem:[#allocation29_spill]] }
  0x89   : > { %s6956_s15 = sld [smem:[#allocation46_spill]] }
  0x8a   : > { %s6957_s8 = sld [smem:[#allocation47_spill]] }
  0x8b   : > { %s6965_s20 = sld [smem:[#allocation61_spill]] }
  0x8c   : > { %s6881_s9 = sand.u32 1, %s6953_s0   ;;  %s6964_s0 = sld [smem:[#allocation56_spill]] }
  0x8d   : > { %s4408_s3 = sshll.u32 %s6881_s9, 3  ;;  %p1193_p7 = scmp.lt.s32.totalorder %s6954_s10, 1 }
  0x8e   : > { %p1201_p9 = scmp.lt.s32.totalorder %s6955_s18, 1  ;;  %s6966_s1 = sld [smem:[#allocation62_spill]] }
  0x8f   : > { %s7014_s10 = smov (!%p1193_p7, %s6954_s10), 1  ;;  %s6968_s6 = sld [smem:[#allocation67_spill]] }
  0x90   : > { %s6115_s22 = scalar_select %p1201_p9, %s6955_s18, 1 }
  0x91   : > { %s4409_s2 = sshll.u32 %s7014_s10, 3  ;;  %s6969_s9 = sld [smem:[#allocation65_spill]] }
  0x92   : > { %s1196_s17 = scalar_lea.vmem %s6956_s15, %s4409_s2  ;;  %s6123_s19 = scalar_lea.vmem %s6957_s8, %s4409_s2 }
  0x93   : > { %6958 = sst [smem:[#allocation45_spill]] %s6123_s19  ;;  %s4956_s4 = sshll.u32 %s6115_s22, 6 }
  0x94   : > { %s6962_s15 = sld [smem:[#allocation50_spill]]  ;;  %s1220_s7 = scalar_lea.vmem %s6964_s0, %s6115_s22 }
  0x95   : > { %s1223_s5 = scalar_lea.vmem %s6965_s20, %s6115_s22  ;;  %s1226_s10 = scalar_lea.vmem %s6966_s1, %s6115_s22 }
  0x96   : > { %s1236_s27 = scalar_lea.vmem %s6968_s6, %s6115_s22  ;;  %s6175_s14 = scalar_lea.vmem [#allocation17], %s4408_s3 }
  0x97   : > { %p4414_p8 = scmp.ne.s32.totalorder %s6955_s18, 0 }
  0x9a   : > { %s6141_s29 = scalar_lea.vmem %s6962_s15, %s4956_s4  ;;  %s6967_s4 = sld [smem:[#allocation63_spill]] }
  0x9b   : > { %s4413_s15 = sshll.u32 %s6115_s22, 2 }
  0x9c   : > { %s6171_s0 = scalar_lea.vmem %s6969_s9, %s4413_s15  ;;  %1241 = sbr.rel (%p4414_p8) target bundleno = 163 (0xa3), region = 148 }
  0xa0   : > { %s1229_s16 = scalar_lea.vmem %s6967_s4, %s6115_s22 }
  0xa1   : > { %v1242_v0 = vld [vmem:[%s1196_s17] sm:$0xff] }
  0xa2   : > { %1243 = vst [vmem:[%s6175_s14] sm:$0xff] %v1242_v0 }
  0xa3 PF: > { %v5702_v2 = vmov 128.0   ;;  %v4964_v3 = vld [vmem:[%s6141_s29 + $0x38] sm:$0xff]  ;;  %v4963_v16 = vld [vmem:[%s6141_s29 + $0x30] sm:$0xff]  ;;  %v4962_v19 = vld [vmem:[%s6141_s29 + $0x28] sm:$0xff]  ;;  %s6972_s18 = sld [smem:[#allocation49_spill]]  ;;  %s5703_s17 = smov 32  }
  0xa4   : > { %5247 = vrcp.f32 %v5702_v2  ;;  %v4972_v4 = vld [vmem:[%s6070_s13 + $0x38] sm:$0xff]  ;;  %1404 = vmatpush.bf16.msra.mxu0 %v4964_v3  ;;  %v4971_v17 = vld [vmem:[%s6070_s13 + $0x30] sm:$0xff]  ;;  %v4970_v20 = vld [vmem:[%s6070_s13 + $0x28] sm:$0xff]  ;;  %s5704_s19 = smov 96   ;;  %s5705_s8 = smov 64   ;;  %vm1570_vm4 = vcmask 1047556  }
  0xa5   : > { %v4980_v5 = vld [vmem:[%s6077_s26 + $0x38] sm:$0xff]  ;;  %1465 = vmatpush.bf16.msra.mxu1 %v4972_v4  ;;  %v4979_v18 = vld [vmem:[%s6077_s26 + $0x30] sm:$0xff]  ;;  %v4978_v21 = vld [vmem:[%s6077_s26 + $0x28] sm:$0xff]  ;;  %v5706_v63 = vmov 1983009808   ;;  %vm1906_vm5 = vcmask 261120  }
  0xa6   : > { %1526 = vmatpush.bf16.msra.mxu2 %v4980_v5  ;;  %v4961_v22 = vld [vmem:[%s6141_s29 + $0x20] sm:$0xff]  ;;  %v4960_v25 = vld [vmem:[%s6141_s29 + $0x18] sm:$0xff]  ;;  %v4959_v28 = vld [vmem:[%s6141_s29 + $0x10] sm:$0xff]  ;;  %v1561_v0 = vunpack.c.l.s4 %v5706_v63  ;;  %vm1983_vm7 = vcmask 64512   ;;  %vm2035_vm8 = vcmask 1043456   ;;  %s6974_s20 = sld [smem:[#allocation41_spill]] }
  0xa7   : > { %v4969_v23 = vld [vmem:[%s6070_s13 + $0x20] sm:$0xff]  ;;  %v4968_v26 = vld [vmem:[%s6070_s13 + $0x18] sm:$0xff]  ;;  %v4967_v29 = vld [vmem:[%s6070_s13 + $0x10] sm:$0xff]  ;;  %vm2242_vm9 = vcmask 523264   ;;  %vm2245_vm10 = vcmask 785408   ;;  %s6975_s21 = sld [smem:[#allocation40_spill]] }
  0xa8   : > { %1405 = vmatpush.bf16.msra.mxu0 %v4963_v16  ;;  %v4977_v24 = vld [vmem:[%s6077_s26 + $0x20] sm:$0xff]  ;;  %v4976_v27 = vld [vmem:[%s6077_s26 + $0x18] sm:$0xff]  ;;  %v4975_v30 = vld [vmem:[%s6077_s26 + $0x10] sm:$0xff]  ;;  %v6226_v4 = vunpack.c.0.s8 %v1561_v0  ;;  %s6976_s30 = sld [smem:[#allocation54_spill]]  ;;  %s3982_s23 = sshll.u32 %s6175_s14, 4  ;;  %s3983_s23 = int_to_ptr.vmem [resolvable:$true] %s3982_s23 }
  0xa9   : > { %v1244_v1 = vld [vmem:[%s6175_s14] sm:$0xff]  ;;  %1466 = vmatpush.bf16.msra.mxu1 %v4971_v17  ;;  %s6973_s3 = scalar_lea.vmem %s6972_s18, %s6115_s22  ;;  %s6978_s15 = sld [smem:[#allocation45_spill]] }
  0xaa   : > { %1255 = vadd.xlane.f32.xlu0 %v1244_v1  ;;  %v5248_v6 = vpop.eup %5247  ;;  %1527 = vmatpush.bf16.msra.mxu2 %v4979_v18  ;;  %v4958_v31 = vld [vmem:[%s6141_s29 + $0x8] sm:$0xff]  ;;  %v4957_v34 = vld [vmem:[%s6141_s29] sm:$0xff]  ;;  %s6970_s29 = sld [smem:[#allocation48_spill]] }
  0xab   : > { %v1258_v7 = vmul.f32 128.0, %v5248_v6  ;;  %vm1262_vm0 = vweird.f32 %v5248_v6  ;;  %v4966_v32 = vld [vmem:[%s6070_s13 + $0x8] sm:$0xff]  ;;  %v4965_v35 = vld [vmem:[%s6070_s13] sm:$0xff]  ;;  %s6979_s2 = sld [smem:[#allocation42_spill]] }
  0xac   : > { %1406 = vmatpush.bf16.msra.mxu0 %v4962_v19  ;;  %v4974_v33 = vld [vmem:[%s6077_s26 + $0x8] sm:$0xff]  ;;  %v4973_v36 = vld [vmem:[%s6077_s26] sm:$0xff]  ;;  %s6980_s9 = sld [smem:[#allocation55_spill]] }
  0xad   : > { %v1259_v8 = vsub.f32 1.0, %v1258_v7  ;;  %1467 = vmatpush.bf16.msra.mxu1 %v4970_v20  ;;  %v5239_v49 = vld [vmem:[%s6973_s3] ss:$0 sm:$0xff]  ;;  %v5707_v7 = vmov 1934713408   ;;  %s6984_s11 = sld [smem:[#allocation44_spill]] }
  0xae   : > { %1528 = vmatpush.bf16.msra.mxu2 %v4978_v21  ;;  %s6977_s4 = scalar_lea.vmem %s6976_s30, %s6115_s22 }
  0xaf   : > { %v1260_v9 = vmul.f32 %v5248_v6, %v1259_v8  ;;  %v1575_v8 = vunpack.c.l.s4 %v5707_v7 }
  0xb0   : > { %1407 = vmatpush.bf16.msra.mxu0 %v4961_v22  ;;  %s6971_s25 = scalar_lea.vmem %s6970_s29, %s6115_s22 }
  0xb1   : > { %v1261_v10 = vadd.f32 %v5248_v6, %v1260_v9  ;;  %1468 = vmatpush.bf16.msra.mxu1 %v4969_v23  ;;  %v5238_v46 = vld [vmem:[%s6971_s25] ss:$0 sm:$0xff]  ;;  %v6230_v18 = vunpack.c.0.s8 %v1575_v8 }
  0xb2   : > { %1529 = vmatpush.bf16.msra.mxu2 %v4977_v24  ;;  %s6981_s13 = scalar_lea.vmem %s6980_s9, %s6115_s22 }
  0xb3   : > { %v6183_v11 = vsel %vm1262_vm0, %v5248_v6, %v1261_v10 }
  0xb4   : > { %1408 = vmatpush.bf16.msra.mxu0 %v4960_v25 }
  0xb5   : > { %1469 = vmatpush.bf16.msra.mxu1 %v4968_v26 }
  0xb6   : > { %1530 = vmatpush.bf16.msra.mxu2 %v4976_v27 }
  0xb8   : > { %1409 = vmatpush.bf16.msra.mxu0 %v4959_v28 }
  0xb9   : > { %1470 = vmatpush.bf16.msra.mxu1 %v4967_v29 }
  0xba   : > { %1531 = vmatpush.bf16.msra.mxu2 %v4975_v30 }
  0xbc   : > { %1410 = vmatpush.bf16.msra.mxu0 %v4958_v31 }
  0xbd   : > { %1471 = vmatpush.bf16.msra.mxu1 %v4966_v32 }
  0xbe   : > { %1532 = vmatpush.bf16.msra.mxu2 %v4974_v33 }
  0xc0   : > { %1411 = vmatpush.bf16.msra.mxu0 %v4957_v34 }
  0xc1   : > { %1472 = vmatpush.bf16.msra.mxu1 %v4965_v35 }
  0xc2   : > { %1533 = vmatpush.bf16.msra.mxu2 %v4973_v36 }
 0x11d   : > { %v1256_v12 = vpop.xlane.xlu0 %1255 }
 0x11e   : > { %v1264_v13 = vmul.f32 %v6183_v11, %v1256_v12 }
 0x120   : > { %v1265_v14 = vsub.f32 %v1244_v1, %v1264_v13 }
 0x122   : > { %v1266_v15 = vmul.f32 %v1265_v14, %v1265_v14 }
 0x124   : > { %1267 = vadd.xlane.f32.xlu0 %v1266_v15 }
 0x197   : > { %v1268_v37 = vpop.xlane.xlu0 %1267 }
 0x198   : > { %v1269_v38 = vmul.f32 %v1268_v37, %v6183_v11 }
 0x19a   : > { %v1270_v39 = vadd.f32 1e-05, %v1269_v38 }
 0x19c   : > { %5249 = vrsqrt.f32 %v1270_v39  ;;  %vm1277_vm2 = vweird.f32 %v1270_v39 }
 0x1a2   : > { %v5250_v40 = vpop.eup %5249 }
 0x1a3   : > { %v1272_v41 = vmul.f32 %v5250_v40, %v1270_v39  ;;  %vm1278_vm1 = vweird.f32 %v5250_v40 }
 0x1a4   : > { %vm1279_vm3 = vmor %vm1277_vm2, %vm1278_vm1 }
 0x1a5   : > { %v1273_v42 = vmul.f32 %v5250_v40, %v1272_v41 }
 0x1a7   : > { %v1274_v43 = vmul.f32 0.5, %v1273_v42 }
 0x1a9   : > { %v1275_v44 = vsub.f32 1.5, %v1274_v43 }
 0x1ab   : > { %v1276_v45 = vmul.f32 %v5250_v40, %v1275_v44 }
 0x1ad   : > { %v1280_v47 = vsel %vm1279_vm3, %v5250_v40, %v1276_v45 }
 0x1ae   : > { %v1281_v48 = vmul.f32 %v1280_v47, %v1265_v14 }
 0x1b0   : > { %v1285_v50 = vmul.f32 %v5238_v46, %v1281_v48 }
 0x1b2   : > { %v1289_v51 = vadd.f32 %v5239_v49, %v1285_v50 }
 0x1b4   : > { %v1290_v52 = vpack.c.bf16 %v1289_v51, %v1289_v51 }
 0x1b6   : > { %1412 = vmatmul.bf16.vlgmr.msra.gmra.mxu0 %v1290_v52  ;;  %1473 = vmatmul.bf16.vlgmr.msra.gmra.mxu1 %v1290_v52 }
 0x1b7   : > { %1534 = vmatmul.bf16.vlgmr.msra.gmra.mxu2 %v1290_v52 }
 0x233   : > { %v1413_v53 = vpop.f32.mrf.mxu0  ;;  %v1474_v54 = vpop.f32.mrf.mxu1 }
 0x234   : > { %v1539_v55 = vpack.c.bf16 %v1413_v53, %v1413_v53  ;;  %v1662_v56 = vpack.c.bf16 %v1474_v54, %v1474_v54 }
 0x236   : > { %1668 = vrot.lane.b32.xlu2 %v1662_v56, %s5703_s17  ;;  %1664 = vrot.lane.b32.xlu1 %v1662_v56, %s5704_s19  ;;  %v1673_v3 = vshrl.u32 %v1662_v56, 16  ;;  %v1550_v17 = vshrl.u32 %v1539_v55, 16 }
 0x237   : > { %1543 = vrot.lane.b32.xlu0 %v1539_v55, %s5705_s8 }
 0x23a   : > { %v6221_v57 = vpop.f32.mrf.mxu2 }
 0x23b   : > { %v1415_v58 = vpop.f32.mrf.mxu0  ;;  %v1476_v59 = vpop.f32.mrf.mxu1 }
 0x23e   : > { %1666 = vrot.lane.b32.xlu1 %v1662_v56, %s5705_s8  ;;  %1541 = vrot.lane.b32.xlu2 %v1539_v55, %s5704_s19 }
 0x242   : > { %v1537_v60 = vpop.f32.mrf.mxu2 }
 0x246   : > { %1545 = vrot.lane.b32.xlu1 %v1539_v55, %s5703_s17 }
 0x290   : > { %v1669_v61 = vpop.permute.xlu2 %1668 }
 0x291   : > { %v1680_v13 = vshrl.u32 %v1669_v61, 16 }
 0x298   : > { %v1542_v5 = vpop.permute.xlu2 %1541 }
 0x299   : > { %v1551_v10 = vshrl.u32 %v1542_v5, 16  ;;  %v1549_v19 = vpack.i.b16 %v1542_v5, %v1539_v55 }
 0x29b   : > { %v1552_v23 = vpack.i.b16 %v1551_v10, %v1550_v17  ;;  %v1563_v30 = vperm.slane %v1549_v19, %v6226_v4 }
 0x29d   : > { %v1590_v34 = vperm.slane %v1552_v23, %v6226_v4  ;;  %v1572_v47 = vrot.slane %v1563_v30, 4 }
 0x29f   : > { %v1598_v51 = vrot.slane %v1590_v34, 4 }
 0x2a8   : > { %v1665_v62 = vpop.permute.xlu1 %1664 }
 0x2a9   : > { %v1674_v1 = vshrl.u32 %v1665_v62, 16  ;;  %v1672_v2 = vpack.i.b16 %v1665_v62, %v1662_v56  ;;  %v1544_v28 = vpop.permute.xlu0 %1543 }
 0x2aa   : > { %v1556_v39 = vshrl.u32 %v1544_v28, 16 }
 0x2ab   : > { %v1675_v6 = vpack.i.b16 %v1674_v1, %v1673_v3  ;;  %v1686_v9 = vperm.slane %v1672_v2, %v6226_v4 }
 0x2ad   : > { %v1712_v14 = vperm.slane %v1675_v6, %v6226_v4  ;;  %v1694_v20 = vrot.slane %v1686_v9, 4 }
 0x2af   : > { %v1720_v24 = vrot.slane %v1712_v14, 4 }
 0x2b0   : > { %v1667_v12 = vpop.permute.xlu1 %1666 }
 0x2b1   : > { %v1678_v15 = vpack.i.b16 %v1669_v61, %v1667_v12  ;;  %v1679_v16 = vshrl.u32 %v1667_v12, 16 }
 0x2b3   : > { %v1681_v21 = vpack.i.b16 %v1680_v13, %v1679_v16  ;;  %v1691_v22 = vperm.slane %v1678_v15, %v6226_v4 }
 0x2b5   : > { %v1692_v25 = vrot.slane %v1691_v22, 4  ;;  %v1695_v26 = vsel %vm1570_vm4, %v1691_v22, %v1694_v20  ;;  %v1717_v27 = vperm.slane %v1681_v21, %v6226_v4 }
 0x2b6   : > { %v1703_v29 = vperm.slane %v1695_v26, %v6230_v18 }
 0x2b7   : > { %v1693_v31 = vsel %vm1570_vm4, %v1692_v25, %v1686_v9  ;;  %v1718_v32 = vrot.slane %v1717_v27, 4  ;;  %v1721_v33 = vsel %vm1570_vm4, %v1717_v27, %v1720_v24 }
 0x2b8   : > { %v1699_v35 = vperm.slane %v1693_v31, %v6230_v18  ;;  %v1706_v36 = vrot.slane %v1703_v29, 4  ;;  %v1729_v37 = vperm.slane %v1721_v33, %v6230_v18  ;;  %v1546_v38 = vpop.permute.xlu1 %1545 }
 0x2b9   : > { %v1719_v40 = vsel %vm1570_vm4, %v1718_v32, %v1712_v14  ;;  %v1555_v41 = vpack.i.b16 %v1546_v38, %v1544_v28  ;;  %v1557_v42 = vshrl.u32 %v1546_v38, 16 }
 0x2ba   : > { %v1704_v43 = vrot.slane %v1699_v35, 4  ;;  %v1707_v44 = vsel %vm1570_vm4, 0, %v1706_v36  ;;  %v1725_v45 = vperm.slane %v1719_v40, %v6230_v18  ;;  %v1732_v46 = vrot.slane %v1729_v37, 4 }
 0x2bb   : > { %v1739_v48 = vrot.slane %v1707_v44, 4  ;;  %v1558_v49 = vpack.i.b16 %v1557_v42, %v1556_v39  ;;  %v1568_v50 = vperm.slane %v1555_v41, %v6226_v4  ;;  %v1734_v62 = vsel %vm1570_vm4, %v1706_v36, %v1699_v35 }
 0x2bc   : > { %v1705_v52 = vsel %vm1570_vm4, 0, %v1704_v43  ;;  %v1730_v53 = vrot.slane %v1725_v45, 4  ;;  %v1733_v54 = vsel %vm1570_vm4, 0, %v1732_v46  ;;  %v1753_v8 = vsel %vm1570_vm4, %v1732_v46, %v1725_v45 }
 0x2bd   : > { %v1758_v55 = vrot.slane %v1733_v54, 4  ;;  %v1569_v56 = vrot.slane %v1568_v50, 4  ;;  %v1573_v58 = vsel %vm1570_vm4, %v1568_v50, %v1572_v47  ;;  %v1595_v59 = vperm.slane %v1558_v49, %v6226_v4 }
 0x2be   : > { %v1581_v60 = vperm.slane %v1573_v58, %v6230_v18  ;;  %v1731_v61 = vsel %vm1570_vm4, 0, %v1730_v53  ;;  %v1740_v63 = vsel %vm1570_vm4, %v1739_v48, %v1705_v52  ;;  %v1738_v10 = vperm.slane %v1734_v62, %v6226_v4 }
 0x2bf   : > { %v1571_v0 = vsel %vm1570_vm4, %v1569_v56, %v1563_v30  ;;  %v1596_v1 = vrot.slane %v1595_v59, 4  ;;  %v1599_v2 = vsel %vm1570_vm4, %v1595_v59, %v1598_v51  ;;  %v1744_v3 = vperm.slane %v1740_v63, %v6226_v4 }
 0x2c0   : > { %v1577_v5 = vperm.slane %v1571_v0, %v6230_v18  ;;  %v1584_v6 = vrot.slane %v1581_v60, 4  ;;  %v1607_v7 = vperm.slane %v1599_v2, %v6230_v18  ;;  %v1759_v13 = vsel %vm1570_vm4, %v1758_v55, %v1731_v61 }
 0x2c1   : > { %v1597_v9 = vsel %vm1570_vm4, %v1596_v1, %v1590_v34  ;;  %v1745_v12 = vrot.slane %v1744_v3, 4  ;;  %v1757_v21 = vperm.slane %v1753_v8, %v6226_v4  ;;  %v1763_v22 = vperm.slane %v1759_v13, %v6226_v4 }
 0x2c2   : > { %v1582_v14 = vrot.slane %v1577_v5, 4  ;;  %v1585_v15 = vsel %vm1570_vm4, 0, %v1584_v6  ;;  %v1603_v16 = vperm.slane %v1597_v9, %v6230_v18  ;;  %v1610_v17 = vrot.slane %v1607_v7, 4 }
 0x2c3   : > { %v1617_v19 = vrot.slane %v1585_v15, 4  ;;  %v1746_v20 = vsel %vm1570_vm4, %v1745_v12, %v1738_v10  ;;  %v1612_v27 = vsel %vm1570_vm4, %v1584_v6, %v1577_v5  ;;  %v1764_v29 = vrot.slane %v1763_v22, 4 }
 0x2c4   : > { %v1583_v23 = vsel %vm1570_vm4, 0, %v1582_v14  ;;  %v1608_v24 = vrot.slane %v1603_v16, 4  ;;  %v1611_v25 = vsel %vm1570_vm4, 0, %v1610_v17  ;;  %v1750_v26 = vperm.slane %v1746_v20, %v6230_v18 }
 0x2c5   : > { %v1636_v28 = vrot.slane %v1611_v25, 4  ;;  %v1618_v30 = vsel %vm1570_vm4, %v1617_v19, %v1583_v23  ;;  %v1765_v34 = vsel %vm1570_vm4, %v1764_v29, %v1757_v21  ;;  %v1616_v37 = vperm.slane %v1612_v27, %v6226_v4 }
 0x2c6   : > { %v1609_v31 = vsel %vm1570_vm4, 0, %v1608_v24  ;;  %v1751_v32 = vrot.slane %v1750_v26, 4  ;;  %v1622_v33 = vperm.slane %v1618_v30, %v6226_v4  ;;  %v1769_v36 = vperm.slane %v1765_v34, %v6230_v18 }
 0x2c7   : > { %v1637_v35 = vsel %vm1570_vm4, %v1636_v28, %v1609_v31  ;;  %v1631_v39 = vsel %vm1570_vm4, %v1610_v17, %v1603_v16  ;;  %v1775_v40 = vshrl.u32 %v1750_v26, 16  ;;  %v1247_v13 = vlaneseq }
 0x2c8   : > { %v1623_v38 = vrot.slane %v1622_v33, 4  ;;  %v1752_v41 = vsel %vm1570_vm4, 0, %v1751_v32  ;;  %v1641_v42 = vperm.slane %v1637_v35, %v6226_v4  ;;  %v1774_v43 = vpack.i.b16 %v1769_v36, %v1750_v26 }
 0x2c9   : > { %v1776_v44 = vshrl.u32 %v1769_v36, 16  ;;  %v1770_v45 = vrot.slane %v1769_v36, 4  ;;  %v1635_v48 = vperm.slane %v1631_v39, %v6226_v4  ;;  %v1781_v53 = vshrl.u32 %v1752_v41, 16 }
 0x2ca   : > { %v1624_v46 = vsel %vm1570_vm4, %v1623_v38, %v1616_v37  ;;  %v1642_v49 = vrot.slane %v1641_v42, 4  ;;  %v1911_v50 = vsel %vm1906_vm5, %v1774_v43, 0  ;;  %v1248_v14 = vshrl.u32 %v1247_v13, 7 }
 0x2cb   : > { %v1628_v47 = vperm.slane %v1624_v46, %v6230_v18  ;;  %v1777_v51 = vpack.i.b16 %v1776_v44, %v1775_v40  ;;  %v1771_v52 = vsel %vm1570_vm4, 0, %v1770_v45  ;;  %1920 = vmatpush.bf16.xpose.msra.mxu3 %v1911_v50  ;;  %v1250_v15 = vand.u32 127, %v1247_v13 }
 0x2cc   : > { %v1782_v54 = vshrl.u32 %v1771_v52, 16  ;;  %v1643_v55 = vsel %vm1570_vm4, %v1642_v49, %v1635_v48  ;;  %v1780_v62 = vpack.i.b16 %v1771_v52, %v1752_v41  ;;  %v5708_v16 = vmov -1e+30  }
 0x2cd   : > { %v1629_v56 = vrot.slane %v1628_v47, 4  ;;  %v1930_v58 = vsel %vm1906_vm5, %v1777_v51, 0  ;;  %v1647_v59 = vperm.slane %v1643_v55, %v6230_v18  ;;  %v1653_v9 = vshrl.u32 %v1628_v47, 16 }
 0x2ce   : > { %v1783_v60 = vpack.i.b16 %v1782_v54, %v1781_v53  ;;  %v1949_v6 = vsel %vm1906_vm5, %v1780_v62, 0  ;;  %vm1251_vm6 = vcmp.le.s32.totalorder %v1250_v15, %v1248_v14  ;;  %v1784_v32 = vpack.c.bf16 %v6221_v57, %v6221_v57 }
 0x2cf   : > { %v1652_v61 = vpack.i.b16 %v1647_v59, %v1628_v47  ;;  %v1630_v63 = vsel %vm1570_vm4, 0, %v1629_v56  ;;  %v1648_v0 = vrot.slane %v1647_v59, 4  ;;  %v1654_v8 = vshrl.u32 %v1647_v59, 16 }
 0x2d0   : > { %v1968_v1 = vsel %vm1906_vm5, %v1783_v60, 0  ;;  %v1659_v3 = vshrl.u32 %v1630_v63, 16  ;;  %v1252_v17 = vsel %vm1251_vm6, 0.0, %v5708_v16 }
 0x2d1   : > { %1977 = vmatpush.bf16.xpose.msrb.mxu0 %v1968_v1  ;;  %v1649_v2 = vsel %vm1570_vm4, 0, %v1648_v0  ;;  %v1655_v10 = vpack.i.b16 %v1654_v8, %v1653_v9 }
 0x2d2   : > { %v1660_v5 = vshrl.u32 %v1649_v2, 16  ;;  %4511 = vmatmul.msk.bf16.vlgmr.msra.gmra.mxu3 %vm1906_vm5, %v1652_v61  ;;  %v1658_v12 = vpack.i.b16 %v1649_v2, %v1630_v63 }
 0x2d3   : > { %1939 = vmatpush.bf16.xpose.msrb.mxu3 %v1930_v58  ;;  %v1795_v58 = vshrl.u32 %v1784_v32, 16 }
 0x2d4   : > { %v1661_v7 = vpack.i.b16 %v1660_v5, %v1659_v3 }
 0x2d8   : > { %4514 = vmatmul.msk.bf16.vlgmr.msrb.gmra.mxu0 %vm1906_vm5, %v1661_v7 }
 0x2db   : > { %1958 = vmatpush.bf16.xpose.msra.mxu3 %v1949_v6 }
 0x2e2   : > { %4512 = vmatmul.msk.bf16.vlgmr.msrb.gmra.mxu3 %vm1906_vm5, %v1655_v10 }
 0x2f2   : > { %4513 = vmatmul.msk.bf16.vlgmr.msra.gmra.mxu3 %vm1906_vm5, %v1658_v12 }
 0x355   : > { %v1979_v19 = vpop.f32.mrf.mxu0  ;;  %v1922_v21 = vpop.f32.mrf.mxu3 }
 0x356   : > { %v1980_v20 = vadd.f32 %v1979_v19, %v1252_v17  ;;  %v1923_v23 = vadd.f32 %v1922_v21, %v1252_v17 }
 0x358   : > { %v1993_v22 = vsel %vm1983_vm7, %v1980_v20, -inf  ;;  %v1984_v26 = vsel %vm1983_vm7, %v1923_v23, -inf }
 0x359   : > { %1994 = vmax.xlane.f32.xlu2 %v1993_v22 }
 0x35d   : > { %v1981_v24 = vpop.f32.mrf.mxu0  ;;  %v1924_v25 = vpop.f32.mrf.mxu3 }
 0x361   : > { %1985 = vmax.xlane.f32.xlu2 %v1984_v26 }
 0x365   : > { %v1941_v27 = vpop.f32.mrf.mxu3 }
 0x366   : > { %v1942_v28 = vadd.f32 %v1941_v27, %v1252_v17 }
 0x368   : > { %v1987_v29 = vsel %vm1983_vm7, %v1942_v28, -inf }
 0x369   : > { %1988 = vmax.xlane.f32.xlu1 %v1987_v29 }
 0x36d   : > { %v1943_v30 = vpop.f32.mrf.mxu3 }
 0x375   : > { %v1960_v31 = vpop.f32.mrf.mxu3 }
 0x376   : > { %v1961_v33 = vadd.f32 %v1960_v31, %v1252_v17 }
 0x378   : > { %v1990_v34 = vsel %vm1983_vm7, %v1961_v33, -inf }
 0x379   : > { %1786 = vrot.lane.b32.xlu2 %v1784_v32, %s5704_s19  ;;  %1991 = vmax.xlane.f32.xlu0 %v1990_v34 }
 0x37d   : > { %v1962_v35 = vpop.f32.mrf.mxu3 }
 0x382   : > { %1788 = vrot.lane.b32.xlu1 %v1784_v32, %s5705_s8 }
 0x38d   : > { %1790 = vrot.lane.b32.xlu0 %v1784_v32, %s5703_s17 }
 0x3cc   : > { %v1995_v36 = vpop.xlane.xlu2 %1994 }
 0x3cd   : > { %v1999_v39 = vsub.f32 %v1980_v20, %v1995_v36 }
 0x3cf   : > { %v2006_v41 = vmul.f32 1.442695, %v1999_v39 }
 0x3d4   : > { %v1986_v37 = vpop.xlane.xlu2 %1985 }
 0x3d5   : > { %v1996_v38 = vsub.f32 %v1923_v23, %v1986_v37 }
 0x3d7   : > { %v2000_v40 = vmul.f32 1.442695, %v1996_v38 }
 0x3d9   : > { %5251 = vpow2.f32 %v2000_v40 }
 0x3da   : > { %5253 = vpow2.f32 %v2006_v41 }
 0x3dc   : > { %v1989_v42 = vpop.xlane.xlu1 %1988  ;;  %v1787_v53 = vpop.permute.xlu2 %1786 }
 0x3dd   : > { %v1997_v57 = vsub.f32 %v1942_v28, %v1989_v42  ;;  %v1796_v55 = vshrl.u32 %v1787_v53, 16  ;;  %v1794_v59 = vpack.i.b16 %v1787_v53, %v1784_v32 }
 0x3df   : > { %v6307_v43 = vpop.eup %5251  ;;  %v2002_v44 = vmul.f32 1.442695, %v1997_v57  ;;  %v1797_v60 = vpack.i.b16 %v1796_v55, %v1795_v58  ;;  %v1808_v62 = vperm.slane %v1794_v59, %v6226_v4 }
 0x3e0   : > { %v2008_v45 = vsel %vm1983_vm7, %v6307_v43, 0.0  ;;  %v6311_v46 = vpop.eup %5253 }
 0x3e1   : > { %2009 = vadd.xlane.f32.xlu2 %v2008_v45  ;;  %5255 = vpow2.f32 %v2002_v44  ;;  %v2017_v48 = vsel %vm1983_vm7, %v6311_v46, 0.0  ;;  %v1834_v0 = vperm.slane %v1797_v60, %v6226_v4  ;;  %v1816_v5 = vrot.slane %v1808_v62, 4 }
 0x3e3   : > { %v1842_v8 = vrot.slane %v1834_v0, 4 }
 0x3e7   : > { %v6313_v47 = vpop.eup %5255 }
 0x3e8   : > { %v2011_v49 = vsel %vm1983_vm7, %v6313_v47, 0.0 }
 0x3e9   : > { %2018 = vadd.xlane.f32.xlu2 %v2017_v48  ;;  %2012 = vadd.xlane.f32.xlu1 %v2011_v49 }
 0x3ec   : > { %v1992_v50 = vpop.xlane.xlu0 %1991 }
 0x3ed   : > { %v1998_v51 = vsub.f32 %v1961_v33, %v1992_v50 }
 0x3ef   : > { %v2004_v52 = vmul.f32 1.442695, %v1998_v51 }
 0x3f1   : > { %5257 = vpow2.f32 %v2004_v52 }
 0x3f4   : > { %v1789_v61 = vpop.permute.xlu1 %1788 }
 0x3f5   : > { %v1801_v1 = vshrl.u32 %v1789_v61, 16 }
 0x3f7   : > { %v6319_v54 = vpop.eup %5257 }
 0x3f8   : > { %v2014_v56 = vsel %vm1983_vm7, %v6319_v54, 0.0 }
 0x3f9   : > { %2015 = vadd.xlane.f32.xlu0 %v2014_v56 }
 0x3ff   : > { %v1791_v63 = vpop.permute.xlu0 %1790 }
 0x400   : > { %v1800_v2 = vpack.i.b16 %v1791_v63, %v1789_v61  ;;  %v1802_v3 = vshrl.u32 %v1791_v63, 16 }
 0x402   : > { %v1803_v6 = vpack.i.b16 %v1802_v3, %v1801_v1  ;;  %v1813_v7 = vperm.slane %v1800_v2, %v6226_v4 }
 0x404   : > { %v1814_v9 = vrot.slane %v1813_v7, 4  ;;  %v1817_v10 = vsel %vm1570_vm4, %v1813_v7, %v1816_v5  ;;  %v1839_v12 = vperm.slane %v1803_v6, %v6226_v4 }
 0x405   : > { %v1825_v13 = vperm.slane %v1817_v10, %v6230_v18 }
 0x406   : > { %v1815_v14 = vsel %vm1570_vm4, %v1814_v9, %v1808_v62  ;;  %v1840_v15 = vrot.slane %v1839_v12, 4  ;;  %v1843_v16 = vsel %vm1570_vm4, %v1839_v12, %v1842_v8 }
 0x407   : > { %v1821_v17 = vperm.slane %v1815_v14, %v6230_v18  ;;  %v1828_v19 = vrot.slane %v1825_v13, 4  ;;  %v1851_v20 = vperm.slane %v1843_v16, %v6230_v18 }
 0x408   : > { %v1841_v21 = vsel %vm1570_vm4, %v1840_v15, %v1834_v0 }
 0x409   : > { %v1826_v22 = vrot.slane %v1821_v17, 4  ;;  %v1829_v23 = vsel %vm1570_vm4, 0, %v1828_v19  ;;  %v1847_v24 = vperm.slane %v1841_v21, %v6230_v18  ;;  %v1854_v25 = vrot.slane %v1851_v20, 4 }
 0x40a   : > { %v1861_v26 = vrot.slane %v1829_v23, 4  ;;  %v1856_v31 = vsel %vm1570_vm4, %v1828_v19, %v1821_v17 }
 0x40b   : > { %v1827_v27 = vsel %vm1570_vm4, 0, %v1826_v22  ;;  %v1852_v28 = vrot.slane %v1847_v24, 4  ;;  %v1855_v29 = vsel %vm1570_vm4, 0, %v1854_v25  ;;  %v1875_v35 = vsel %vm1570_vm4, %v1854_v25, %v1847_v24 }
 0x40c   : > { %v1880_v30 = vrot.slane %v1855_v29, 4  ;;  %v1862_v32 = vsel %vm1570_vm4, %v1861_v26, %v1827_v27  ;;  %v1860_v37 = vperm.slane %v1856_v31, %v6226_v4  ;;  %v1879_v41 = vperm.slane %v1875_v35, %v6226_v4 }
 0x40d   : > { %v1853_v33 = vsel %vm1570_vm4, 0, %v1852_v28  ;;  %v1866_v34 = vperm.slane %v1862_v32, %v6226_v4 }
 0x40e   : > { %v1881_v36 = vsel %vm1570_vm4, %v1880_v30, %v1853_v33 }
 0x40f   : > { %v1867_v38 = vrot.slane %v1866_v34, 4  ;;  %v1885_v39 = vperm.slane %v1881_v36, %v6226_v4 }
 0x411   : > { %v1868_v40 = vsel %vm1570_vm4, %v1867_v38, %v1860_v37  ;;  %v1886_v42 = vrot.slane %v1885_v39, 4  ;;  %v4988_v37 = vld [vmem:[%s6083_s24 + $0x38] sm:$0xff] }
 0x412   : > { %v1872_v57 = vperm.slane %v1868_v40, %v6230_v18  ;;  %2300 = vmatpush.bf16.msrb.mxu1 %v4988_v37  ;;  %v4985_v37 = vld [vmem:[%s6083_s24 + $0x20] sm:$0xff] }
 0x413   : > { %v1887_v44 = vsel %vm1570_vm4, %v1886_v42, %v1879_v41 }
 0x414   : > { %v1891_v45 = vperm.slane %v1887_v44, %v6230_v18  ;;  %v1873_v48 = vrot.slane %v1872_v57, 4  ;;  %v1897_v49 = vshrl.u32 %v1872_v57, 16 }
 0x416   : > { %v1896_v50 = vpack.i.b16 %v1891_v45, %v1872_v57  ;;  %v1898_v51 = vshrl.u32 %v1891_v45, 16  ;;  %v1874_v52 = vsel %vm1570_vm4, 0, %v1873_v48  ;;  %v1892_v53 = vrot.slane %v1891_v45, 4 }
 0x417   : > { %v1903_v60 = vshrl.u32 %v1874_v52, 16 }
 0x418   : > { %v2037_v55 = vsel %vm2035_vm8, %v1896_v50, 0  ;;  %v1899_v56 = vpack.i.b16 %v1898_v51, %v1897_v49  ;;  %v1893_v58 = vsel %vm1570_vm4, 0, %v1892_v53 }
 0x419   : > { %2046 = vmatpush.bf16.msrb.mxu2 %v2037_v55  ;;  %v1902_v59 = vpack.i.b16 %v1893_v58, %v1874_v52  ;;  %v1904_v61 = vshrl.u32 %v1893_v58, 16 }
 0x41a   : > { %v2056_v62 = vsel %vm2035_vm8, %v1899_v56, 0 }
 0x41b   : > { %v2075_v63 = vsel %vm2035_vm8, %v1902_v59, 0  ;;  %v1905_v0 = vpack.i.b16 %v1904_v61, %v1903_v60 }
 0x41c   : > { %2084 = vmatpush.bf16.msrb.mxu3 %v2075_v63 }
 0x41d   : > { %2065 = vmatpush.bf16.msra.mxu2 %v2056_v62  ;;  %v2094_v1 = vsel %vm2035_vm8, %v1905_v0, 0 }
 0x41e   : > { %2103 = vmatpush.bf16.msra.mxu0 %v2094_v1 }
 0x454   : > { %v2010_v2 = vpop.xlane.xlu2 %2009 }
 0x455   : > { %5259 = vrcp.f32 %v2010_v2 }
 0x45b   : > { %v5260_v3 = vpop.eup %5259 }
 0x45c   : > { %v2024_v5 = vmul.f32 %v5260_v3, %v6307_v43  ;;  %v2019_v6 = vpop.xlane.xlu2 %2018  ;;  %v2013_v7 = vpop.xlane.xlu1 %2012 }
 0x45d   : > { %5261 = vrcp.f32 %v2019_v6 }
 0x45e   : > { %v2028_v8 = vpack.c.bf16 %v2024_v5, %v2024_v5  ;;  %5263 = vrcp.f32 %v2013_v7 }
 0x460   : > { %4515 = vmatmul.msk.bf16.vlgmr.msrb.gmra.mxu2 %vm1983_vm7, %v2028_v8 }
 0x463   : > { %v5262_v9 = vpop.eup %5261 }
 0x464   : > { %v2027_v10 = vmul.f32 %v5262_v9, %v6311_v46  ;;  %v5264_v13 = vpop.eup %5263 }
 0x465   : > { %v2025_v14 = vmul.f32 %v5264_v13, %v6313_v47 }
 0x466   : > { %v2031_v12 = vpack.c.bf16 %v2027_v10, %v2027_v10 }
 0x467   : > { %v2029_v16 = vpack.c.bf16 %v2025_v14, %v2025_v14 }
 0x468   : > { %4518 = vmatmul.msk.bf16.vlgmr.msra.gmra.mxu0 %vm1983_vm7, %v2031_v12 }
 0x46c   : > { %v2016_v15 = vpop.xlane.xlu0 %2015 }
 0x46d   : > { %5265 = vrcp.f32 %v2016_v15 }
 0x470   : > { %4516 = vmatmul.msk.bf16.vlgmr.msra.gmra.mxu2 %vm1983_vm7, %v2029_v16 }
 0x473   : > { %v5266_v43 = vpop.eup %5265 }
 0x474   : > { %v2026_v17 = vmul.f32 %v5266_v43, %v6319_v54 }
 0x476   : > { %v2030_v19 = vpack.c.bf16 %v2026_v17, %v2026_v17 }
 0x478   : > { %4517 = vmatmul.msk.bf16.vlgmr.msrb.gmra.mxu3 %vm1983_vm7, %v2030_v19 }
 0x4e3   : > { %v2048_v20 = vpop.f32.mrf.mxu2 }
 0x4e4   : > { %v2109_v25 = vpack.c.bf16 %v2048_v20, %v2048_v20 }
 0x4e5   : > { %v2105_v21 = vpop.f32.mrf.mxu0 }
 0x4e6   : > { %v2116_v26 = vshrl.u32 %v2109_v25, 16  ;;  %v2112_v28 = vpack.c.bf16 %v2105_v21, %v2105_v21 }
 0x4e8   : > { %v2123_v33 = vshrl.u32 %v2112_v28, 16 }
 0x4eb   : > { %v2050_v46 = vpop.f32.mrf.mxu2 }
 0x4ed   : > { %v2107_v22 = vpop.f32.mrf.mxu0 }
 0x4f3   : > { %v2067_v23 = vpop.f32.mrf.mxu2 }
 0x4f4   : > { %v2110_v24 = vpack.c.bf16 %v2067_v23, %v2067_v23 }
 0x4f6   : > { %v2117_v47 = vshrl.u32 %v2110_v24, 16  ;;  %v2115_v27 = vpack.i.b16 %v2110_v24, %v2109_v25 }
 0x4f8   : > { %v2118_v29 = vpack.i.b16 %v2117_v47, %v2116_v26  ;;  %v2129_v54 = vperm.slane %v2115_v27, %v6226_v4 }
 0x4fa   : > { %v2155_v34 = vperm.slane %v2118_v29, %v6226_v4  ;;  %v2137_v38 = vrot.slane %v2129_v54, 4 }
 0x4fb   : > { %v2069_v30 = vpop.f32.mrf.mxu2  ;;  %v2086_v31 = vpop.f32.mrf.mxu3 }
 0x4fc   : > { %v2111_v32 = vpack.c.bf16 %v2086_v31, %v2086_v31  ;;  %v2163_v41 = vrot.slane %v2155_v34, 4 }
 0x4fe   : > { %v2121_v35 = vpack.i.b16 %v2112_v28, %v2111_v32  ;;  %v2122_v36 = vshrl.u32 %v2111_v32, 16 }
 0x500   : > { %v2124_v39 = vpack.i.b16 %v2123_v33, %v2122_v36  ;;  %v2134_v40 = vperm.slane %v2121_v35, %v6226_v4  ;;  %v4987_v35 = vld [vmem:[%s6083_s24 + $0x30] sm:$0xff]  ;;  %v4986_v36 = vld [vmem:[%s6083_s24 + $0x28] sm:$0xff] }
 0x501   : > { %2301 = vmatpush.bf16.msrb.mxu1 %v4987_v35 }
 0x502   : > { %v2135_v42 = vrot.slane %v2134_v40, 4  ;;  %v2138_v57 = vsel %vm1570_vm4, %v2134_v40, %v2137_v38  ;;  %v2160_v44 = vperm.slane %v2124_v39, %v6226_v4  ;;  %v4984_v38 = vld [vmem:[%s6083_s24 + $0x18] sm:$0xff]  ;;  %v4983_v39 = vld [vmem:[%s6083_s24 + $0x10] sm:$0xff]  ;;  %v4982_v40 = vld [vmem:[%s6083_s24 + $0x8] sm:$0xff] }
 0x503   : > { %v2146_v45 = vperm.slane %v2138_v57, %v6230_v18  ;;  %v2088_v48 = vpop.f32.mrf.mxu3 }
 0x504   : > { %v2136_v49 = vsel %vm1570_vm4, %v2135_v42, %v2129_v54  ;;  %v2161_v50 = vrot.slane %v2160_v44, 4  ;;  %v2164_v51 = vsel %vm1570_vm4, %v2160_v44, %v2163_v41  ;;  %v4981_v41 = vld [vmem:[%s6083_s24] sm:$0xff]  ;;  %s6990_s24 = sld [smem:[#allocation25_spill]] }
 0x505   : > { %v2142_v52 = vperm.slane %v2136_v49, %v6230_v18  ;;  %v2149_v53 = vrot.slane %v2146_v45, 4  ;;  %v2172_v55 = vperm.slane %v2164_v51, %v6230_v18  ;;  %2302 = vmatpush.bf16.msrb.mxu1 %v4986_v36  ;;  %v5240_v51 = vld [vmem:[%s6977_s4] ss:$0 sm:$0xff]  ;;  %v5011_v36 = vld [vmem:[%s6979_s2 + $0x30] sm:$0xff] }
 0x506   : > { %v2162_v56 = vsel %vm1570_vm4, %v2161_v50, %v2155_v34  ;;  %v5004_v50 = vld [vmem:[%s6974_s20 + $0x38] sm:$0xff] }
 0x507   : > { %v2147_v58 = vrot.slane %v2142_v52, 4  ;;  %v2150_v59 = vsel %vm1570_vm4, 0, %v2149_v53  ;;  %v2168_v60 = vperm.slane %v2162_v56, %v6230_v18  ;;  %v2175_v61 = vrot.slane %v2172_v55, 4  ;;  %2519 = vmatpush.bf16.msra.mxu3 %v5004_v50  ;;  %v5287_v55 = vld [vmem:[%s6175_s14] sm:$0xff] }
 0x508   : > { %v2182_v62 = vrot.slane %v2150_v59, 4  ;;  %v2177_v2 = vsel %vm1570_vm4, %v2149_v53, %v2142_v52  ;;  %v5003_v59 = vld [vmem:[%s6974_s20 + $0x30] sm:$0xff] }
 0x509   : > { %v2148_v63 = vsel %vm1570_vm4, 0, %v2147_v58  ;;  %v2173_v0 = vrot.slane %v2168_v60, 4  ;;  %v2176_v1 = vsel %vm1570_vm4, 0, %v2175_v61  ;;  %v2196_v8 = vsel %vm1570_vm4, %v2175_v61, %v2168_v60  ;;  %2303 = vmatpush.bf16.msrb.mxu1 %v4985_v37  ;;  %v5002_v60 = vld [vmem:[%s6974_s20 + $0x28] sm:$0xff]  ;;  %v5001_v61 = vld [vmem:[%s6974_s20 + $0x20] sm:$0xff] }
 0x50a   : > { %v2183_v3 = vsel %vm1570_vm4, %v2182_v62, %v2148_v63  ;;  %v2201_v5 = vrot.slane %v2176_v1, 4  ;;  %v2181_v10 = vperm.slane %v2177_v2, %v6226_v4  ;;  %v2200_v15 = vperm.slane %v2196_v8, %v6226_v4  ;;  %v4996_v62 = vld [vmem:[%s6975_s21 + $0x38] sm:$0xff]  ;;  %v4998_v1 = vld [vmem:[%s6974_s20 + $0x8] sm:$0xff]  ;;  %v4997_v2 = vld [vmem:[%s6974_s20] sm:$0xff]  ;;  %s6993_s22 = sand.u32 1, %s6990_s24  }
 0x50b   : > { %v2174_v6 = vsel %vm1570_vm4, 0, %v2173_v0  ;;  %v2187_v7 = vperm.slane %v2183_v3, %v6226_v4  ;;  %2520 = vmatpush.bf16.msra.mxu3 %v5003_v59  ;;  %v5000_v63 = vld [vmem:[%s6974_s20 + $0x18] sm:$0xff]  ;;  %2458 = vmatpush.bf16.msrb.mxu2 %v4996_v62  ;;  %v4999_v0 = vld [vmem:[%s6974_s20 + $0x10] sm:$0xff]  ;;  %v1245_v3 = vld [vmem:[%s6978_s15] sm:$0xff]  ;;  %s6991_s15 = sld [smem:[#allocation68_spill]] }
 0x50c   : > { %v2202_v9 = vsel %vm1570_vm4, %v2201_v5, %v2174_v6  ;;  %v6428_v5 = vpack.c.bf16 %v1245_v3, %v1245_v3  ;;  %v5010_v37 = vld [vmem:[%s6979_s2 + $0x28] sm:$0xff] }
 0x50d   : > { %v2188_v12 = vrot.slane %v2187_v7, 4  ;;  %v2206_v13 = vperm.slane %v2202_v9, %v6226_v4  ;;  %2304 = vmatpush.bf16.msrb.mxu1 %v4984_v38 }
 0x50f   : > { %v2189_v14 = vsel %vm1570_vm4, %v2188_v12, %v2181_v10  ;;  %v2207_v16 = vrot.slane %v2206_v13, 4  ;;  %2521 = vmatpush.bf16.msra.mxu3 %v5002_v60  ;;  %v4995_v10 = vld [vmem:[%s6975_s21 + $0x30] sm:$0xff]  ;;  %v4994_v12 = vld [vmem:[%s6975_s21 + $0x28] sm:$0xff]  ;;  %v4993_v13 = vld [vmem:[%s6975_s21 + $0x20] sm:$0xff] }
 0x510   : > { %v2193_v43 = vperm.slane %v2189_v14, %v6230_v18  ;;  %2459 = vmatpush.bf16.msrb.mxu2 %v4995_v10  ;;  %v4992_v14 = vld [vmem:[%s6975_s21 + $0x18] sm:$0xff] }
 0x511   : > { %v2208_v17 = vsel %vm1570_vm4, %v2207_v16, %v2200_v15  ;;  %2305 = vmatpush.bf16.msrb.mxu1 %v4983_v39  ;;  %v4991_v15 = vld [vmem:[%s6975_s21 + $0x10] sm:$0xff]  ;;  %v4990_v16 = vld [vmem:[%s6975_s21 + $0x8] sm:$0xff] }
 0x512   : > { %v2212_v19 = vperm.slane %v2208_v17, %v6230_v18  ;;  %v2194_v20 = vrot.slane %v2193_v43, 4  ;;  %v2218_v21 = vshrl.u32 %v2193_v43, 16 }
 0x513   : > { %2522 = vmatpush.bf16.msra.mxu3 %v5001_v61 }
 0x514   : > { %v2219_v46 = vshrl.u32 %v2212_v19, 16  ;;  %v2195_v22 = vsel %vm1570_vm4, 0, %v2194_v20  ;;  %v2213_v23 = vrot.slane %v2212_v19, 4  ;;  %v2217_v24 = vpack.i.b16 %v2212_v19, %v2193_v43  ;;  %2460 = vmatpush.bf16.msrb.mxu2 %v4994_v12  ;;  %v4989_v43 = vld [vmem:[%s6975_s21] sm:$0xff] }
 0x515   : > { %v2224_v27 = vshrl.u32 %v2195_v22, 16  ;;  %2306 = vmatpush.bf16.msrb.mxu1 %v4982_v40 }
 0x516   : > { %v2220_v25 = vpack.i.b16 %v2219_v46, %v2218_v21  ;;  %v2214_v47 = vsel %vm1570_vm4, 0, %v2213_v23 }
 0x517   : > { %v2223_v26 = vpack.i.b16 %v2214_v47, %v2195_v22  ;;  %v2225_v28 = vshrl.u32 %v2214_v47, 16  ;;  %2523 = vmatpush.bf16.msra.mxu3 %v5000_v63 }
 0x518   : > { %v2227_v29 = vunpack.c.l.b16 %v2220_v25  ;;  %2461 = vmatpush.bf16.msrb.mxu2 %v4993_v13 }
 0x519   : > { %v2231_v30 = vunpack.c.l.b16 %v2223_v26  ;;  %v2226_v31 = vpack.i.b16 %v2225_v28, %v2224_v27  ;;  %2307 = vmatpush.bf16.msrb.mxu1 %v4981_v41  ;;  %v5241_v28 = vld [vmem:[%s6981_s13] ss:$0 sm:$0xff] }
 0x51a   : > { %v2228_v54 = vpack.c.b16 %v2227_v29, %v2227_v29 }
 0x51b   : > { %v2232_v32 = vpack.c.b16 %v2231_v30, %v2231_v30  ;;  %v2235_v33 = vunpack.c.l.b16 %v2226_v31  ;;  %2524 = vmatpush.bf16.msra.mxu3 %v4999_v0  ;;  %v5242_v31 = vld [vmem:[%s1220_s7] ss:$0 sm:$0xff]  ;;  %s6983_s7 = sld [smem:[#allocation43_spill]] }
 0x51c   : > { %2229 = vrot.lane.b32.xlu1 %v2228_v54, %s5703_s17  ;;  %2462 = vmatpush.bf16.msrb.mxu2 %v4992_v14 }
 0x51d   : > { %2233 = vrot.lane.b32.xlu2 %v2232_v32, %s5705_s8  ;;  %v2236_v34 = vpack.c.b16 %v2235_v33, %v2235_v33 }
 0x51f   : > { %2237 = vrot.lane.b32.xlu0 %v2236_v34, %s5704_s19  ;;  %2525 = vmatpush.bf16.msra.mxu3 %v4998_v1  ;;  %v5012_v34 = vld [vmem:[%s6979_s2 + $0x38] sm:$0xff] }
 0x520   : > { %2463 = vmatpush.bf16.msrb.mxu2 %v4991_v15  ;;  %2580 = vmatpush.bf16.msrb.mxu0 %v5012_v34 }
 0x523   : > { %2526 = vmatpush.bf16.msra.mxu3 %v4997_v2 }
 0x524   : > { %2464 = vmatpush.bf16.msrb.mxu2 %v4990_v16  ;;  %2581 = vmatpush.bf16.msrb.mxu0 %v5011_v36  ;;  %v5009_v16 = vld [vmem:[%s6979_s2 + $0x20] sm:$0xff]  ;;  %v5006_v36 = vld [vmem:[%s6979_s2 + $0x8] sm:$0xff] }
 0x526   : > { %2527 = vmatmul.bf16.vlgmr.msra.gmra.mxu3 %v6428_v5 }
 0x528   : > { %2465 = vmatpush.bf16.msrb.mxu2 %v4989_v43  ;;  %2582 = vmatpush.bf16.msrb.mxu0 %v5010_v37 }
 0x52c   : > { %2583 = vmatpush.bf16.msrb.mxu0 %v5009_v16 }
 0x577   : > { %v2234_v57 = vpop.permute.xlu2 %2233 }
 0x58e   : > { %v2230_v42 = vpop.permute.xlu1 %2229 }
 0x58f   : > { %v2241_v44 = vsel %vm1906_vm5, %v2217_v24, %v2230_v42 }
 0x590   : > { %v2244_v45 = vsel %vm2242_vm9, %v2241_v44, %v2234_v57 }
 0x591   : > { %v2238_v48 = vpop.permute.xlu0 %2237 }
 0x592   : > { %v2247_v49 = vsel %vm2245_vm10, %v2244_v45, %v2238_v48 }
 0x593   : > { %2308 = vmatmul.bf16.vlgmr.msrb.gmra.mxu1 %v2247_v49 }
 0x5a9   : > { %v2528_v21 = vpop.f32.mrf.mxu3 }
 0x5aa   : > { %v2715_v46 = vpack.c.bf16 %v2528_v21, %v2528_v21 }
 0x5ac   : > { %2717 = vrot.lane.b32.xlu2 %v2715_v46, %s5704_s19  ;;  %v2726_v38 = vshrl.u32 %v2715_v46, 16 }
 0x5b1   : > { %v2530_v25 = vpop.f32.mrf.mxu3 }
 0x5b4   : > { %2719 = vrot.lane.b32.xlu2 %v2715_v46, %s5705_s8 }
 0x5bc   : > { %2721 = vrot.lane.b32.xlu2 %v2715_v46, %s5703_s17 }
 0x606   : > { %v2718_v35 = vpop.permute.xlu2 %2717 }
 0x607   : > { %v2727_v39 = vshrl.u32 %v2718_v35, 16  ;;  %v2725_v41 = vpack.i.b16 %v2718_v35, %v2715_v46 }
 0x609   : > { %v2728_v42 = vpack.i.b16 %v2727_v39, %v2726_v38  ;;  %v2739_v57 = vperm.slane %v2725_v41, %v6226_v4 }
 0x60b   : > { %v2765_v44 = vperm.slane %v2728_v42, %v6226_v4  ;;  %v2747_v49 = vrot.slane %v2739_v57, 4  ;;  %v5005_v42 = vld [vmem:[%s6979_s2] sm:$0xff] }
 0x60e   : > { %v2720_v40 = vpop.permute.xlu2 %2719 }
 0x60f   : > { %v2732_v45 = vshrl.u32 %v2720_v40, 16 }
 0x610   : > { %v2309_v52 = vpop.f32.mrf.mxu1 }
 0x611   : > { %v2310_v53 = vadd.f32 %v5240_v51, %v2309_v52  ;;  %v2773_v52 = vrot.slane %v2765_v44, 4 }
 0x613   : > { %v6416_v56 = vadd.f32 %v5287_v55, %v2310_v53 }
 0x615   : > { %2316 = vadd.xlane.f32.xlu1 %v6416_v56 }
 0x616   : > { %v2722_v48 = vpop.permute.xlu2 %2721 }
 0x617   : > { %v2731_v50 = vpack.i.b16 %v2722_v48, %v2720_v40  ;;  %v2733_v51 = vshrl.u32 %v2722_v48, 16 }
 0x618   : > { %v2311_v58 = vpop.f32.mrf.mxu1 }
 0x619   : > { %v2734_v53 = vpack.i.b16 %v2733_v51, %v2732_v45  ;;  %v2744_v55 = vperm.slane %v2731_v50, %v6226_v4 }
 0x61b   : > { %v2745_v58 = vrot.slane %v2744_v55, 4  ;;  %v2748_v59 = vsel %vm1570_vm4, %v2744_v55, %v2747_v49  ;;  %v2770_v60 = vperm.slane %v2734_v53, %v6226_v4 }
 0x61c   : > { %v2756_v61 = vperm.slane %v2748_v59, %v6230_v18 }
 0x61d   : > { %v2746_v62 = vsel %vm1570_vm4, %v2745_v58, %v2739_v57  ;;  %v2771_v63 = vrot.slane %v2770_v60, 4  ;;  %v2774_v0 = vsel %vm1570_vm4, %v2770_v60, %v2773_v52 }
 0x61e   : > { %v2752_v1 = vperm.slane %v2746_v62, %v6230_v18  ;;  %v2759_v2 = vrot.slane %v2756_v61, 4  ;;  %v2782_v3 = vperm.slane %v2774_v0, %v6230_v18 }
 0x620   : > { %v2785_v10 = vrot.slane %v2782_v3, 4  ;;  %v2787_v43 = vsel %vm1570_vm4, %v2759_v2, %v2752_v1 }
 0x622   : > { %v2786_v15 = vsel %vm1570_vm4, 0, %v2785_v10 }
 0x688   : > { %v2317_v6 = vpop.xlane.xlu1 %2316 }
 0x689   : > { %v2318_v7 = vmul.f32 %v2317_v6, %v6183_v11  ;;  %v2772_v6 = vsel %vm1570_vm4, %v2771_v63, %v2765_v44 }
 0x68b   : > { %v2319_v8 = vsub.f32 %v6416_v56, %v2318_v7  ;;  %v2757_v7 = vrot.slane %v2752_v1, 4 }
 0x68d   : > { %v2320_v9 = vmul.f32 %v2319_v8, %v2319_v8  ;;  %v2758_v13 = vsel %vm1570_vm4, 0, %v2757_v7 }
 0x68f   : > { %2321 = vadd.xlane.f32.xlu0 %v2320_v9  ;;  %v2778_v9 = vperm.slane %v2772_v6, %v6230_v18 }
 0x691   : > { %v2783_v14 = vrot.slane %v2778_v9, 4  ;;  %v2806_v21 = vsel %vm1570_vm4, %v2785_v10, %v2778_v9 }
 0x702   : > { %v2322_v17 = vpop.xlane.xlu0 %2321 }
 0x703   : > { %v2323_v19 = vmul.f32 %v2322_v17, %v6183_v11 }
 0x705   : > { %v2324_v20 = vadd.f32 1e-05, %v2323_v19  ;;  %v2811_v19 = vrot.slane %v2786_v15, 4 }
 0x707   : > { %5267 = vrsqrt.f32 %v2324_v20  ;;  %vm2331_vm12 = vweird.f32 %v2324_v20 }
 0x70d   : > { %v5268_v22 = vpop.eup %5267 }
 0x70e   : > { %v2326_v23 = vmul.f32 %v5268_v22, %v2324_v20  ;;  %vm2332_vm11 = vweird.f32 %v5268_v22  ;;  %v2784_v20 = vsel %vm1570_vm4, 0, %v2783_v14 }
 0x70f   : > { %vm2333_vm13 = vmor %vm2331_vm12, %vm2332_vm11  ;;  %v2812_v46 = vsel %vm1570_vm4, %v2811_v19, %v2784_v20 }
 0x710   : > { %v2327_v24 = vmul.f32 %v5268_v22, %v2326_v23  ;;  %v5008_v23 = vld [vmem:[%s6979_s2 + $0x18] sm:$0xff]  ;;  %v2816_v25 = vperm.slane %v2812_v46, %v6226_v4 }
 0x711   : > { %2584 = vmatpush.bf16.msrb.mxu0 %v5008_v23 }
 0x712   : > { %v2328_v47 = vmul.f32 0.5, %v2327_v24 }
 0x714   : > { %v2329_v26 = vsub.f32 1.5, %v2328_v47 }
 0x716   : > { %v2330_v27 = vmul.f32 %v5268_v22, %v2329_v26  ;;  %v2810_v26 = vperm.slane %v2806_v21, %v6226_v4 }
 0x718   : > { %v2334_v29 = vsel %vm2333_vm13, %v5268_v22, %v2330_v27  ;;  %v2791_v22 = vperm.slane %v2787_v43, %v6226_v4  ;;  %v2817_v27 = vrot.slane %v2816_v25, 4 }
 0x719   : > { %v2335_v30 = vmul.f32 %v2334_v29, %v2319_v8  ;;  %v2760_v8 = vsel %vm1570_vm4, 0, %v2759_v2 }
 0x71a   : > { %v2792_v12 = vrot.slane %v2760_v8, 4 }
 0x71b   : > { %v2339_v54 = vmul.f32 %v5241_v28, %v2335_v30  ;;  %v5007_v28 = vld [vmem:[%s6979_s2 + $0x10] sm:$0xff]  ;;  %v2818_v30 = vsel %vm1570_vm4, %v2817_v27, %v2810_v26 }
 0x71c   : > { %v2793_v17 = vsel %vm1570_vm4, %v2792_v12, %v2758_v13  ;;  %2585 = vmatpush.bf16.msrb.mxu0 %v5007_v28 }
 0x71d   : > { %v2343_v32 = vadd.f32 %v5242_v31, %v2339_v54  ;;  %v2797_v24 = vperm.slane %v2793_v17, %v6226_v4  ;;  %v2822_v54 = vperm.slane %v2818_v30, %v6230_v18 }
 0x71f   : > { %v2344_v33 = vpack.c.bf16 %v2343_v32, %v2343_v32  ;;  %v2798_v47 = vrot.slane %v2797_v24, 4  ;;  %v2829_v34 = vshrl.u32 %v2822_v54, 16  ;;  %v2823_v37 = vrot.slane %v2822_v54, 4 }
 0x720   : > { %2586 = vmatpush.bf16.msrb.mxu0 %v5006_v36 }
 0x721   : > { %2466 = vmatmul.bf16.vlgmr.msrb.gmra.mxu2 %v2344_v33  ;;  %v2799_v29 = vsel %vm1570_vm4, %v2798_v47, %v2791_v22  ;;  %v2824_v41 = vsel %vm1570_vm4, 0, %v2823_v37 }
 0x722   : > { %v2803_v31 = vperm.slane %v2799_v29, %v6230_v18  ;;  %v2835_v48 = vshrl.u32 %v2824_v41, 16 }
 0x724   : > { %v2827_v32 = vpack.i.b16 %v2822_v54, %v2803_v31  ;;  %v2828_v33 = vshrl.u32 %v2803_v31, 16  ;;  %v2804_v35 = vrot.slane %v2803_v31, 4  ;;  %2587 = vmatpush.bf16.msrb.mxu0 %v5005_v42 }
 0x726   : > { %v2963_v38 = vsel %vm1906_vm5, %v2827_v32, 0  ;;  %v2830_v39 = vpack.i.b16 %v2829_v34, %v2828_v33  ;;  %v2805_v40 = vsel %vm1570_vm4, 0, %v2804_v35 }
 0x727   : > { %2972 = vmatpush.bf16.xpose.msra.mxu1 %v2963_v38  ;;  %v2834_v57 = vshrl.u32 %v2805_v40, 16  ;;  %v2833_v45 = vpack.i.b16 %v2824_v41, %v2805_v40  ;;  %2588 = vmatmul.bf16.vlgmr.msrb.gmra.mxu0 %v6428_v5 }
 0x728   : > { %v2982_v44 = vsel %vm1906_vm5, %v2830_v39, 0 }
 0x729   : > { %2991 = vmatpush.bf16.xpose.msra.mxu2 %v2982_v44  ;;  %v3001_v49 = vsel %vm1906_vm5, %v2833_v45, 0  ;;  %v2836_v50 = vpack.i.b16 %v2835_v48, %v2834_v57 }
 0x72a   : > { %3010 = vmatpush.bf16.xpose.msrb.mxu3 %v3001_v49 }
 0x72b   : > { %v3020_v51 = vsel %vm1906_vm5, %v2836_v50, 0 }
 0x72c   : > { %3029 = vmatpush.bf16.xpose.msra.mxu0 %v3020_v51 }
 0x7a4   : > { %v2467_v52 = vpop.f32.mrf.mxu2  ;;  %v2589_v0 = vpop.f32.mrf.mxu0 }
 0x7a5   : > { %v2593_v53 = vpack.c.bf16 %v2467_v52, %v2467_v52  ;;  %v6501_v2 = vpack.c.bf16 %v2589_v0, %v2589_v0 }
 0x7a7   : > { %2599 = vrot.lane.b32.xlu1 %v2593_v53, %s5703_s17  ;;  %2595 = vrot.lane.b32.xlu2 %v2593_v53, %s5704_s19  ;;  %v2604_v60 = vshrl.u32 %v2593_v53, 16 }
 0x7ac   : > { %v2469_v55 = vpop.f32.mrf.mxu2  ;;  %v2591_v17 = vpop.f32.mrf.mxu0 }
 0x7af   : > { %2597 = vrot.lane.b32.xlu2 %v2593_v53, %s5705_s8  ;;  %2839 = vrot.lane.b32.xlu1 %v6501_v2, %s5704_s19 }
 0x7b7   : > { %2843 = vrot.lane.b32.xlu1 %v6501_v2, %s5703_s17 }
 0x801   : > { %v2596_v58 = vpop.permute.xlu2 %2595 }
 0x802   : > { %v2605_v59 = vshrl.u32 %v2596_v58, 16  ;;  %v2603_v61 = vpack.i.b16 %v2596_v58, %v2593_v53 }
 0x804   : > { %v2606_v62 = vpack.i.b16 %v2605_v59, %v2604_v60  ;;  %v2617_v1 = vperm.slane %v2603_v61, %v6226_v4 }
 0x806   : > { %v2643_v3 = vperm.slane %v2606_v62, %v6226_v4  ;;  %v2625_v9 = vrot.slane %v2617_v1, 4 }
 0x808   : > { %v2651_v13 = vrot.slane %v2643_v3, 4 }
 0x809   : > { %v2598_v63 = vpop.permute.xlu2 %2597 }
 0x80a   : > { %v2610_v6 = vshrl.u32 %v2598_v63, 16 }
 0x819   : > { %v2600_v5 = vpop.permute.xlu1 %2599 }
 0x81a   : > { %v2609_v7 = vpack.i.b16 %v2600_v5, %v2598_v63  ;;  %v2611_v8 = vshrl.u32 %v2600_v5, 16 }
 0x81c   : > { %v2612_v10 = vpack.i.b16 %v2611_v8, %v2610_v6  ;;  %v2622_v12 = vperm.slane %v2609_v7, %v6226_v4 }
 0x81e   : > { %v2623_v14 = vrot.slane %v2622_v12, 4  ;;  %v2626_v15 = vsel %vm1570_vm4, %v2622_v12, %v2625_v9  ;;  %v2648_v16 = vperm.slane %v2612_v10, %v6226_v4 }
 0x81f   : > { %v2634_v43 = vperm.slane %v2626_v15, %v6230_v18 }
 0x820   : > { %v2624_v19 = vsel %vm1570_vm4, %v2623_v14, %v2617_v1  ;;  %v2649_v20 = vrot.slane %v2648_v16, 4  ;;  %v2652_v21 = vsel %vm1570_vm4, %v2648_v16, %v2651_v13 }
 0x821   : > { %v2630_v46 = vperm.slane %v2624_v19, %v6230_v18  ;;  %v2637_v22 = vrot.slane %v2634_v43, 4  ;;  %v2660_v23 = vperm.slane %v2652_v21, %v6230_v18 }
 0x822   : > { %v2650_v24 = vsel %vm1570_vm4, %v2649_v20, %v2643_v3 }
 0x823   : > { %v2635_v25 = vrot.slane %v2630_v46, 4  ;;  %v2638_v47 = vsel %vm1570_vm4, 0, %v2637_v22  ;;  %v2656_v26 = vperm.slane %v2650_v24, %v6230_v18  ;;  %v2663_v27 = vrot.slane %v2660_v23, 4 }
 0x824   : > { %v2670_v28 = vrot.slane %v2638_v47, 4  ;;  %v2665_v54 = vsel %vm1570_vm4, %v2637_v22, %v2630_v46 }
 0x825   : > { %v2636_v29 = vsel %vm1570_vm4, 0, %v2635_v25  ;;  %v2661_v30 = vrot.slane %v2656_v26, 4  ;;  %v2664_v31 = vsel %vm1570_vm4, 0, %v2663_v27  ;;  %v2684_v36 = vsel %vm1570_vm4, %v2663_v27, %v2656_v26 }
 0x826   : > { %v2671_v32 = vsel %vm1570_vm4, %v2670_v28, %v2636_v29  ;;  %v2689_v33 = vrot.slane %v2664_v31, 4  ;;  %v2669_v38 = vperm.slane %v2665_v54, %v6226_v4  ;;  %v2688_v41 = vperm.slane %v2684_v36, %v6226_v4  ;;  %v2840_v31 = vpop.permute.xlu1 %2839 }
 0x827   : > { %v2662_v34 = vsel %vm1570_vm4, 0, %v2661_v30  ;;  %v2675_v35 = vperm.slane %v2671_v32, %v6226_v4  ;;  %v2848_v32 = vshrl.u32 %v6501_v2, 16 }
 0x828   : > { %v2690_v37 = vsel %vm1570_vm4, %v2689_v33, %v2662_v34  ;;  %v2849_v33 = vshrl.u32 %v2840_v31, 16 }
 0x829   : > { %v2676_v39 = vrot.slane %v2675_v35, 4  ;;  %v2694_v40 = vperm.slane %v2690_v37, %v6226_v4  ;;  %v2847_v35 = vpack.i.b16 %v2840_v31, %v6501_v2 }
 0x82a   : > { %v2850_v36 = vpack.i.b16 %v2849_v33, %v2848_v32 }
 0x82b   : > { %v2695_v42 = vrot.slane %v2694_v40, 4  ;;  %v2677_v57 = vsel %vm1570_vm4, %v2676_v39, %v2669_v38  ;;  %v2861_v38 = vperm.slane %v2847_v35, %v6226_v4 }
 0x82c   : > { %v2681_v44 = vperm.slane %v2677_v57, %v6230_v18  ;;  %v2887_v40 = vperm.slane %v2850_v36, %v6226_v4 }
 0x82d   : > { %v2696_v45 = vsel %vm1570_vm4, %v2695_v42, %v2688_v41 }
 0x82e   : > { %v2700_v48 = vperm.slane %v2696_v45, %v6230_v18  ;;  %v2682_v49 = vrot.slane %v2681_v44, 4  ;;  %v2706_v50 = vshrl.u32 %v2681_v44, 16  ;;  %v2844_v37 = vpop.permute.xlu1 %2843 }
 0x82f   : > { %v2855_v41 = vshrl.u32 %v2844_v37, 16 }
 0x830   : > { %v2705_v51 = vpack.i.b16 %v2700_v48, %v2681_v44  ;;  %v2707_v52 = vshrl.u32 %v2700_v48, 16  ;;  %v2683_v53 = vsel %vm1570_vm4, 0, %v2682_v49  ;;  %v2701_v55 = vrot.slane %v2700_v48, 4 }
 0x831   : > { %v2712_v61 = vshrl.u32 %v2683_v53, 16  ;;  %v2869_v44 = vrot.slane %v2861_v38, 4  ;;  %v2895_v49 = vrot.slane %v2887_v40, 4 }
 0x832   : > { %4647 = vmatmul.msk.bf16.vlgmr.msra.gmra.mxu1 %vm1906_vm5, %v2705_v51  ;;  %v2708_v58 = vpack.i.b16 %v2707_v52, %v2706_v50  ;;  %v2702_v59 = vsel %vm1570_vm4, 0, %v2701_v55 }
 0x833   : > { %v2711_v60 = vpack.i.b16 %v2702_v59, %v2683_v53  ;;  %v2713_v62 = vshrl.u32 %v2702_v59, 16 }
 0x834   : > { %4648 = vmatmul.msk.bf16.vlgmr.msra.gmra.mxu2 %vm1906_vm5, %v2708_v58 }
 0x835   : > { %4649 = vmatmul.msk.bf16.vlgmr.msrb.gmra.mxu3 %vm1906_vm5, %v2711_v60  ;;  %v2714_v63 = vpack.i.b16 %v2713_v62, %v2712_v61 }
 0x837   : > { %4650 = vmatmul.msk.bf16.vlgmr.msra.gmra.mxu0 %vm1906_vm5, %v2714_v63 }
 0x8af   : > { %v2974_v0 = vpop.f32.mrf.mxu1 }
 0x8b0   : > { %v3035_v13 = vsel %vm1983_vm7, %v2974_v0, -inf }
 0x8b4   : > { %v3031_v1 = vpop.f32.mrf.mxu0 }
 0x8b5   : > { %v3044_v14 = vsel %vm1983_vm7, %v3031_v1, -inf }
 0x8b7   : > { %v2976_v5 = vpop.f32.mrf.mxu1  ;;  %v2993_v3 = vpop.f32.mrf.mxu2 }
 0x8b8   : > { %v3012_v6 = vpop.f32.mrf.mxu3  ;;  %v3038_v7 = vsel %vm1983_vm7, %v2993_v3, -inf }
 0x8b9   : > { %3039 = vmax.xlane.f32.xlu0 %v3038_v7  ;;  %v3041_v8 = vsel %vm1983_vm7, %v3012_v6, -inf }
 0x8ba   : > { %3042 = vmax.xlane.f32.xlu2 %v3041_v8 }
 0x8bc   : > { %v3033_v9 = vpop.f32.mrf.mxu0 }
 0x8bf   : > { %v2995_v10 = vpop.f32.mrf.mxu2 }
 0x8c0   : > { %v3014_v12 = vpop.f32.mrf.mxu3 }
 0x8c1   : > { %3036 = vmax.xlane.f32.xlu0 %v3035_v13 }
 0x8c9   : > { %3045 = vmax.xlane.f32.xlu0 %v3044_v14 }
 0x8dd   : > { %2841 = vrot.lane.b32.xlu0 %v6501_v2, %s5705_s8 }
 0x92c   : > { %v3040_v15 = vpop.xlane.xlu0 %3039 }
 0x92d   : > { %v3048_v16 = vsub.f32 %v2993_v3, %v3040_v15  ;;  %v3043_v43 = vpop.xlane.xlu2 %3042 }
 0x92e   : > { %v3049_v17 = vsub.f32 %v3012_v6, %v3043_v43 }
 0x92f   : > { %v3053_v19 = vmul.f32 1.442695, %v3048_v16 }
 0x930   : > { %v3055_v20 = vmul.f32 1.442695, %v3049_v17 }
 0x931   : > { %5269 = vpow2.f32 %v3053_v19 }
 0x932   : > { %5271 = vpow2.f32 %v3055_v20 }
 0x934   : > { %v3037_v21 = vpop.xlane.xlu0 %3036 }
 0x935   : > { %v3047_v46 = vsub.f32 %v2974_v0, %v3037_v21 }
 0x937   : > { %v6546_v22 = vpop.eup %5269  ;;  %v3051_v23 = vmul.f32 1.442695, %v3047_v46 }
 0x938   : > { %v6548_v24 = vpop.eup %5271  ;;  %v3062_v25 = vsel %vm1983_vm7, %v6546_v22, 0.0 }
 0x939   : > { %5273 = vpow2.f32 %v3051_v23  ;;  %3063 = vadd.xlane.f32.xlu1 %v3062_v25  ;;  %v3065_v47 = vsel %vm1983_vm7, %v6548_v24, 0.0 }
 0x93a   : > { %3066 = vadd.xlane.f32.xlu2 %v3065_v47 }
 0x93c   : > { %v3046_v26 = vpop.xlane.xlu0 %3045 }
 0x93d   : > { %v3050_v27 = vsub.f32 %v3031_v1, %v3046_v26 }
 0x93f   : > { %v6554_v28 = vpop.eup %5273  ;;  %v3057_v29 = vmul.f32 1.442695, %v3050_v27 }
 0x940   : > { %v3059_v30 = vsel %vm1983_vm7, %v6554_v28, 0.0 }
 0x941   : > { %5275 = vpow2.f32 %v3057_v29  ;;  %3060 = vadd.xlane.f32.xlu0 %v3059_v30 }
 0x947   : > { %v6558_v54 = vpop.eup %5275 }
 0x948   : > { %v3068_v34 = vsel %vm1983_vm7, %v6558_v54, 0.0 }
 0x949   : > { %3069 = vadd.xlane.f32.xlu2 %v3068_v34 }
 0x94f   : > { %v2842_v39 = vpop.permute.xlu0 %2841 }
 0x950   : > { %v2853_v42 = vpack.i.b16 %v2844_v37, %v2842_v39  ;;  %v2854_v57 = vshrl.u32 %v2842_v39, 16 }
 0x952   : > { %v2856_v45 = vpack.i.b16 %v2855_v41, %v2854_v57  ;;  %v2866_v48 = vperm.slane %v2853_v42, %v6226_v4 }
 0x954   : > { %v2867_v50 = vrot.slane %v2866_v48, 4  ;;  %v2870_v51 = vsel %vm1570_vm4, %v2866_v48, %v2869_v44  ;;  %v2892_v2 = vperm.slane %v2856_v45, %v6226_v4 }
 0x955   : > { %v2878_v52 = vperm.slane %v2870_v51, %v6230_v18 }
 0x956   : > { %v2868_v53 = vsel %vm1570_vm4, %v2867_v50, %v2861_v38  ;;  %v2893_v55 = vrot.slane %v2892_v2, 4  ;;  %v2896_v58 = vsel %vm1570_vm4, %v2892_v2, %v2895_v49 }
 0x957   : > { %v2874_v59 = vperm.slane %v2868_v53, %v6230_v18  ;;  %v2881_v60 = vrot.slane %v2878_v52, 4  ;;  %v2904_v61 = vperm.slane %v2896_v58, %v6230_v18 }
 0x958   : > { %v2894_v62 = vsel %vm1570_vm4, %v2893_v55, %v2887_v40 }
 0x959   : > { %v2879_v63 = vrot.slane %v2874_v59, 4  ;;  %v2882_v0 = vsel %vm1570_vm4, 0, %v2881_v60  ;;  %v2900_v1 = vperm.slane %v2894_v62, %v6230_v18  ;;  %v2907_v5 = vrot.slane %v2904_v61, 4 }
 0x95a   : > { %v2914_v3 = vrot.slane %v2882_v0, 4  ;;  %v2909_v9 = vsel %vm1570_vm4, %v2881_v60, %v2874_v59 }
 0x95b   : > { %v2880_v6 = vsel %vm1570_vm4, 0, %v2879_v63  ;;  %v2905_v7 = vrot.slane %v2900_v1, 4  ;;  %v2908_v8 = vsel %vm1570_vm4, 0, %v2907_v5  ;;  %v2928_v15 = vsel %vm1570_vm4, %v2907_v5, %v2900_v1 }
 0x95c   : > { %v2915_v10 = vsel %vm1570_vm4, %v2914_v3, %v2880_v6  ;;  %v2933_v12 = vrot.slane %v2908_v8, 4  ;;  %v2913_v43 = vperm.slane %v2909_v9, %v6226_v4  ;;  %v2932_v21 = vperm.slane %v2928_v15, %v6226_v4 }
 0x95d   : > { %v2906_v13 = vsel %vm1570_vm4, 0, %v2905_v7  ;;  %v2919_v14 = vperm.slane %v2915_v10, %v6226_v4 }
 0x95e   : > { %v2934_v16 = vsel %vm1570_vm4, %v2933_v12, %v2906_v13 }
 0x95f   : > { %v2920_v17 = vrot.slane %v2919_v14, 4  ;;  %v2938_v19 = vperm.slane %v2934_v16, %v6226_v4 }
 0x961   : > { %v2921_v20 = vsel %vm1570_vm4, %v2920_v17, %v2913_v43  ;;  %v2939_v46 = vrot.slane %v2938_v19, 4 }
 0x962   : > { %v2925_v23 = vperm.slane %v2921_v20, %v6230_v18 }
 0x963   : > { %v2940_v25 = vsel %vm1570_vm4, %v2939_v46, %v2932_v21 }
 0x964   : > { %v2944_v47 = vperm.slane %v2940_v25, %v6230_v18  ;;  %v2926_v26 = vrot.slane %v2925_v23, 4  ;;  %v2950_v27 = vshrl.u32 %v2925_v23, 16 }
 0x966   : > { %v2949_v29 = vpack.i.b16 %v2944_v47, %v2925_v23  ;;  %v2951_v30 = vshrl.u32 %v2944_v47, 16  ;;  %v2927_v31 = vsel %vm1570_vm4, 0, %v2926_v26  ;;  %v2945_v32 = vrot.slane %v2944_v47, 4 }
 0x967   : > { %v2956_v37 = vshrl.u32 %v2927_v31, 16 }
 0x968   : > { %v3087_v33 = vsel %vm2035_vm8, %v2949_v29, 0  ;;  %v2952_v34 = vpack.i.b16 %v2951_v30, %v2950_v27  ;;  %v2946_v35 = vsel %vm1570_vm4, 0, %v2945_v32 }
 0x969   : > { %3096 = vmatpush.bf16.msrb.mxu1 %v3087_v33  ;;  %v2955_v36 = vpack.i.b16 %v2946_v35, %v2927_v31  ;;  %v2957_v38 = vshrl.u32 %v2946_v35, 16  ;;  %v5020_v31 = vld [vmem:[%s6983_s7 + $0x38] sm:$0xff] }
 0x96a   : > { %v3106_v39 = vsel %vm2035_vm8, %v2952_v34, 0 }
 0x96b   : > { %3115 = vmatpush.bf16.msrb.mxu2 %v3106_v39  ;;  %v3125_v40 = vsel %vm2035_vm8, %v2955_v36, 0  ;;  %v2958_v41 = vpack.i.b16 %v2957_v38, %v2956_v37 }
 0x96c   : > { %3134 = vmatpush.bf16.msra.mxu3 %v3125_v40 }
 0x96d   : > { %v3144_v42 = vsel %vm2035_vm8, %v2958_v41, 0  ;;  %3348 = vmatpush.bf16.msra.mxu1 %v5020_v31 }
 0x96e   : > { %3153 = vmatpush.bf16.msrb.mxu0 %v3144_v42 }
 0x9ac   : > { %v3064_v57 = vpop.xlane.xlu1 %3063 }
 0x9ad   : > { %5277 = vrcp.f32 %v3064_v57  ;;  %v3067_v44 = vpop.xlane.xlu2 %3066 }
 0x9ae   : > { %5279 = vrcp.f32 %v3067_v44 }
 0x9b3   : > { %v5278_v45 = vpop.eup %5277 }
 0x9b4   : > { %v5280_v48 = vpop.eup %5279  ;;  %v3076_v49 = vmul.f32 %v5278_v45, %v6546_v22  ;;  %v3061_v50 = vpop.xlane.xlu0 %3060 }
 0x9b5   : > { %v3077_v51 = vmul.f32 %v5280_v48, %v6548_v24  ;;  %5281 = vrcp.f32 %v3061_v50 }
 0x9b6   : > { %v3080_v2 = vpack.c.bf16 %v3076_v49, %v3076_v49 }
 0x9b7   : > { %v3081_v52 = vpack.c.bf16 %v3077_v51, %v3077_v51 }
 0x9b8   : > { %4652 = vmatmul.msk.bf16.vlgmr.msrb.gmra.mxu2 %vm1983_vm7, %v3080_v2 }
 0x9b9   : > { %4653 = vmatmul.msk.bf16.vlgmr.msra.gmra.mxu3 %vm1983_vm7, %v3081_v52 }
 0x9bb   : > { %v5282_v53 = vpop.eup %5281 }
 0x9bc   : > { %v3075_v55 = vmul.f32 %v5282_v53, %v6554_v28  ;;  %v3070_v58 = vpop.xlane.xlu2 %3069 }
 0x9bd   : > { %5283 = vrcp.f32 %v3070_v58 }
 0x9be   : > { %v3079_v59 = vpack.c.bf16 %v3075_v55, %v3075_v55 }
 0x9c0   : > { %4651 = vmatmul.msk.bf16.vlgmr.msrb.gmra.mxu1 %vm1983_vm7, %v3079_v59 }
 0x9c3   : > { %v5284_v60 = vpop.eup %5283 }
 0x9c4   : > { %v3078_v22 = vmul.f32 %v5284_v60, %v6558_v54 }
 0x9c6   : > { %v3082_v61 = vpack.c.bf16 %v3078_v22, %v3078_v22 }
 0x9c8   : > { %4654 = vmatmul.msk.bf16.vlgmr.msrb.gmra.mxu0 %vm1983_vm7, %v3082_v61 }
 0xa3b   : > { %v3117_v24 = vpop.f32.mrf.mxu2 }
 0xa3c   : > { %v3136_v62 = vpop.f32.mrf.mxu3  ;;  %v3160_v0 = vpack.c.bf16 %v3117_v24, %v3117_v24 }
 0xa3d   : > { %v3098_v63 = vpop.f32.mrf.mxu1  ;;  %v3161_v7 = vpack.c.bf16 %v3136_v62, %v3136_v62 }
 0xa3e   : > { %v3159_v1 = vpack.c.bf16 %v3098_v63, %v3098_v63  ;;  %v3167_v3 = vshrl.u32 %v3160_v0, 16 }
 0xa3f   : > { %v3172_v14 = vshrl.u32 %v3161_v7, 16 }
 0xa40   : > { %v3166_v5 = vshrl.u32 %v3159_v1, 16  ;;  %v3165_v6 = vpack.i.b16 %v3160_v0, %v3159_v1 }
 0xa42   : > { %v3168_v8 = vpack.i.b16 %v3167_v3, %v3166_v5  ;;  %v3179_v13 = vperm.slane %v3165_v6, %v6226_v4 }
 0xa43   : > { %v3119_v28 = vpop.f32.mrf.mxu2 }
 0xa44   : > { %v3138_v9 = vpop.f32.mrf.mxu3  ;;  %v3205_v15 = vperm.slane %v3168_v8, %v6226_v4  ;;  %v3187_v17 = vrot.slane %v3179_v13, 4 }
 0xa45   : > { %v3100_v10 = vpop.f32.mrf.mxu1  ;;  %v3155_v12 = vpop.f32.mrf.mxu0 }
 0xa46   : > { %v3162_v54 = vpack.c.bf16 %v3155_v12, %v3155_v12  ;;  %v3213_v21 = vrot.slane %v3205_v15, 4 }
 0xa48   : > { %v3171_v16 = vpack.i.b16 %v3162_v54, %v3161_v7  ;;  %v3173_v43 = vshrl.u32 %v3162_v54, 16 }
 0xa4a   : > { %v3174_v19 = vpack.i.b16 %v3173_v43, %v3172_v14  ;;  %v3184_v20 = vperm.slane %v3171_v16, %v6226_v4  ;;  %v5018_v16 = vld [vmem:[%s6983_s7 + $0x28] sm:$0xff]  ;;  %v5017_v43 = vld [vmem:[%s6983_s7 + $0x20] sm:$0xff] }
 0xa4c   : > { %v3185_v46 = vrot.slane %v3184_v20, 4  ;;  %v3188_v23 = vsel %vm1570_vm4, %v3184_v20, %v3187_v17  ;;  %v3210_v25 = vperm.slane %v3174_v19, %v6226_v4  ;;  %v5016_v17 = vld [vmem:[%s6983_s7 + $0x18] sm:$0xff]  ;;  %v5015_v19 = vld [vmem:[%s6983_s7 + $0x10] sm:$0xff]  ;;  %v5014_v20 = vld [vmem:[%s6983_s7 + $0x8] sm:$0xff] }
 0xa4d   : > { %v3196_v47 = vperm.slane %v3188_v23, %v6230_v18  ;;  %v3157_v26 = vpop.f32.mrf.mxu0 }
 0xa4e   : > { %v3186_v27 = vsel %vm1570_vm4, %v3185_v46, %v3179_v13  ;;  %v3211_v29 = vrot.slane %v3210_v25, 4  ;;  %v3214_v30 = vsel %vm1570_vm4, %v3210_v25, %v3213_v21  ;;  %v5013_v21 = vld [vmem:[%s6983_s7] sm:$0xff] }
 0xa4f   : > { %v3192_v32 = vperm.slane %v3186_v27, %v6230_v18  ;;  %v3199_v33 = vrot.slane %v3196_v47, 4  ;;  %v3222_v34 = vperm.slane %v3214_v30, %v6230_v18 }
 0xa50   : > { %v3212_v35 = vsel %vm1570_vm4, %v3211_v29, %v3205_v15  ;;  %v5019_v15 = vld [vmem:[%s6983_s7 + $0x30] sm:$0xff]  ;;  %v5243_v29 = vld [vmem:[%s1223_s5] ss:$0 sm:$0xff]  ;;  %s5578_s7 = scalar_lea.hbm %s6991_s15, 16 }
 0xa51   : > { %v3197_v36 = vrot.slane %v3192_v32, 4  ;;  %v3200_v37 = vsel %vm1570_vm4, 0, %v3199_v33  ;;  %v3218_v38 = vperm.slane %v3212_v35, %v6230_v18  ;;  %v3225_v39 = vrot.slane %v3222_v34, 4  ;;  %3349 = vmatpush.bf16.msra.mxu1 %v5019_v15  ;;  %v4801_v34 = vld [vmem:[%s6984_s11 + $0xe0] sm:$0xf] }
 0xa52   : > { %v3232_v40 = vrot.slane %v3200_v37, 4  ;;  %v3227_v44 = vsel %vm1570_vm4, %v3199_v33, %v3192_v32  ;;  %v5051_v35 = vld [vmem:[%s6984_s11 + $0xec] sm:$0xf0]  ;;  %v4761_v15 = vld [vmem:[%s6984_s11 + $0x88] sm:$0xf] }
 0xa53   : > { %v3198_v41 = vsel %vm1570_vm4, 0, %v3197_v36  ;;  %v3223_v42 = vrot.slane %v3218_v38, 4  ;;  %v3226_v57 = vsel %vm1570_vm4, 0, %v3225_v39  ;;  %v3246_v51 = vsel %vm1570_vm4, %v3225_v39, %v3218_v38  ;;  %v5049_v36 = vld [vmem:[%s6984_s11 + $0xe4] sm:$0xf] }
 0xa54   : > { %v3233_v45 = vsel %vm1570_vm4, %v3232_v40, %v3198_v41  ;;  %v3251_v48 = vrot.slane %v3226_v57, 4  ;;  %v3231_v52 = vperm.slane %v3227_v44, %v6226_v4  ;;  %v3250_v59 = vperm.slane %v3246_v51, %v6226_v4  ;;  %v4803_v38 = vld [vmem:[%s6984_s11 + $0xf0] sm:$0xf0]  ;;  %v4809_v39 = vld [vmem:[%s6984_s11 + $0xe8] sm:$0xf] }
 0xa55   : > { %v3224_v49 = vsel %vm1570_vm4, 0, %v3223_v42  ;;  %v3237_v50 = vperm.slane %v3233_v45, %v6226_v4  ;;  %3350 = vmatpush.bf16.msra.mxu1 %v5018_v16  ;;  %v4802_v37 = vor.u32 %v5051_v35, %v4801_v34  ;;  %v5052_v40 = vld [vmem:[%s6984_s11 + $0xf4] sm:$0xf0]  ;;  %v4806_v41 = vor.u32 %v5049_v36, %v4803_v38  ;;  %v5050_v57 = vld [vmem:[%s6984_s11 + $0xec] sm:$0xf] }
 0xa56   : > { %v3252_v2 = vsel %vm1570_vm4, %v3251_v48, %v3224_v49  ;;  %v4810_v42 = vor.u32 %v5052_v40, %v4809_v39  ;;  %v4811_v44 = vld [vmem:[%s6984_s11 + $0xf8] sm:$0xf0]  ;;  %v4785_v51 = vld [vmem:[%s6984_s11 + $0xc0] sm:$0xf]  ;;  %v5040_v16 = vld [vmem:[%s6984_s11 + $0x94] sm:$0xf0] }
 0xa57   : > { %v3238_v53 = vrot.slane %v3237_v50, 4  ;;  %v3256_v55 = vperm.slane %v3252_v2, %v6226_v4  ;;  %3595 = vmatpush.bf16.msra.mxu2 %v4802_v37  ;;  %3608 = vmatpush.bf16.msrb.mxu3 %v4806_v41  ;;  %v5047_v2 = vld [vmem:[%s6984_s11 + $0xcc] sm:$0xf0]  ;;  %v4747_v34 = vld [vmem:[%s6984_s11 + $0x78] sm:$0xf0] }
 0xa58   : > { %3621 = vmatpush.bf16.msra.mxu0 %v4810_v42  ;;  %v4721_v36 = vld [vmem:[%s6984_s11 + $0x40] sm:$0xf]  ;;  %v5031_v37 = vld [vmem:[%s6984_s11 + $0x4c] sm:$0xf0]  ;;  %v5029_v38 = vld [vmem:[%s6984_s11 + $0x44] sm:$0xf] }
 0xa59   : > { %v3239_v58 = vsel %vm1570_vm4, %v3238_v53, %v3231_v52  ;;  %v3257_v60 = vrot.slane %v3256_v55, 4  ;;  %3351 = vmatpush.bf16.msra.mxu1 %v5017_v43  ;;  %v5045_v52 = vld [vmem:[%s6984_s11 + $0xc4] sm:$0xf]  ;;  %v4786_v53 = vor.u32 %v5047_v2, %v4785_v51  ;;  %v4787_v55 = vld [vmem:[%s6984_s11 + $0xd0] sm:$0xf0]  ;;  %v4722_v39 = vor.u32 %v5031_v37, %v4721_v36 }
 0xa5a   : > { %v3243_v22 = vperm.slane %v3239_v58, %v6230_v18  ;;  %v4793_v58 = vld [vmem:[%s6984_s11 + $0xc8] sm:$0xf]  ;;  %v4723_v40 = vld [vmem:[%s6984_s11 + $0x50] sm:$0xf0]  ;;  %v5032_v42 = vld [vmem:[%s6984_s11 + $0x54] sm:$0xf0] }
 0xa5b   : > { %v3258_v61 = vsel %vm1570_vm4, %v3257_v60, %v3250_v59  ;;  %v5048_v59 = vld [vmem:[%s6984_s11 + $0xd4] sm:$0xf0]  ;;  %v4790_v60 = vor.u32 %v5045_v52, %v4787_v55  ;;  %3596 = vmatpush.bf16.msra.mxu2 %v4786_v53  ;;  %v4729_v41 = vld [vmem:[%s6984_s11 + $0x48] sm:$0xf]  ;;  %v5027_v51 = vld [vmem:[%s6984_s11 + $0x2c] sm:$0xf0] }
 0xa5c   : > { %v3262_v24 = vperm.slane %v3258_v61, %v6230_v18  ;;  %v3244_v62 = vrot.slane %v3243_v22, 4  ;;  %v3268_v63 = vshrl.u32 %v3243_v22, 16  ;;  %v5046_v61 = vld [vmem:[%s6984_s11 + $0xcc] sm:$0xf]  ;;  %v5025_v2 = vld [vmem:[%s6984_s11 + $0x24] sm:$0xf] }
 0xa5d   : > { %3352 = vmatpush.bf16.msra.mxu1 %v5016_v17  ;;  %3609 = vmatpush.bf16.msrb.mxu3 %v4790_v60  ;;  %v4762_v17 = vor.u32 %v5040_v16, %v4761_v15  ;;  %v4707_v53 = vld [vmem:[%s6984_s11 + $0x30] sm:$0xf0]  ;;  %v4713_v55 = vld [vmem:[%s6984_s11 + $0x28] sm:$0xf] }
 0xa5e   : > { %v3269_v0 = vshrl.u32 %v3262_v24, 16  ;;  %v3263_v1 = vrot.slane %v3262_v24, 4  ;;  %v3267_v5 = vpack.i.b16 %v3262_v24, %v3243_v22  ;;  %v3245_v3 = vsel %vm1570_vm4, 0, %v3244_v62  ;;  %v4795_v24 = vld [vmem:[%s6984_s11 + $0xd8] sm:$0xf0]  ;;  %v5075_v15 = vld [vmem:[%s6173_s12 + $0xb0] sm:$0xff] }
 0xa5f   : > { %v3274_v9 = vshrl.u32 %v3245_v3, 16  ;;  %v4794_v22 = vor.u32 %v5048_v59, %v4793_v58  ;;  %v4798_v62 = vor.u32 %v5046_v61, %v4795_v24  ;;  %v5028_v58 = vld [vmem:[%s6984_s11 + $0x34] sm:$0xf0]  ;;  %v4710_v59 = vor.u32 %v5025_v2, %v4707_v53  ;;  %v4715_v61 = vld [vmem:[%s6984_s11 + $0x38] sm:$0xf0]  ;;  %v5083_v16 = vld [vmem:[%s6173_s12 + $0xf0] sm:$0xff] }
 0xa60   : > { %v3270_v6 = vpack.i.b16 %v3269_v0, %v3268_v63  ;;  %v3264_v28 = vsel %vm1570_vm4, 0, %v3263_v1  ;;  %v4769_v63 = vld [vmem:[%s6984_s11 + $0xa0] sm:$0xf]  ;;  %v5043_v0 = vld [vmem:[%s6984_s11 + $0xac] sm:$0xf0]  ;;  %v4714_v60 = vor.u32 %v5028_v58, %v4713_v55  ;;  %v5054_v55 = vld [vmem:[%s6173_s12 + $0x8] sm:$0xff] }
 0xa61   : > { %v3273_v4 = vpack.i.b16 %v3264_v28, %v3245_v3  ;;  %v3275_v7 = vshrl.u32 %v3264_v28, 16  ;;  %3353 = vmatpush.bf16.msra.mxu1 %v5015_v19  ;;  %3622 = vmatpush.bf16.msra.mxu0 %v4794_v22  ;;  %v5041_v1 = vld [vmem:[%s6984_s11 + $0xa4] sm:$0xf]  ;;  %v4771_v3 = vld [vmem:[%s6984_s11 + $0xb0] sm:$0xf0]  ;;  %v5062_v58 = vld [vmem:[%s6173_s12 + $0x48] sm:$0xff] }
 0xa62   : > { %v3277_v8 = vunpack.c.l.b16 %v3270_v6  ;;  %v4777_v6 = vld [vmem:[%s6984_s11 + $0xa8] sm:$0xf]  ;;  %v5044_v28 = vld [vmem:[%s6984_s11 + $0xb4] sm:$0xf0]  ;;  %v5038_v19 = vld [vmem:[%s6984_s11 + $0x8c] sm:$0xf] }
 0xa63   : > { %v3281_v10 = vunpack.c.l.b16 %v3273_v4  ;;  %v3276_v12 = vpack.i.b16 %v3275_v7, %v3274_v9  ;;  %v4774_v4 = vor.u32 %v5041_v1, %v4771_v3  ;;  %v4778_v7 = vor.u32 %v5044_v28, %v4777_v6  ;;  %v4779_v9 = vld [vmem:[%s6984_s11 + $0xb8] sm:$0xf0]  ;;  %v5026_v22 = vld [vmem:[%s6984_s11 + $0x2c] sm:$0xf]  ;;  %v4689_v24 = vld [vmem:[%s6984_s11] sm:$0xf] }
 0xa64   : > { %v3278_v18 = vpack.c.b16 %v3277_v8, %v3277_v8  ;;  %v5042_v8 = vld [vmem:[%s6984_s11 + $0xac] sm:$0xf]  ;;  %v4691_v1 = vld [vmem:[%s6984_s11 + $0x10] sm:$0xf0]  ;;  %v4697_v6 = vld [vmem:[%s6984_s11 + $0x8] sm:$0xf] }
 0xa65   : > { %v3282_v13 = vpack.c.b16 %v3281_v10, %v3281_v10  ;;  %v3285_v54 = vunpack.c.l.b16 %v3276_v12  ;;  %3354 = vmatpush.bf16.msra.mxu1 %v5014_v20  ;;  %v4782_v10 = vor.u32 %v5042_v8, %v4779_v9  ;;  %3610 = vmatpush.bf16.msrb.mxu3 %v4774_v4  ;;  %v5039_v12 = vld [vmem:[%s6984_s11 + $0x8c] sm:$0xf0]  ;;  %v4763_v20 = vld [vmem:[%s6984_s11 + $0x98] sm:$0xf0]  ;;  %v5024_v28 = vld [vmem:[%s6984_s11 + $0x14] sm:$0xf0] }
 0xa66   : > { %3279 = vrot.lane.b32.xlu2 %v3278_v18, %s5703_s17  ;;  %3623 = vmatpush.bf16.msra.mxu0 %v4778_v7  ;;  %v4753_v18 = vld [vmem:[%s6984_s11 + $0x80] sm:$0xf]  ;;  %v5022_v4 = vld [vmem:[%s6984_s11 + $0xc] sm:$0xf]  ;;  %v4698_v7 = vor.u32 %v5024_v28, %v4697_v6  ;;  %v4699_v8 = vld [vmem:[%s6984_s11 + $0x18] sm:$0xf0] }
 0xa67   : > { %3283 = vrot.lane.b32.xlu1 %v3282_v13, %s5705_s8  ;;  %v3286_v14 = vpack.c.b16 %v3285_v54, %v3285_v54  ;;  %v5037_v13 = vld [vmem:[%s6984_s11 + $0x84] sm:$0xf]  ;;  %v4754_v54 = vor.u32 %v5039_v12, %v4753_v18  ;;  %v4702_v9 = vor.u32 %v5022_v4, %v4699_v8  ;;  %v5076_v18 = vld [vmem:[%s6173_s12 + $0xb8] sm:$0xff]  ;;  %v5063_v2 = vld [vmem:[%s6173_s12 + $0x50] sm:$0xff] }
 0xa68   : > { %v5084_v12 = vld [vmem:[%s6173_s12 + $0xf8] sm:$0xff]  ;;  %v5077_v53 = vld [vmem:[%s6173_s12 + $0xc0] sm:$0xff] }
 0xa69   : > { %3355 = vmatpush.bf16.msra.mxu1 %v5013_v21  ;;  %v4766_v21 = vor.u32 %v5038_v19, %v4763_v20  ;;  %v5067_v19 = vld [vmem:[%s6173_s12 + $0x70] sm:$0xff]  ;;  %v5082_v20 = vld [vmem:[%s6173_s12 + $0xe8] sm:$0xff] }
 0xa6a   : > { %3624 = vmatpush.bf16.msra.mxu0 %v4762_v17  ;;  %v5059_v17 = vld [vmem:[%s6173_s12 + $0x30] sm:$0xff] }
 0xa6e   : > { %3287 = vrot.lane.b32.xlu2 %v3286_v14, %s5704_s19  ;;  %v4755_v14 = vld [vmem:[%s6984_s11 + $0x90] sm:$0xf0] }
 0xa6f   : > { %v4758_v43 = vor.u32 %v5037_v13, %v4755_v14  ;;  %v5068_v14 = vld [vmem:[%s6173_s12 + $0x78] sm:$0xff] }
 0xa71   : > { %3611 = vmatpush.bf16.msrb.mxu3 %v4758_v43 }
 0xac0   : > { %v3280_v46 = vpop.permute.xlu2 %3279 }
 0xac1   : > { %v3291_v23 = vsel %vm1906_vm5, %v3267_v5, %v3280_v46  ;;  %v4770_v5 = vor.u32 %v5043_v0, %v4769_v63  ;;  %v4737_v46 = vld [vmem:[%s6984_s11 + $0x60] sm:$0xf]  ;;  %v5023_v63 = vld [vmem:[%s6984_s11 + $0xc] sm:$0xf0]  ;;  %v5021_v0 = vld [vmem:[%s6984_s11 + $0x4] sm:$0xf] }
 0xac2   : > { %v4694_v3 = vor.u32 %v5021_v0, %v4691_v1 }
 0xac3   : > { %3597 = vmatpush.bf16.msra.mxu2 %v4770_v5  ;;  %v4690_v5 = vor.u32 %v5023_v63, %v4689_v24 }
 0xac7   : > { %3598 = vmatpush.bf16.msra.mxu2 %v4754_v54  ;;  %v5060_v54 = vld [vmem:[%s6173_s12 + $0x38] sm:$0xff] }
 0xac8   : > { %v3288_v47 = vpop.permute.xlu2 %3287 }
 0xad9   : > { %v3284_v25 = vpop.permute.xlu1 %3283 }
 0xada   : > { %v3293_v26 = vsel %vm2242_vm9, %v3291_v23, %v3284_v25  ;;  %v5035_v23 = vld [vmem:[%s6984_s11 + $0x6c] sm:$0xf0]  ;;  %v5033_v25 = vld [vmem:[%s6984_s11 + $0x64] sm:$0xf] }
 0xadb   : > { %v3295_v27 = vsel %vm2245_vm10, %v3293_v26, %v3288_v47  ;;  %v4738_v47 = vor.u32 %v5035_v23, %v4737_v46  ;;  %v4739_v26 = vld [vmem:[%s6984_s11 + $0x70] sm:$0xf0]  ;;  %v5066_v46 = vld [vmem:[%s6173_s12 + $0x68] sm:$0xff]  ;;  %v5073_v23 = vld [vmem:[%s6173_s12 + $0xa0] sm:$0xff] }
 0xadc   : > { %3356 = vmatmul.bf16.vlgmr.msra.gmra.mxu1 %v3295_v27  ;;  %v4745_v27 = vld [vmem:[%s6984_s11 + $0x68] sm:$0xf] }
 0xadd   : > { %3599 = vmatpush.bf16.msra.mxu2 %v4738_v47 }
 0xae1   : > { %3600 = vmatpush.bf16.msra.mxu2 %v4722_v39  ;;  %v5079_v39 = vld [vmem:[%s6173_s12 + $0xd0] sm:$0xff] }
 0xb59   : > { %v3357_v30 = vpop.f32.mrf.mxu1 }
 0xb5a   : > { %v3358_v31 = vadd.f32 %v5243_v29, %v3357_v30  ;;  %v5036_v29 = vld [vmem:[%s6984_s11 + $0x74] sm:$0xf0]  ;;  %v4742_v30 = vor.u32 %v5033_v25, %v4739_v26  ;;  %v5081_v25 = vld [vmem:[%s6173_s12 + $0xe0] sm:$0xff] }
 0xb5b   : > { %v5057_v26 = vld [vmem:[%s6173_s12 + $0x20] sm:$0xff] }
 0xb5c   : > { %v6656_v32 = vadd.f32 %v3358_v31, %v6416_v56  ;;  %v4814_v56 = vor.u32 %v5050_v57, %v4811_v44  ;;  %v4746_v31 = vor.u32 %v5036_v29, %v4745_v27  ;;  %3612 = vmatpush.bf16.msrb.mxu3 %v4742_v30  ;;  %v4726_v57 = vor.u32 %v5029_v38, %v4723_v40  ;;  %v5065_v27 = vld [vmem:[%s6173_s12 + $0x60] sm:$0xff]  ;;  %v5071_v38 = vld [vmem:[%s6173_s12 + $0x90] sm:$0xff] }
 0xb5d   : > { %v4730_v44 = vor.u32 %v5032_v42, %v4729_v41  ;;  %v5244_v41 = vld [vmem:[%s1226_s10] ss:$0 sm:$0xff]  ;;  %s6988_s10 = sld [smem:[#allocation30_spill]] }
 0xb5e   : > { %3364 = vadd.xlane.f32.xlu0 %v6656_v32  ;;  %3634 = vmatpush.bf16.msrb.mxu1 %v4814_v56  ;;  %v5030_v56 = vld [vmem:[%s6984_s11 + $0x4c] sm:$0xf] }
 0xb5f   : > { %3625 = vmatpush.bf16.msra.mxu0 %v4746_v31  ;;  %v5072_v31 = vld [vmem:[%s6173_s12 + $0x98] sm:$0xff] }
 0xb60   : > { %3613 = vmatpush.bf16.msrb.mxu3 %v4726_v57 }
 0xb61   : > { %v3359_v33 = vpop.f32.mrf.mxu1 }
 0xb62   : > { %3635 = vmatpush.bf16.msrb.mxu1 %v4798_v62  ;;  %v5034_v33 = vld [vmem:[%s6984_s11 + $0x6c] sm:$0xf]  ;;  %v4718_v62 = vor.u32 %v5026_v22, %v4715_v61  ;;  %v3425_v22 = vld [vmem:[%s6171_s0] sm:$0xf] }
 0xb63   : > { %v4750_v35 = vor.u32 %v5034_v33, %v4747_v34  ;;  %3626 = vmatpush.bf16.msra.mxu0 %v4730_v44  ;;  %v5080_v33 = vld [vmem:[%s6173_s12 + $0xd8] sm:$0xff]  ;;  %v5245_v44 = vld [vmem:[%s1229_s16] ss:$0 sm:$0xff]  ;;  %v3429_v61 = vperm.slane %v3425_v22, 2  ;;  %v3430_v24 = vperm.slane %v3425_v22, 3  ;;  %s4944_s1 = sshll.u32 %s6988_s10, 3 }
 0xb64   : > { %3614 = vmatpush.bf16.msrb.mxu3 %v4710_v59  ;;  %v5056_v34 = vld [vmem:[%s6173_s12 + $0x18] sm:$0xff]  ;;  %v5053_v59 = vld [vmem:[%s6173_s12] sm:$0xff]  ;;  %s3980_s2 = scalar_lea.hbm %s6991_s15, %s4944_s1 }
 0xb65   : > { %s3984_s9 = sshll.u32 %s3980_s2, 4  ;;  %s3985_s9 = int_to_ptr.hbm [resolvable:$true] %s3984_s9 }
 0xb66   : > { %3636 = vmatpush.bf16.msrb.mxu1 %v4782_v10  ;;  %s5572_s13 = sshra.s32 %s3985_s9, 4  ;;  %s5573_s13 = int_to_ptr.hbm [resolvable:$true] %s5572_s13 }
 0xb67   : > { %3627 = vmatpush.bf16.msra.mxu0 %v4714_v60  ;;  %v5061_v60 = vld [vmem:[%s6173_s12 + $0x40] sm:$0xff]  ;;  %s5574_s26 = scalar_lea.hbm %s5573_s13, 8  ;;  %p5579_p0 = scmp.lt.s32.totalorder %s5573_s13, %s6991_s15 }
 0xb68   : > { %3615 = vmatpush.bf16.msrb.mxu3 %v4694_v3  ;;  %v3428_v3 = vperm.slane %v3425_v22, 1  ;;  %p5575_p10 = scmp.ne.s32.totalorder %s5573_s13, %s5574_s26  ;;  %p5580_p1 = scmp.lt.s32.totalorder %s5578_s7, %s5574_s26 }
 0xb6a   : > { %3637 = vmatpush.bf16.msrb.mxu1 %v4766_v21  ;;  %v5058_v21 = vld [vmem:[%s6173_s12 + $0x28] sm:$0xff]  ;;  %p5576_p11 = pnand %p5575_p10, %p5916_p12  ;;  %p5581_p4 = por %p5580_p1, %p5579_p0 }
 0xb6b   : > { %3628 = vmatpush.bf16.msra.mxu0 %v4698_v7 }
 0xb6c   : > { %3928 = vmatpush.bf16.msra.mxu3 %v5068_v14  ;;  %p5577_p13 = pneg %p5576_p11 }
 0xb6e   : > { %3638 = vmatpush.bf16.msrb.mxu1 %v4750_v35  ;;  %v5064_v35 = vld [vmem:[%s6173_s12 + $0x58] sm:$0xff]  ;;  %p5582_p3 = pnand %p5581_p4, %p5577_p13 }
 0xb6f   : > { %3941 = vmatpush.bf16.msrb.mxu0 %v5076_v18 }
 0xb70   : > { %3929 = vmatpush.bf16.msra.mxu3 %v5067_v19 }
 0xb73   : > { %3942 = vmatpush.bf16.msrb.mxu0 %v5075_v15 }
 0xb74   : > { %3930 = vmatpush.bf16.msra.mxu3 %v5066_v46  ;;  %v5246_v46 = vld [vmem:[%s1236_s27] ss:$0 sm:$0xff]  ;;  %s3970_s27 = scalar_lea.sflag [#allocation4], %s6993_s22 }
 0xb78   : > { %3931 = vmatpush.bf16.msra.mxu3 %v5065_v27 }
 0xb7c   : > { %3932 = vmatpush.bf16.msra.mxu3 %v5064_v35 }
 0xb80   : > { %3933 = vmatpush.bf16.msra.mxu3 %v5063_v2 }
 0xb84   : > { %3934 = vmatpush.bf16.msra.mxu3 %v5062_v58 }
 0xb88   : > { %3935 = vmatpush.bf16.msra.mxu3 %v5061_v60 }
 0xbd1   : > { %v3365_v45 = vpop.xlane.xlu0 %3364 }
 0xbd2   : > { %v3366_v48 = vmul.f32 %v3365_v45, %v6183_v11  ;;  %v4731_v45 = vld [vmem:[%s6984_s11 + $0x58] sm:$0xf0] }
 0xbd4   : > { %v6669_v49 = vsub.f32 %v6656_v32, %v3366_v48  ;;  %v4734_v48 = vor.u32 %v5030_v56, %v4731_v45 }
 0xbd6   : > { %v3368_v50 = vmul.f32 %v6669_v49, %v6669_v49  ;;  %3639 = vmatpush.bf16.msrb.mxu1 %v4734_v48 }
 0xbd8   : > { %3369 = vadd.xlane.f32.xlu2 %v3368_v50  ;;  %v4705_v50 = vld [vmem:[%s6984_s11 + $0x20] sm:$0xf] }
 0xbd9   : > { %v4706_v52 = vor.u32 %v5027_v51, %v4705_v50  ;;  %v5070_v50 = vld [vmem:[%s6173_s12 + $0x88] sm:$0xff] }
 0xbda   : > { %3640 = vmatpush.bf16.msrb.mxu1 %v4718_v62  ;;  %v5078_v51 = vld [vmem:[%s6173_s12 + $0xc8] sm:$0xff] }
 0xbdb   : > { %3601 = vmatpush.bf16.msra.mxu2 %v4706_v52  ;;  %v5069_v52 = vld [vmem:[%s6173_s12 + $0x80] sm:$0xff] }
 0xbde   : > { %3641 = vmatpush.bf16.msrb.mxu1 %v4702_v9 }
 0xbdf   : > { %3602 = vmatpush.bf16.msra.mxu2 %v4690_v5  ;;  %v3427_v5 = vperm.slane %v3425_v22, 0 }
 0xbe2   : > { %3954 = vmatpush.bf16.msra.mxu1 %v5084_v12 }
 0xbe3   : > { %3915 = vmatpush.bf16.msrb.mxu2 %v5060_v54 }
 0xbe6   : > { %3955 = vmatpush.bf16.msra.mxu1 %v5083_v16 }
 0xbe7   : > { %3916 = vmatpush.bf16.msrb.mxu2 %v5059_v17 }
 0xbea   : > { %3956 = vmatpush.bf16.msra.mxu1 %v5082_v20 }
 0xbeb   : > { %3917 = vmatpush.bf16.msrb.mxu2 %v5058_v21 }
 0xbee   : > { %3957 = vmatpush.bf16.msra.mxu1 %v5081_v25 }
 0xbef   : > { %3918 = vmatpush.bf16.msrb.mxu2 %v5057_v26 }
 0xbf2   : > { %3958 = vmatpush.bf16.msra.mxu1 %v5080_v33 }
 0xbf3   : > { %3919 = vmatpush.bf16.msrb.mxu2 %v5056_v34 }
 0xbf6   : > { %3959 = vmatpush.bf16.msra.mxu1 %v5079_v39 }
 0xbfa   : > { %3960 = vmatpush.bf16.msra.mxu1 %v5078_v51 }
 0xbfe   : > { %3961 = vmatpush.bf16.msra.mxu1 %v5077_v53 }
 0xc4b   : > { %v3370_v10 = vpop.xlane.xlu2 %3369 }
 0xc4c   : > { %v3371_v13 = vmul.f32 %v3370_v10, %v6183_v11  ;;  %v5074_v11 = vld [vmem:[%s6173_s12 + $0xa8] sm:$0xff] }
 0xc4d   : > { %3943 = vmatpush.bf16.msrb.mxu0 %v5074_v11 }
 0xc4e   : > { %v3372_v43 = vadd.f32 1e-05, %v3371_v13 }
 0xc50   : > { %5285 = vrsqrt.f32 %v3372_v43  ;;  %vm3379_vm15 = vweird.f32 %v3372_v43 }
 0xc51   : > { %3944 = vmatpush.bf16.msrb.mxu0 %v5073_v23 }
 0xc55   : > { %3945 = vmatpush.bf16.msrb.mxu0 %v5072_v31 }
 0xc56   : > { %v5286_v47 = vpop.eup %5285 }
 0xc57   : > { %v3374_v29 = vmul.f32 %v5286_v47, %v3372_v43  ;;  %vm3380_vm14 = vweird.f32 %v5286_v47 }
 0xc58   : > { %vm3381_vm0 = vmor %vm3379_vm15, %vm3380_vm14 }
 0xc59   : > { %v3375_v30 = vmul.f32 %v5286_v47, %v3374_v29  ;;  %3946 = vmatpush.bf16.msrb.mxu0 %v5071_v38 }
 0xc5b   : > { %v3376_v36 = vmul.f32 0.5, %v3375_v30 }
 0xc5d   : > { %v3377_v37 = vsub.f32 1.5, %v3376_v36  ;;  %3947 = vmatpush.bf16.msrb.mxu0 %v5070_v50 }
 0xc5f   : > { %v3378_v40 = vmul.f32 %v5286_v47, %v3377_v37 }
 0xc61   : > { %v3382_v42 = vsel %vm3381_vm0, %v5286_v47, %v3378_v40  ;;  %3948 = vmatpush.bf16.msrb.mxu0 %v5069_v52 }
 0xc62   : > { %v3383_v57 = vmul.f32 %v3382_v42, %v6669_v49  ;;  %v5055_v49 = vld [vmem:[%s6173_s12 + $0x10] sm:$0xff] }
 0xc63   : > { %3920 = vmatpush.bf16.msrb.mxu2 %v5055_v49 }
 0xc64   : > { %v3387_v56 = vmul.f32 %v5244_v41, %v3383_v57 }
 0xc66   : > { %v3391_v45 = vadd.f32 %v5245_v44, %v3387_v56 }
 0xc67   : > { %3921 = vmatpush.bf16.msrb.mxu2 %v5054_v55 }
 0xc68   : > { %v3392_v48 = vpack.c.bf16 %v3391_v45, %v3391_v45 }
 0xc6a   : > { %3603 = vmatmul.bf16.vlgmr.msra.gmra.mxu2 %v3392_v48  ;;  %3616 = vmatmul.bf16.vlgmr.msrb.gmra.mxu3 %v3392_v48 }
 0xc6b   : > { %3629 = vmatmul.bf16.vlgmr.msra.gmra.mxu0 %v3392_v48  ;;  %3642 = vmatmul.bf16.vlgmr.msrb.gmra.mxu1 %v3392_v48 }
 0xc6c   : > { %3922 = vmatpush.bf16.msrb.mxu2 %v5053_v59 }
 0xce8   : > { %v3630_v62 = vpop.f32.mrf.mxu0  ;;  %v3643_v63 = vpop.f32.mrf.mxu1 }
 0xce9   : > { %v3631_v0 = vadd.f32 %v3630_v62, %v3429_v61  ;;  %v3644_v1 = vadd.f32 %v3643_v63, %v3430_v24 }
 0xceb   : > { %v3649_v6 = vmax.f32 %v3631_v0, 0.0  ;;  %v3650_v28 = vmax.f32 %v3644_v1, 0.0 }
 0xced   : > { %v3653_v4 = vpack.c.bf16 %v3649_v6, %v3649_v6  ;;  %v3654_v7 = vpack.c.bf16 %v3650_v28, %v3650_v28  ;;  %v3604_v8 = vpop.f32.mrf.mxu2  ;;  %v3617_v9 = vpop.f32.mrf.mxu3 }
 0xcee   : > { %v3605_v10 = vadd.f32 %v3604_v8, %v3427_v5  ;;  %v3618_v18 = vadd.f32 %v3617_v9, %v3428_v3 }
 0xcef   : > { %3949 = vmatmul.bf16.vlgmr.msrb.gmra.mxu0 %v3653_v4  ;;  %3962 = vmatmul.bf16.vlgmr.msra.gmra.mxu1 %v3654_v7 }
 0xcf0   : > { %v3647_v12 = vmax.f32 %v3605_v10, 0.0  ;;  %v3648_v13 = vmax.f32 %v3618_v18, 0.0  ;;  %v3632_v54 = vpop.f32.mrf.mxu0  ;;  %v3645_v14 = vpop.f32.mrf.mxu1 }
 0xcf2   : > { %v3651_v15 = vpack.c.bf16 %v3647_v12, %v3647_v12  ;;  %v3652_v16 = vpack.c.bf16 %v3648_v13, %v3648_v13 }
 0xcf4   : > { %3923 = vmatmul.bf16.vlgmr.msrb.gmra.mxu2 %v3651_v15  ;;  %3936 = vmatmul.bf16.vlgmr.msra.gmra.mxu3 %v3652_v16 }
 0xcf5   : > { %v3606_v43 = vpop.f32.mrf.mxu2  ;;  %v3619_v17 = vpop.f32.mrf.mxu3 }
 0xd6c   : > { %v3950_v19 = vpop.f32.mrf.mxu0  ;;  %v3963_v11 = vpop.f32.mrf.mxu1 }
 0xd74   : > { %v3952_v20 = vpop.f32.mrf.mxu0  ;;  %v3965_v21 = vpop.f32.mrf.mxu1 }
 0xd77   : > { %v3924_v23 = vpop.f32.mrf.mxu2  ;;  %v3937_v25 = vpop.f32.mrf.mxu3 }
 0xd78   : > { %v3925_v47 = vadd.f32 %v5246_v46, %v3924_v23 }
 0xd7a   : > { %v3938_v26 = vadd.f32 %v3937_v25, %v3925_v47 }
 0xd7c   : > { %v3951_v27 = vadd.f32 %v3950_v19, %v3938_v26 }
 0xd7e   : > { %v3964_v29 = vadd.f32 %v3963_v11, %v3951_v27 }
 0xd7f   : > { %v3926_v30 = vpop.f32.mrf.mxu2  ;;  %v3939_v31 = vpop.f32.mrf.mxu3 }
 0xd80   : > { %v3967_v33 = vadd.f32 %v3964_v29, %v6656_v32 }
 0xd82   : > { %3968 = vst [vmem:[%s6175_s14] sm:$0xff] %v3967_v33 }
 0xd83   : > { %5585 = shalt.err (!%p5582_p3)
}
 0xd84   : > { %5103 = dma.vmem_to_hbm [thread:$0]  (%p5916_p12), %s3983_s23, 128, %s3985_s9, %s3970_s27  }
 0xd85 PF: > { %s6994_s14 = sld [smem:[#allocation33_spill]] }
 0xd86   : > { %s6995_s18 = sld [smem:[#allocation24_spill]] }
 0xd8b   : > { %p5138_p5 = scmp.ge.s32.totalorder %s6994_s14, 2 }
 0xd8c   : > { %s3996_s5 = sand.u32 1, %s6995_s18  }
 0xd8d   : > { %p5134_p6 = pnand %p5138_p5, %p5926_p2  ;;  %s3997_s17 = scalar_lea.sflag [#allocation4], %s3996_s5 }
 0xd8f   : > { %p5135_p7 = pneg %p5134_p6 }
 0xd91   : > { %5651 = dma.done.wait (%p5135_p7), %s3997_s17, 128  }
 0xd92   : > { %5653 = vsyncadd (%p5135_p7), %s3997_s17, 4294967168  ;;  %s50_s6 = sadd.s32 1, %s6994_s14   ;;  %s6997_s3 = sld [smem:[#allocation25_spill]] }
 0xd93   : > { %p47_p9 = scmp.ge.s32.totalorder %s50_s6, 6   ;;  %s6998_s28 = sld [smem:[#allocation26_spill]] }
 0xd94   : > { %s6999_s29 = sld [smem:[#allocation37_spill]] }
 0xd95   : > { %s7000_s30 = sld [smem:[#allocation27_spill]] }
 0xd96   : > { %s7001_s4 = sld [smem:[#allocation28_spill]] }
 0xd97   : > { %s7002_s0 = sld [smem:[#allocation36_spill]]  ;;  %49 = sbr.rel (!%p47_p9) target bundleno = 41 (0x29), region = 292 }
 0xd98   : > { %s7003_s23 = sld [smem:[#allocation31_spill]] }
 0xd99   : > { %s7004_s1 = sld [smem:[#allocation32_spill]] }
 0xd9a   : > { %s7005_s5 = sld [smem:[#allocation34_spill]] }
 0xd9b   : > { %s7006_s24 = sld [smem:[#allocation35_spill]] }
 0xd9c   :  { %4003 = vsyncpa [#allocation3], 1 }
 0xd9d   :  { %4005 = vsyncpa [#allocation3 + $0x1], 1 }
 0xd9e   :  { %4006 = vsyncpa [#allocation6], 1 }
 0xd9f   :  { %4008 = vsyncpa [#allocation6 + $0x1], 1 }
 0xda0   :  { %4009 = vsyncpa [#allocation9], 1 }
 0xda1   :  { %4011 = vsyncpa [#allocation9 + $0x1], 1 }
 0xda2   :  { %4012 = vsyncpa [#allocation12], 1 }
 0xda3   :  { %4014 = vsyncpa [#allocation12 + $0x1], 1 }
 0xda4   :  { %4015 = vsyncpa [#allocation15], 1 }
 0xda5   :  { %4017 = vsyncpa [#allocation15 + $0x1], 1 }
 0xda6   :  { %4018 = vsyncpa [#allocation4], 1 }
 0xda7   :  { %4020 = vsyncpa [#allocation4 + $0x1], 1 }

</bundles_post_ra>
